<compile_context>
chip_gen: v6e
topology: v6e:2x2x1
jax: 0.10.0
libtpu: 0.0.40
codegen_flags: <defaults>
</compile_context>

<pallas_src>
import math
from functools import partial

import jax
import jax.numpy as jnp
from jax import lax
from jax.experimental import pallas as pl
from jax.experimental.pallas import tpu as pltpu


# ------------------------------ Pallas kernel ------------------------------


def _bimamba_kernel(
    x_ref,        # (N, d_model)            bf16   N = L*tb rows, time-major (row = t*tb + j)
    in_w_ref,     # (d_model, 2*d_inner)    bf16   tied in_proj  (pre-transposed)
    in_b_ref,     # (1, 2*d_inner)          f32
    out_w_ref,    # (d_inner, d_model_pad)  bf16   tied out_proj (pre-transposed, lane-padded)
    out_b_ref,    # (1, d_model_pad)        f32    out_b_fwd + out_b_rev
    # forward-direction params
    cw_f_ref, cb_f_ref, xp_f_ref, dtw_f_ref, dtb_f_ref, at_f_ref, d_f_ref,
    # reverse-direction params
    cw_r_ref, cb_r_ref, xp_r_ref, dtw_r_ref, dtb_r_ref, at_r_ref, d_r_ref,
    o_ref,        # (N, d_model_pad)        f32
    xpad_scr,     # (N + 2*(d_conv-1)*tb, d_inner) f32  conv input, zero-padded in time
    z_scr,        # (N, d_inner)    f32  silu(z) gate
    xc_scr,       # (N, d_inner)    f32  conv+SiLU output (reused per direction)
    dl_scr,       # (N, d_inner)    f32  softplus(dt)
    bc_scr,       # (N, 2*d_state)  f32  [B | C]
    y_scr,        # (N, d_inner)    f32  y_fwd + y_rev accumulator
    *, seq_len, n_seq, chunk,
):
    L, tb, Tc = seq_len, n_seq, chunk
    N = L * tb
    d_conv, d_inner = cw_f_ref.shape
    d_state = at_f_ref.shape[0]
    dt_rank = dtw_f_ref.shape[0]
    cpad = d_conv - 1
    pad_rows = cpad * tb
    rows_c = Tc * tb
    n_chunks = L // Tc

    # ---------- tied input projection (shared by both directions) ----------
    xz = jnp.dot(x_ref[...], in_w_ref[...],
                 preferred_element_type=jnp.float32) + in_b_ref[...]

    # stage x (conv/scan input, time-padded) and the SiLU gate in explicit VMEM
    # scratch so they are not held live in vregs across both direction passes.
    if cpad > 0:
        xpad_scr[pl.ds(0, pad_rows), :] = jnp.zeros((pad_rows, d_inner), jnp.float32)
        xpad_scr[pl.ds(pad_rows + N, pad_rows), :] = jnp.zeros(
            (pad_rows, d_inner), jnp.float32)
    xpad_scr[pl.ds(pad_rows, N), :] = xz[:, :d_inner]
    z = xz[:, d_inner:]
    z_scr[...] = z * jax.nn.sigmoid(z)

    def run_direction(cw_ref, cb_ref, xp_ref, dtw_ref, dtb_ref, at_ref, dd_ref,
                      reverse, accumulate):
        # -- depthwise conv along time + SiLU --------------------------------
        # time-major layout: shifting s timesteps == shifting s*tb rows; the
        # zero-padded head/tail of xpad_scr provides the causal (fwd) /
        # anti-causal (rev) boundary, so no masks are needed.
        acc = jnp.zeros((N, d_inner), jnp.float32)
        for k in range(d_conv):
            s = cpad - k                               # tap distance in time
            off = (cpad + s) * tb if reverse else (cpad - s) * tb
            acc = acc + xpad_scr[pl.ds(off, N), :] * cw_ref[k][None, :]
        xc = acc + cb_ref[...]
        xc = xc * jax.nn.sigmoid(xc)                   # SiLU, f32
        xc_scr[...] = xc

        # -- x_proj -> (dt, B, C), dt_proj + softplus (kept f32: feeds exp) ---
        x_dbl = jnp.dot(xc, xp_ref[...], preferred_element_type=jnp.float32)
        dt = jnp.dot(x_dbl[:, :dt_rank], dtw_ref[...],
                     preferred_element_type=jnp.float32) + dtb_ref[...]
        dl_scr[...] = jax.nn.softplus(dt)
        bc_scr[...] = x_dbl[:, dt_rank:]               # [B | C] lane-packed

        # -- selective scan, batched over the tb packed sequences -------------
        # state h: (tb, d_state, d_inner), d_inner on the 128-lane axis.
        at = at_ref[...]                               # (d_state, d_inner) == A^T
        dv = dd_ref[...]                               # (1, d_inner)

        def chunk_body(ci, h):
            c = (n_chunks - 1 - ci) if reverse else ci
            r0 = c * rows_c
            if rows_c % 8 == 0:
                r0 = pl.multiple_of(r0, 8)
            # bulk chunk loads (independent of the serial recurrence chain)
            xc_c = xc_scr[pl.ds(r0, rows_c), :]        # (Tc*tb, d_inner)
            dl_c = dl_scr[pl.ds(r0, rows_c), :]
            bc_c = bc_scr[pl.ds(r0, rows_c), :]        # (Tc*tb, 2*d_state)
            y_prev = y_scr[pl.ds(r0, rows_c), :] if accumulate else None

            ys = [None] * Tc
            for step in range(Tc):                     # unrolled recurrence
                t = (Tc - 1 - step) if reverse else step
                r = t * tb
                xc_t = xc_c[r:r + tb, :]               # (tb, d_inner)
                dl_t = dl_c[r:r + tb, :]
                b_t = bc_c[r:r + tb, :d_state][:, :, None]        # (tb, d_state, 1)
                c_t = bc_c[r:r + tb, d_state:][:, :, None]
                dA = jnp.exp(dl_t[:, None, :] * at[None, :, :])   # (tb, d_state, d_inner)
                dBx = b_t * (dl_t * xc_t)[:, None, :]
                h = dA * h + dBx                       # 2 VPU ops on the chain
                ys[t] = jnp.sum(h * c_t, axis=1) + dv * xc_t      # (tb, d_inner)

            y_c = jnp.concatenate(ys, axis=0)          # (Tc*tb, d_inner), time order
            if accumulate:
                y_c = y_c + y_prev
            y_scr[pl.ds(r0, rows_c), :] = y_c          # chunk-sized lane-dense store
            return h

        lax.fori_loop(0, n_chunks, chunk_body,
                      jnp.zeros((tb, d_state, d_inner), jnp.float32))

    run_direction(cw_f_ref, cb_f_ref, xp_f_ref, dtw_f_ref, dtb_f_ref,
                  at_f_ref, d_f_ref, reverse=False, accumulate=False)
    run_direction(cw_r_ref, cb_r_ref, xp_r_ref, dtw_r_ref, dtb_r_ref,
                  at_r_ref, d_r_ref, reverse=True, accumulate=True)

    # ---------- shared SiLU gate + single tied output projection -------------
    # out_b_ref already holds out_b_fwd + out_b_rev (each direction's out_proj
    # contributes its own bias in the reference).
    y = y_scr[...] * z_scr[...]
    o_ref[...] = jnp.dot(y.astype(jnp.bfloat16), out_w_ref[...],
                         preferred_element_type=jnp.float32) + out_b_ref[...]


# --------------------------- host-side packing ------------------------------


def _pack_shared(pf, pr, d_model_pad):
    """Tied in_proj / out_proj: pre-transpose, bf16, lane-pad out_proj.

    The fused kernel applies out_proj once to (y_fwd + y_rev), so the bias is
    the SUM of both directions' out_proj biases (== 2*out_b when weight-tied).
    """
    # TODO(synk): the fused kernel assumes bidirectional_weight_tie=True
    # (shared in_proj / out_proj); untied projections would need two matmuls.
    d_model, d_inner = pf["out_w"].shape
    out_wT = jnp.zeros((d_inner, d_model_pad), jnp.float32)
    out_wT = out_wT.at[:, :d_model].set(pf["out_w"].T)
    out_b = jnp.zeros((1, d_model_pad), jnp.float32)
    out_b = out_b.at[:, :d_model].set(pf["out_b"] + pr["out_b"])
    return (pf["in_w"].T.astype(jnp.bfloat16),         # (d_model, 2*d_inner)
            pf["in_b"].astype(jnp.float32),             # (1, 2*d_inner)
            out_wT.astype(jnp.bfloat16),                # (d_inner, d_model_pad)
            out_b)                                      # (1, d_model_pad)


def _pack_direction(p):
    """Per-direction params, pre-transposed into matmul/scan-friendly layouts.

    x_proj / dt_proj stay f32: they are tiny and feed softplus/exp.
    """
    return (p["conv_w"].T.astype(jnp.float32),             # (d_conv, d_inner)
            p["conv_b"].astype(jnp.float32),               # (1, d_inner)
            p["xproj_w"].T.astype(jnp.float32),            # (d_inner, dt_rank+2*d_state)
            p["dtproj_w"].T.astype(jnp.float32),           # (dt_rank, d_inner)
            p["dtproj_b"].astype(jnp.float32),             # (1, d_inner)
            (-jnp.exp(p["A_log"])).T.astype(jnp.float32),  # A^T (d_state, d_inner)
            p["D"].astype(jnp.float32))                    # (1, d_inner)


def bimamba_forward(hidden_states, params_fwd, params_rev, *,
                    bidirectional=True, bidirectional_strategy="add",
                    block_batch=None, time_chunk=None):
    """BiMambaWrapper.forward (bidirectional=True, 'add', tied in/out proj)."""
    if not (bidirectional and bidirectional_strategy == "add"):
        # TODO(synk): 'ew_multiply' and non-bidirectional configs are not fused
        # into this single kernel (they need separate out_proj applications).
        raise NotImplementedError("fused kernel covers bidirectional 'add' only")

    B, L, d_model = hidden_states.shape
    d_inner, d_conv = params_fwd["conv_w"].shape
    d_state = params_fwd["A_log"].shape[1]
    d_model_pad = ((d_model + 127) // 128) * 128

    # ----- per-block VMEM estimate (scratch + double-buffered I/O blocks) -----
    def _block_bytes(tb):
        n = tb * L
        scr = 4 * (4 * n * d_inner                       # z, xc, dl, y (f32)
                   + (n + 2 * (d_conv - 1) * tb) * d_inner
                   + n * 2 * d_state)
        io = 2 * n * d_model * 2 + 2 * n * d_model_pad * 4
        return scr + io

    budget = 40 << 20            # keep block-local VMEM v7x-safe (64 MiB physical)

    # ----- choose tb (sequences packed per grid step) -------------------------
    if block_batch is not None:
        tb = block_batch
    else:
        candidates = [t for t in range(B, 0, -1)
                      if B % t == 0 and ((t * L) % 8 == 0 or t == B)]
        fitting = [t for t in candidates if _block_bytes(t) <= budget]
        pool = fitting if fitting else candidates
        tb = pool[0]
        if tb == B and B > 1:
            # prefer >= 2 grid steps so the 'parallel' axis feeds both v7x cores
            smaller = [t for t in pool if t <= B // 2]
            if smaller:
                tb = smaller[0]
    # TODO(synk): sequences so long that even tb=1 exceeds the VMEM budget need a
    # second ('arbitrary') time-tiled grid axis carrying the scan state.
    n_rows = tb * L

    # ----- time chunk for the scan (amortizes per-step overhead / stores) -----
    if time_chunk is None:
        time_chunk = 8
    Tc = max(t for t in range(1, min(L, time_chunk) + 1) if L % t == 0)

    weights = list(_pack_shared(params_fwd, params_rev, d_model_pad)) \
        + list(_pack_direction(params_fwd)) \
        + list(_pack_direction(params_rev))

    # time-major row layout within each block: row = t*tb + j
    x_tm = hidden_states.reshape(B // tb, tb, L, d_model)
    x_tm = jnp.transpose(x_tm, (0, 2, 1, 3)).reshape(B * L, d_model)
    x_tm = x_tm.astype(jnp.bfloat16)

    def _w_spec(a):
        # constant weights: same block every grid step
        # TODO(synk): pipeline_mode=pl.Buffered(1) would single-buffer these.
        return pl.BlockSpec(a.shape, lambda b: (0, 0))

    grid_spec = pltpu.PrefetchScalarGridSpec(
        num_scalar_prefetch=0,
        grid=(B // tb,),
        in_specs=[pl.BlockSpec((n_rows, d_model), lambda b: (b, 0))]
                 + [_w_spec(a) for a in weights],
        out_specs=pl.BlockSpec((n_rows, d_model_pad), lambda b: (b, 0)),
        scratch_shapes=[
            pltpu.VMEM((n_rows + 2 * (d_conv - 1) * tb, d_inner), jnp.float32),
            pltpu.VMEM((n_rows, d_inner), jnp.float32),      # silu(z)
            pltpu.VMEM((n_rows, d_inner), jnp.float32),      # xc (conv+SiLU)
            pltpu.VMEM((n_rows, d_inner), jnp.float32),      # softplus(dt)
            pltpu.VMEM((n_rows, 2 * d_state), jnp.float32),  # [B | C]
            pltpu.VMEM((n_rows, d_inner), jnp.float32),      # y accumulator
        ],
    )

    # ----- VMEM limit derived from shapes, capped per-generation --------------
    w_bytes = sum(int(a.size) * a.dtype.itemsize for a in weights)
    try:
        kind = jax.devices()[0].device_kind.lower()
    except Exception:  # pragma: no cover
        kind = ""
    phys_cap = (56 << 20) if "v7" in kind else (100 << 20)
    vmem_limit = 2 * _block_bytes(tb) + 2 * w_bytes + (16 << 20)
    vmem_limit = int(min(max(vmem_limit, 32 << 20), phys_cap))

    out2 = pl.pallas_call(
        partial(_bimamba_kernel, seq_len=L, n_seq=tb, chunk=Tc),
        out_shape=jax.ShapeDtypeStruct((B * L, d_model_pad), jnp.float32),
        grid_spec=grid_spec,
        compiler_params=pltpu.CompilerParams(
            dimension_semantics=("parallel",),   # batch blocks are independent
            vmem_limit_bytes=vmem_limit,
        ),
    )(x_tm, *weights)

    out = out2.reshape(B // tb, L, tb, d_model_pad)
    out = jnp.transpose(out, (0, 2, 1, 3)).reshape(B, L, d_model_pad)
    return out[:, :, :d_model]


# --------------------------- parameter init ---------------------------------


def init_mamba_params(key, d_model, d_inner, d_state, d_conv, dt_rank,
                      shared=None):
    """Deterministic synthetic Mamba parameters (PyTorch weight layout)."""
    ks = jax.random.split(key, 8)
    p = {}
    if shared is None:
        p["in_w"] = 0.1 * jax.random.normal(ks[0], (2 * d_inner, d_model), jnp.float32)
        p["in_b"] = 0.1 * jax.random.normal(ks[1], (1, 2 * d_inner), jnp.float32)
        p["out_w"] = 0.1 * jax.random.normal(ks[2], (d_model, d_inner), jnp.float32)
        p["out_b"] = 0.1 * jax.random.normal(ks[3], (1, d_model), jnp.float32)
    else:  # bidirectional_weight_tie=True: share in_proj / out_proj
        p["in_w"], p["in_b"] = shared["in_w"], shared["in_b"]
        p["out_w"], p["out_b"] = shared["out_w"], shared["out_b"]

    p["conv_w"] = 0.1 * jax.random.normal(ks[4], (d_inner, d_conv), jnp.float32)
    p["conv_b"] = 0.1 * jax.random.normal(ks[5], (1, d_inner), jnp.float32)
    p["xproj_w"] = 0.1 * jax.random.normal(
        ks[6], (dt_rank + 2 * d_state, d_inner), jnp.float32)
    p["dtproj_w"] = 0.5 * jax.random.normal(ks[7], (d_inner, dt_rank), jnp.float32)
    p["dtproj_b"] = jnp.full((1, d_inner), math.log(math.expm1(0.01)), jnp.float32)
    p["A_log"] = jnp.log(jnp.tile(jnp.arange(1, d_state + 1, dtype=jnp.float32),
                                  (d_inner, 1)))
    p["D"] = jnp.ones((1, d_inner), jnp.float32)
    return p


# --------------------------- pure-JAX reference ------------------------------


def _mamba_ref(h, p):
    d_inner, d_conv = p["conv_w"].shape
    d_state = p["A_log"].shape[1]
    dt_rank = p["dtproj_w"].shape[1]
    L = h.shape[1]

    xz = jnp.einsum("bld,ed->ble", h, p["in_w"]) + p["in_b"][0]
    x, z = xz[..., :d_inner], xz[..., d_inner:]
    xp = jnp.pad(x, ((0, 0), (d_conv - 1, 0), (0, 0)))
    xc = sum(xp[:, k:k + L, :] * p["conv_w"][:, k] for k in range(d_conv))
    xc = xc + p["conv_b"][0]
    xc = xc * jax.nn.sigmoid(xc)

    x_dbl = jnp.einsum("bld,ed->ble", xc, p["xproj_w"])
    dt = jnp.einsum("blr,er->ble", x_dbl[..., :dt_rank], p["dtproj_w"]) + p["dtproj_b"][0]
    delta = jax.nn.softplus(dt)
    Bm = x_dbl[..., dt_rank:dt_rank + d_state]
    Cm = x_dbl[..., dt_rank + d_state:]
    A = -jnp.exp(p["A_log"])

    def step(state, inp):
        d_t, x_t, b_t, c_t = inp
        dA = jnp.exp(d_t[:, :, None] * A[None])
        dBx = d_t[:, :, None] * b_t[:, None, :] * x_t[:, :, None]
        state = dA * state + dBx
        y = jnp.einsum("bds,bs->bd", state, c_t) + p["D"][0] * x_t
        return state, y

    init = jnp.zeros((h.shape[0], d_inner, d_state), jnp.float32)
    _, ys = lax.scan(step, init, (jnp.swapaxes(delta, 0, 1), jnp.swapaxes(xc, 0, 1),
                                  jnp.swapaxes(Bm, 0, 1), jnp.swapaxes(Cm, 0, 1)))
    y = jnp.swapaxes(ys, 0, 1) * (z * jax.nn.sigmoid(z))
    return jnp.einsum("bld,ed->ble", y, p["out_w"]) + p["out_b"][0]


def _bimamba_ref(h, pf, pr):
    out = _mamba_ref(h, pf)
    out_rev = jnp.flip(_mamba_ref(jnp.flip(h, 1), pr), 1)
    return out + out_rev


# --------------------------------- main --------------------------------------


if __name__ == "__main__":
    B, L, d_model = 4, 16, 32
    expand, d_state, d_conv = 2, 16, 4
    d_inner = expand * d_model
    dt_rank = math.ceil(d_model / 16)

    key = jax.random.PRNGKey(0)
    k_x, k_f, k_r = jax.random.split(key, 3)

    x = jax.random.normal(k_x, (B, L, d_model), jnp.float32)
    params_fwd = init_mamba_params(k_f, d_model, d_inner, d_state, d_conv, dt_rank)
    params_rev = init_mamba_params(k_r, d_model, d_inner, d_state, d_conv, dt_rank,
                                   shared=params_fwd)   # weight-tied in/out proj

    out = jax.jit(bimamba_forward)(x, params_fwd, params_rev)
    out = jax.block_until_ready(out)

    assert out.shape == x.shape and out.dtype == jnp.float32
    assert bool(jnp.all(jnp.isfinite(out)))

    # numerical check against a pure-JAX f32 reference (kernel uses bf16 for the
    # in_proj/out_proj MXU matmuls -> small documented precision delta)
    ref = _bimamba_ref(x, params_fwd, params_rev)
    err = float(jnp.max(jnp.abs(out - ref)))
    assert err < 5e-2, f"mismatch vs reference: {err}"

    print("KERNEL_OK")
</pallas_src>

<mosaic_0001>
module attributes {stable_mosaic.version = 11 : i64} {
  func.func @_bimamba_kernel(%arg0: i32, %arg1: memref<32x32xbf16, #tpu.memory_space<vmem>>, %arg2: memref<32x128xbf16, #tpu.memory_space<vmem>>, %arg3: memref<1x128xf32, #tpu.memory_space<vmem>>, %arg4: memref<64x128xbf16, #tpu.memory_space<vmem>>, %arg5: memref<1x128xf32, #tpu.memory_space<vmem>>, %arg6: memref<4x64xf32, #tpu.memory_space<vmem>>, %arg7: memref<1x64xf32, #tpu.memory_space<vmem>>, %arg8: memref<64x34xf32, #tpu.memory_space<vmem>>, %arg9: memref<2x64xf32, #tpu.memory_space<vmem>>, %arg10: memref<1x64xf32, #tpu.memory_space<vmem>>, %arg11: memref<16x64xf32, #tpu.memory_space<vmem>>, %arg12: memref<1x64xf32, #tpu.memory_space<vmem>>, %arg13: memref<4x64xf32, #tpu.memory_space<vmem>>, %arg14: memref<1x64xf32, #tpu.memory_space<vmem>>, %arg15: memref<64x34xf32, #tpu.memory_space<vmem>>, %arg16: memref<2x64xf32, #tpu.memory_space<vmem>>, %arg17: memref<1x64xf32, #tpu.memory_space<vmem>>, %arg18: memref<16x64xf32, #tpu.memory_space<vmem>>, %arg19: memref<1x64xf32, #tpu.memory_space<vmem>>, %arg20: memref<32x128xf32, #tpu.memory_space<vmem>>, %arg21: memref<44x64xf32, #tpu.memory_space<vmem>>, %arg22: memref<32x64xf32, #tpu.memory_space<vmem>>, %arg23: memref<32x64xf32, #tpu.memory_space<vmem>>, %arg24: memref<32x64xf32, #tpu.memory_space<vmem>>, %arg25: memref<32x32xf32, #tpu.memory_space<vmem>>, %arg26: memref<32x64xf32, #tpu.memory_space<vmem>>) attributes {dimension_semantics = [#tpu.dimension_semantics<parallel>], iteration_bounds = array<i64: 2>, scalar_prefetch = 0 : i64, scratch_operands = 6 : i64, tpu.core_type = #tpu.core_type<tc>, window_params = [{transform_indices = @transform_0, window_bounds = array<i64: 32, 32>}, {pipeline_mode = #tpu.pipeline_mode<synchronous>, transform_indices = @transform_1, window_bounds = array<i64: 32, 128>}, {pipeline_mode = #tpu.pipeline_mode<synchronous>, transform_indices = @transform_2, window_bounds = array<i64: 1, 128>}, {pipeline_mode = #tpu.pipeline_mode<synchronous>, transform_indices = @transform_3, window_bounds = array<i64: 64, 128>}, {pipeline_mode = #tpu.pipeline_mode<synchronous>, transform_indices = @transform_4, window_bounds = array<i64: 1, 128>}, {pipeline_mode = #tpu.pipeline_mode<synchronous>, transform_indices = @transform_5, window_bounds = array<i64: 4, 64>}, {pipeline_mode = #tpu.pipeline_mode<synchronous>, transform_indices = @transform_6, window_bounds = array<i64: 1, 64>}, {pipeline_mode = #tpu.pipeline_mode<synchronous>, transform_indices = @transform_7, window_bounds = array<i64: 64, 34>}, {pipeline_mode = #tpu.pipeline_mode<synchronous>, transform_indices = @transform_8, window_bounds = array<i64: 2, 64>}, {pipeline_mode = #tpu.pipeline_mode<synchronous>, transform_indices = @transform_9, window_bounds = array<i64: 1, 64>}, {pipeline_mode = #tpu.pipeline_mode<synchronous>, transform_indices = @transform_10, window_bounds = array<i64: 16, 64>}, {pipeline_mode = #tpu.pipeline_mode<synchronous>, transform_indices = @transform_11, window_bounds = array<i64: 1, 64>}, {pipeline_mode = #tpu.pipeline_mode<synchronous>, transform_indices = @transform_12, window_bounds = array<i64: 4, 64>}, {pipeline_mode = #tpu.pipeline_mode<synchronous>, transform_indices = @transform_13, window_bounds = array<i64: 1, 64>}, {pipeline_mode = #tpu.pipeline_mode<synchronous>, transform_indices = @transform_14, window_bounds = array<i64: 64, 34>}, {pipeline_mode = #tpu.pipeline_mode<synchronous>, transform_indices = @transform_15, window_bounds = array<i64: 2, 64>}, {pipeline_mode = #tpu.pipeline_mode<synchronous>, transform_indices = @transform_16, window_bounds = array<i64: 1, 64>}, {pipeline_mode = #tpu.pipeline_mode<synchronous>, transform_indices = @transform_17, window_bounds = array<i64: 16, 64>}, {pipeline_mode = #tpu.pipeline_mode<synchronous>, transform_indices = @transform_18, window_bounds = array<i64: 1, 64>}, {transform_indices = @transform_19, window_bounds = array<i64: 32, 128>}]} {
    %c0 = arith.constant 0 : index
    %c0_0 = arith.constant 0 : index
    %0 = vector.load %arg1[%c0, %c0_0] : memref<32x32xbf16, #tpu.memory_space<vmem>>, vector<32x32xbf16>
    %c0_1 = arith.constant 0 : index
    %c0_2 = arith.constant 0 : index
    %1 = vector.load %arg2[%c0_1, %c0_2] : memref<32x128xbf16, #tpu.memory_space<vmem>>, vector<32x128xbf16>
    %cst = arith.constant dense<0.000000e+00> : vector<32x128xf32>
    %2 = tpu.matmul %0, %1, %cst {dimension_numbers = #tpu.dot_dimension_numbers<[1], [0], [0], [1], [0, 0, 1, 1], [], []>} : vector<32x32xbf16>, vector<32x128xbf16>, vector<32x128xf32> -> vector<32x128xf32>
    %c0_3 = arith.constant 0 : index
    %c0_4 = arith.constant 0 : index
    %3 = vector.load %arg3[%c0_3, %c0_4] : memref<1x128xf32, #tpu.memory_space<vmem>>, vector<1x128xf32>
    %4 = vector.broadcast %3 : vector<1x128xf32> to vector<32x128xf32>
    %5 = arith.addf %2, %4 : vector<32x128xf32>
    %cst_5 = arith.constant 0.000000e+00 : f32
    %6 = vector.broadcast %cst_5 : f32 to vector<6x64xf32>
    %c0_6 = arith.constant 0 : index
    %c0_7 = arith.constant 0 : index
    %7 = vector.load %arg21[%c0_6, %c0_7] : memref<44x64xf32, #tpu.memory_space<vmem>>, vector<6x64xf32>
    tpu.vector_store %arg21[%c0_6, %c0_7], %6 {strides = array<i32>} : memref<44x64xf32, #tpu.memory_space<vmem>>, vector<6x64xf32>,
    %cst_8 = arith.constant 0.000000e+00 : f32
    %8 = vector.broadcast %cst_8 : f32 to vector<6x64xf32>
    %c38 = arith.constant 38 : index
    %c0_9 = arith.constant 0 : index
    %9 = vector.load %arg21[%c38, %c0_9] : memref<44x64xf32, #tpu.memory_space<vmem>>, vector<6x64xf32>
    tpu.vector_store %arg21[%c38, %c0_9], %8 {strides = array<i32>} : memref<44x64xf32, #tpu.memory_space<vmem>>, vector<6x64xf32>,
    %10 = vector.extract_strided_slice %5 {offsets = [0, 0], sizes = [32, 64], strides = [1, 1]} : vector<32x128xf32> to vector<32x64xf32>
    %c6 = arith.constant 6 : index
    %c0_10 = arith.constant 0 : index
    %11 = vector.load %arg21[%c6, %c0_10] : memref<44x64xf32, #tpu.memory_space<vmem>>, vector<32x64xf32>
    tpu.vector_store %arg21[%c6, %c0_10], %10 {strides = array<i32>} : memref<44x64xf32, #tpu.memory_space<vmem>>, vector<32x64xf32>,
    %12 = vector.extract_strided_slice %5 {offsets = [0, 64], sizes = [32, 64], strides = [1, 1]} : vector<32x128xf32> to vector<32x64xf32>
    %13 = arith.negf %12 : vector<32x64xf32>
    %14 = math.exp %13 : vector<32x64xf32>
    %cst_11 = arith.constant 1.000000e+00 : f32
    %15 = vector.broadcast %cst_11 : f32 to vector<32x64xf32>
    %16 = arith.addf %15, %14 : vector<32x64xf32>
    %17 = arith.divf %15, %16 : vector<32x64xf32>
    %18 = arith.mulf %12, %17 : vector<32x64xf32>
    %c0_12 = arith.constant 0 : index
    %c0_13 = arith.constant 0 : index
    %19 = vector.load %arg22[%c0_12, %c0_13] : memref<32x64xf32, #tpu.memory_space<vmem>>, vector<32x64xf32>
    tpu.vector_store %arg22[%c0_12, %c0_13], %18 {strides = array<i32>} : memref<32x64xf32, #tpu.memory_space<vmem>>, vector<32x64xf32>,
    %cst_14 = arith.constant 0.000000e+00 : f32
    %20 = vector.broadcast %cst_14 : f32 to vector<32x64xf32>
    %c0_15 = arith.constant 0 : index
    %c0_16 = arith.constant 0 : index
    %21 = vector.load %arg21[%c0_15, %c0_16] : memref<44x64xf32, #tpu.memory_space<vmem>>, vector<32x64xf32>
    %c0_17 = arith.constant 0 : index
    %c0_18 = arith.constant 0 : index
    %22 = vector.load %arg6[%c0_17, %c0_18] : memref<4x64xf32, #tpu.memory_space<vmem>>, vector<1x64xf32>
    %23 = vector.shape_cast %22 : vector<1x64xf32> to vector<64xf32>
    %24 = vector.shape_cast %23 : vector<64xf32> to vector<1x64xf32>
    %25 = vector.broadcast %24 : vector<1x64xf32> to vector<32x64xf32>
    %26 = arith.mulf %21, %25 : vector<32x64xf32>
    %27 = arith.addf %20, %26 : vector<32x64xf32>
    %c2 = arith.constant 2 : index
    %c0_19 = arith.constant 0 : index
    %28 = vector.load %arg21[%c2, %c0_19] : memref<44x64xf32, #tpu.memory_space<vmem>>, vector<32x64xf32>
    %c1 = arith.constant 1 : index
    %c0_20 = arith.constant 0 : index
    %29 = vector.load %arg6[%c1, %c0_20] : memref<4x64xf32, #tpu.memory_space<vmem>>, vector<1x64xf32>
    %30 = vector.shape_cast %29 : vector<1x64xf32> to vector<64xf32>
    %31 = vector.shape_cast %30 : vector<64xf32> to vector<1x64xf32>
    %32 = vector.broadcast %31 : vector<1x64xf32> to vector<32x64xf32>
    %33 = arith.mulf %28, %32 : vector<32x64xf32>
    %34 = arith.addf %27, %33 : vector<32x64xf32>
    %c4 = arith.constant 4 : index
    %c0_21 = arith.constant 0 : index
    %35 = vector.load %arg21[%c4, %c0_21] : memref<44x64xf32, #tpu.memory_space<vmem>>, vector<32x64xf32>
    %c2_22 = arith.constant 2 : index
    %c0_23 = arith.constant 0 : index
    %36 = vector.load %arg6[%c2_22, %c0_23] : memref<4x64xf32, #tpu.memory_space<vmem>>, vector<1x64xf32>
    %37 = vector.shape_cast %36 : vector<1x64xf32> to vector<64xf32>
    %38 = vector.shape_cast %37 : vector<64xf32> to vector<1x64xf32>
    %39 = vector.broadcast %38 : vector<1x64xf32> to vector<32x64xf32>
    %40 = arith.mulf %35, %39 : vector<32x64xf32>
    %41 = arith.addf %34, %40 : vector<32x64xf32>
    %c6_24 = arith.constant 6 : index
    %c0_25 = arith.constant 0 : index
    %42 = vector.load %arg21[%c6_24, %c0_25] : memref<44x64xf32, #tpu.memory_space<vmem>>, vector<32x64xf32>
    %c3 = arith.constant 3 : index
    %c0_26 = arith.constant 0 : index
    %43 = vector.load %arg6[%c3, %c0_26] : memref<4x64xf32, #tpu.memory_space<vmem>>, vector<1x64xf32>
    %44 = vector.shape_cast %43 : vector<1x64xf32> to vector<64xf32>
    %45 = vector.shape_cast %44 : vector<64xf32> to vector<1x64xf32>
    %46 = vector.broadcast %45 : vector<1x64xf32> to vector<32x64xf32>
    %47 = arith.mulf %42, %46 : vector<32x64xf32>
    %48 = arith.addf %41, %47 : vector<32x64xf32>
    %c0_27 = arith.constant 0 : index
    %c0_28 = arith.constant 0 : index
    %49 = vector.load %arg7[%c0_27, %c0_28] : memref<1x64xf32, #tpu.memory_space<vmem>>, vector<1x64xf32>
    %50 = vector.broadcast %49 : vector<1x64xf32> to vector<32x64xf32>
    %51 = arith.addf %48, %50 : vector<32x64xf32>
    %52 = arith.negf %51 : vector<32x64xf32>
    %53 = math.exp %52 : vector<32x64xf32>
    %cst_29 = arith.constant 1.000000e+00 : f32
    %54 = vector.broadcast %cst_29 : f32 to vector<32x64xf32>
    %55 = arith.addf %54, %53 : vector<32x64xf32>
    %56 = arith.divf %54, %55 : vector<32x64xf32>
    %57 = arith.mulf %51, %56 : vector<32x64xf32>
    %c0_30 = arith.constant 0 : index
    %c0_31 = arith.constant 0 : index
    %58 = vector.load %arg23[%c0_30, %c0_31] : memref<32x64xf32, #tpu.memory_space<vmem>>, vector<32x64xf32>
    tpu.vector_store %arg23[%c0_30, %c0_31], %57 {strides = array<i32>} : memref<32x64xf32, #tpu.memory_space<vmem>>, vector<32x64xf32>,
    %c0_32 = arith.constant 0 : index
    %c0_33 = arith.constant 0 : index
    %59 = vector.load %arg8[%c0_32, %c0_33] : memref<64x34xf32, #tpu.memory_space<vmem>>, vector<64x34xf32>
    %cst_34 = arith.constant dense<0.000000e+00> : vector<32x34xf32>
    %60 = tpu.matmul %57, %59, %cst_34 {dimension_numbers = #tpu.dot_dimension_numbers<[1], [0], [0], [1], [0, 0, 1, 1], [], []>} : vector<32x64xf32>, vector<64x34xf32>, vector<32x34xf32> -> vector<32x34xf32>
    %61 = vector.extract_strided_slice %60 {offsets = [0, 0], sizes = [32, 2], strides = [1, 1]} : vector<32x34xf32> to vector<32x2xf32>
    %c0_35 = arith.constant 0 : index
    %c0_36 = arith.constant 0 : index
    %62 = vector.load %arg9[%c0_35, %c0_36] : memref<2x64xf32, #tpu.memory_space<vmem>>, vector<2x64xf32>
    %cst_37 = arith.constant dense<0.000000e+00> : vector<32x64xf32>
    %63 = tpu.matmul %61, %62, %cst_37 {dimension_numbers = #tpu.dot_dimension_numbers<[1], [0], [0], [1], [0, 0, 1, 1], [], []>} : vector<32x2xf32>, vector<2x64xf32>, vector<32x64xf32> -> vector<32x64xf32>
    %c0_38 = arith.constant 0 : index
    %c0_39 = arith.constant 0 : index
    %64 = vector.load %arg10[%c0_38, %c0_39] : memref<1x64xf32, #tpu.memory_space<vmem>>, vector<1x64xf32>
    %65 = vector.broadcast %64 : vector<1x64xf32> to vector<32x64xf32>
    %66 = arith.addf %63, %65 : vector<32x64xf32>
    %cst_40 = arith.constant 0.000000e+00 : f32
    %67 = vector.broadcast %cst_40 : f32 to vector<32x64xf32>
    %68 = arith.maximumf %66, %67 : vector<32x64xf32>
    %69 = vector.broadcast %cst_40 : f32 to vector<32x64xf32>
    %70 = arith.subf %66, %69 : vector<32x64xf32>
    %71 = arith.cmpf one, %70, %70 : vector<32x64xf32>
    %72 = vector.broadcast %cst_40 : f32 to vector<32x64xf32>
    %73 = arith.addf %66, %72 : vector<32x64xf32>
    %74 = math.absf %70 : vector<32x64xf32>
    %cst_41 = arith.constant 0.000000e+00 : f32
    %75 = vector.broadcast %cst_41 : f32 to vector<32x64xf32>
    %76 = arith.subf %75, %74 : vector<32x64xf32>
    %77 = math.exp %76 : vector<32x64xf32>
    %78 = math.log1p %77 : vector<32x64xf32>
    %79 = arith.addf %68, %78 : vector<32x64xf32>
    %80 = arith.select %71, %73, %79 : vector<32x64xi1>, vector<32x64xf32>
    %c0_42 = arith.constant 0 : index
    %c0_43 = arith.constant 0 : index
    %81 = vector.load %arg24[%c0_42, %c0_43] : memref<32x64xf32, #tpu.memory_space<vmem>>, vector<32x64xf32>
    tpu.vector_store %arg24[%c0_42, %c0_43], %80 {strides = array<i32>} : memref<32x64xf32, #tpu.memory_space<vmem>>, vector<32x64xf32>,
    %82 = vector.extract_strided_slice %60 {offsets = [0, 2], sizes = [32, 32], strides = [1, 1]} : vector<32x34xf32> to vector<32x32xf32>
    %c0_44 = arith.constant 0 : index
    %c0_45 = arith.constant 0 : index
    %83 = vector.load %arg25[%c0_44, %c0_45] : memref<32x32xf32, #tpu.memory_space<vmem>>, vector<32x32xf32>
    tpu.vector_store %arg25[%c0_44, %c0_45], %82 {strides = array<i32>} : memref<32x32xf32, #tpu.memory_space<vmem>>, vector<32x32xf32>,
    %c0_46 = arith.constant 0 : index
    %c0_47 = arith.constant 0 : index
    %84 = vector.load %arg11[%c0_46, %c0_47] : memref<16x64xf32, #tpu.memory_space<vmem>>, vector<16x64xf32>
    %c0_48 = arith.constant 0 : index
    %c0_49 = arith.constant 0 : index
    %85 = vector.load %arg12[%c0_48, %c0_49] : memref<1x64xf32, #tpu.memory_space<vmem>>, vector<1x64xf32>
    %cst_50 = arith.constant 0.000000e+00 : f32
    %86 = vector.broadcast %cst_50 : f32 to vector<2x16x64xf32>
    %c0_i32 = arith.constant 0 : i32
    %c2_i32 = arith.constant 2 : i32
    %87 = arith.addi %c0_i32, %c2_i32 : i32
    %c1_i32 = arith.constant 1 : i32
    %88 = scf.for %arg27 = %c0_i32 to %87 step %c1_i32 iter_args(%arg28 = %86) -> (vector<2x16x64xf32>)  : i32 {
      %c16_i32 = arith.constant 16 : i32
      %168 = arith.muli %arg27, %c16_i32 : i32
      %169 = tpu.assume_multiple %168, 8 : i32
      %170 = arith.index_cast %169 : i32 to index
      %c0_105 = arith.constant 0 : index
      %171 = vector.load %arg23[%170, %c0_105] : memref<32x64xf32, #tpu.memory_space<vmem>>, vector<16x64xf32>
      %172 = arith.index_cast %169 : i32 to index
      %c0_106 = arith.constant 0 : index
      %173 = vector.load %arg24[%172, %c0_106] : memref<32x64xf32, #tpu.memory_space<vmem>>, vector<16x64xf32>
      %174 = arith.index_cast %169 : i32 to index
      %c0_107 = arith.constant 0 : index
      %175 = vector.load %arg25[%174, %c0_107] : memref<32x32xf32, #tpu.memory_space<vmem>>, vector<16x32xf32>
      %176 = vector.extract_strided_slice %171 {offsets = [0, 0], sizes = [2, 64], strides = [1, 1]} : vector<16x64xf32> to vector<2x64xf32>
      %177 = vector.extract_strided_slice %173 {offsets = [0, 0], sizes = [2, 64], strides = [1, 1]} : vector<16x64xf32> to vector<2x64xf32>
      %178 = vector.extract_strided_slice %175 {offsets = [0, 0], sizes = [2, 16], strides = [1, 1]} : vector<16x32xf32> to vector<2x16xf32>
      %179 = vector.shape_cast %178 : vector<2x16xf32> to vector<2x16x1xf32>
      %180 = vector.extract_strided_slice %175 {offsets = [0, 16], sizes = [2, 16], strides = [1, 1]} : vector<16x32xf32> to vector<2x16xf32>
      %181 = vector.shape_cast %180 : vector<2x16xf32> to vector<2x16x1xf32>
      %182 = vector.shape_cast %177 : vector<2x64xf32> to vector<2x1x64xf32>
      %183 = vector.shape_cast %84 : vector<16x64xf32> to vector<1x16x64xf32>
      %184 = vector.broadcast %182 : vector<2x1x64xf32> to vector<2x16x64xf32>
      %185 = vector.broadcast %183 : vector<1x16x64xf32> to vector<2x16x64xf32>
      %186 = arith.mulf %184, %185 : vector<2x16x64xf32>
      %187 = math.exp %186 : vector<2x16x64xf32>
      %188 = arith.mulf %177, %176 : vector<2x64xf32>
      %189 = vector.shape_cast %188 : vector<2x64xf32> to vector<2x1x64xf32>
      %190 = vector.broadcast %179 : vector<2x16x1xf32> to vector<2x16x64xf32>
      %191 = vector.broadcast %189 : vector<2x1x64xf32> to vector<2x16x64xf32>
      %192 = arith.mulf %190, %191 : vector<2x16x64xf32>
      %193 = arith.mulf %187, %arg28 : vector<2x16x64xf32>
      %194 = arith.addf %193, %192 : vector<2x16x64xf32>
      %195 = vector.broadcast %181 : vector<2x16x1xf32> to vector<2x16x64xf32>
      %196 = arith.mulf %194, %195 : vector<2x16x64xf32>
      %cst_108 = arith.constant dense<0.000000e+00> : vector<2x64xf32>
      %197 = vector.multi_reduction <add>, %196, %cst_108 [1] : vector<2x16x64xf32> to vector<2x64xf32>
      %198 = vector.broadcast %85 : vector<1x64xf32> to vector<2x64xf32>
      %199 = arith.mulf %198, %176 : vector<2x64xf32>
      %200 = arith.addf %197, %199 : vector<2x64xf32>
      %201 = vector.extract_strided_slice %171 {offsets = [2, 0], sizes = [2, 64], strides = [1, 1]} : vector<16x64xf32> to vector<2x64xf32>
      %202 = vector.extract_strided_slice %173 {offsets = [2, 0], sizes = [2, 64], strides = [1, 1]} : vector<16x64xf32> to vector<2x64xf32>
      %203 = vector.extract_strided_slice %175 {offsets = [2, 0], sizes = [2, 16], strides = [1, 1]} : vector<16x32xf32> to vector<2x16xf32>
      %204 = vector.shape_cast %203 : vector<2x16xf32> to vector<2x16x1xf32>
      %205 = vector.extract_strided_slice %175 {offsets = [2, 16], sizes = [2, 16], strides = [1, 1]} : vector<16x32xf32> to vector<2x16xf32>
      %206 = vector.shape_cast %205 : vector<2x16xf32> to vector<2x16x1xf32>
      %207 = vector.shape_cast %202 : vector<2x64xf32> to vector<2x1x64xf32>
      %208 = vector.shape_cast %84 : vector<16x64xf32> to vector<1x16x64xf32>
      %209 = vector.broadcast %207 : vector<2x1x64xf32> to vector<2x16x64xf32>
      %210 = vector.broadcast %208 : vector<1x16x64xf32> to vector<2x16x64xf32>
      %211 = arith.mulf %209, %210 : vector<2x16x64xf32>
      %212 = math.exp %211 : vector<2x16x64xf32>
      %213 = arith.mulf %202, %201 : vector<2x64xf32>
      %214 = vector.shape_cast %213 : vector<2x64xf32> to vector<2x1x64xf32>
      %215 = vector.broadcast %204 : vector<2x16x1xf32> to vector<2x16x64xf32>
      %216 = vector.broadcast %214 : vector<2x1x64xf32> to vector<2x16x64xf32>
      %217 = arith.mulf %215, %216 : vector<2x16x64xf32>
      %218 = arith.mulf %212, %194 : vector<2x16x64xf32>
      %219 = arith.addf %218, %217 : vector<2x16x64xf32>
      %220 = vector.broadcast %206 : vector<2x16x1xf32> to vector<2x16x64xf32>
      %221 = arith.mulf %219, %220 : vector<2x16x64xf32>
      %cst_109 = arith.constant dense<0.000000e+00> : vector<2x64xf32>
      %222 = vector.multi_reduction <add>, %221, %cst_109 [1] : vector<2x16x64xf32> to vector<2x64xf32>
      %223 = vector.broadcast %85 : vector<1x64xf32> to vector<2x64xf32>
      %224 = arith.mulf %223, %201 : vector<2x64xf32>
      %225 = arith.addf %222, %224 : vector<2x64xf32>
      %226 = vector.extract_strided_slice %171 {offsets = [4, 0], sizes = [2, 64], strides = [1, 1]} : vector<16x64xf32> to vector<2x64xf32>
      %227 = vector.extract_strided_slice %173 {offsets = [4, 0], sizes = [2, 64], strides = [1, 1]} : vector<16x64xf32> to vector<2x64xf32>
      %228 = vector.extract_strided_slice %175 {offsets = [4, 0], sizes = [2, 16], strides = [1, 1]} : vector<16x32xf32> to vector<2x16xf32>
      %229 = vector.shape_cast %228 : vector<2x16xf32> to vector<2x16x1xf32>
      %230 = vector.extract_strided_slice %175 {offsets = [4, 16], sizes = [2, 16], strides = [1, 1]} : vector<16x32xf32> to vector<2x16xf32>
      %231 = vector.shape_cast %230 : vector<2x16xf32> to vector<2x16x1xf32>
      %232 = vector.shape_cast %227 : vector<2x64xf32> to vector<2x1x64xf32>
      %233 = vector.shape_cast %84 : vector<16x64xf32> to vector<1x16x64xf32>
      %234 = vector.broadcast %232 : vector<2x1x64xf32> to vector<2x16x64xf32>
      %235 = vector.broadcast %233 : vector<1x16x64xf32> to vector<2x16x64xf32>
      %236 = arith.mulf %234, %235 : vector<2x16x64xf32>
      %237 = math.exp %236 : vector<2x16x64xf32>
      %238 = arith.mulf %227, %226 : vector<2x64xf32>
      %239 = vector.shape_cast %238 : vector<2x64xf32> to vector<2x1x64xf32>
      %240 = vector.broadcast %229 : vector<2x16x1xf32> to vector<2x16x64xf32>
      %241 = vector.broadcast %239 : vector<2x1x64xf32> to vector<2x16x64xf32>
      %242 = arith.mulf %240, %241 : vector<2x16x64xf32>
      %243 = arith.mulf %237, %219 : vector<2x16x64xf32>
      %244 = arith.addf %243, %242 : vector<2x16x64xf32>
      %245 = vector.broadcast %231 : vector<2x16x1xf32> to vector<2x16x64xf32>
      %246 = arith.mulf %244, %245 : vector<2x16x64xf32>
      %cst_110 = arith.constant dense<0.000000e+00> : vector<2x64xf32>
      %247 = vector.multi_reduction <add>, %246, %cst_110 [1] : vector<2x16x64xf32> to vector<2x64xf32>
      %248 = vector.broadcast %85 : vector<1x64xf32> to vector<2x64xf32>
      %249 = arith.mulf %248, %226 : vector<2x64xf32>
      %250 = arith.addf %247, %249 : vector<2x64xf32>
      %251 = vector.extract_strided_slice %171 {offsets = [6, 0], sizes = [2, 64], strides = [1, 1]} : vector<16x64xf32> to vector<2x64xf32>
      %252 = vector.extract_strided_slice %173 {offsets = [6, 0], sizes = [2, 64], strides = [1, 1]} : vector<16x64xf32> to vector<2x64xf32>
      %253 = vector.extract_strided_slice %175 {offsets = [6, 0], sizes = [2, 16], strides = [1, 1]} : vector<16x32xf32> to vector<2x16xf32>
      %254 = vector.shape_cast %253 : vector<2x16xf32> to vector<2x16x1xf32>
      %255 = vector.extract_strided_slice %175 {offsets = [6, 16], sizes = [2, 16], strides = [1, 1]} : vector<16x32xf32> to vector<2x16xf32>
      %256 = vector.shape_cast %255 : vector<2x16xf32> to vector<2x16x1xf32>
      %257 = vector.shape_cast %252 : vector<2x64xf32> to vector<2x1x64xf32>
      %258 = vector.shape_cast %84 : vector<16x64xf32> to vector<1x16x64xf32>
      %259 = vector.broadcast %257 : vector<2x1x64xf32> to vector<2x16x64xf32>
      %260 = vector.broadcast %258 : vector<1x16x64xf32> to vector<2x16x64xf32>
      %261 = arith.mulf %259, %260 : vector<2x16x64xf32>
      %262 = math.exp %261 : vector<2x16x64xf32>
      %263 = arith.mulf %252, %251 : vector<2x64xf32>
      %264 = vector.shape_cast %263 : vector<2x64xf32> to vector<2x1x64xf32>
      %265 = vector.broadcast %254 : vector<2x16x1xf32> to vector<2x16x64xf32>
      %266 = vector.broadcast %264 : vector<2x1x64xf32> to vector<2x16x64xf32>
      %267 = arith.mulf %265, %266 : vector<2x16x64xf32>
      %268 = arith.mulf %262, %244 : vector<2x16x64xf32>
      %269 = arith.addf %268, %267 : vector<2x16x64xf32>
      %270 = vector.broadcast %256 : vector<2x16x1xf32> to vector<2x16x64xf32>
      %271 = arith.mulf %269, %270 : vector<2x16x64xf32>
      %cst_111 = arith.constant dense<0.000000e+00> : vector<2x64xf32>
      %272 = vector.multi_reduction <add>, %271, %cst_111 [1] : vector<2x16x64xf32> to vector<2x64xf32>
      %273 = vector.broadcast %85 : vector<1x64xf32> to vector<2x64xf32>
      %274 = arith.mulf %273, %251 : vector<2x64xf32>
      %275 = arith.addf %272, %274 : vector<2x64xf32>
      %276 = vector.extract_strided_slice %171 {offsets = [8, 0], sizes = [2, 64], strides = [1, 1]} : vector<16x64xf32> to vector<2x64xf32>
      %277 = vector.extract_strided_slice %173 {offsets = [8, 0], sizes = [2, 64], strides = [1, 1]} : vector<16x64xf32> to vector<2x64xf32>
      %278 = vector.extract_strided_slice %175 {offsets = [8, 0], sizes = [2, 16], strides = [1, 1]} : vector<16x32xf32> to vector<2x16xf32>
      %279 = vector.shape_cast %278 : vector<2x16xf32> to vector<2x16x1xf32>
      %280 = vector.extract_strided_slice %175 {offsets = [8, 16], sizes = [2, 16], strides = [1, 1]} : vector<16x32xf32> to vector<2x16xf32>
      %281 = vector.shape_cast %280 : vector<2x16xf32> to vector<2x16x1xf32>
      %282 = vector.shape_cast %277 : vector<2x64xf32> to vector<2x1x64xf32>
      %283 = vector.shape_cast %84 : vector<16x64xf32> to vector<1x16x64xf32>
      %284 = vector.broadcast %282 : vector<2x1x64xf32> to vector<2x16x64xf32>
      %285 = vector.broadcast %283 : vector<1x16x64xf32> to vector<2x16x64xf32>
      %286 = arith.mulf %284, %285 : vector<2x16x64xf32>
      %287 = math.exp %286 : vector<2x16x64xf32>
      %288 = arith.mulf %277, %276 : vector<2x64xf32>
      %289 = vector.shape_cast %288 : vector<2x64xf32> to vector<2x1x64xf32>
      %290 = vector.broadcast %279 : vector<2x16x1xf32> to vector<2x16x64xf32>
      %291 = vector.broadcast %289 : vector<2x1x64xf32> to vector<2x16x64xf32>
      %292 = arith.mulf %290, %291 : vector<2x16x64xf32>
      %293 = arith.mulf %287, %269 : vector<2x16x64xf32>
      %294 = arith.addf %293, %292 : vector<2x16x64xf32>
      %295 = vector.broadcast %281 : vector<2x16x1xf32> to vector<2x16x64xf32>
      %296 = arith.mulf %294, %295 : vector<2x16x64xf32>
      %cst_112 = arith.constant dense<0.000000e+00> : vector<2x64xf32>
      %297 = vector.multi_reduction <add>, %296, %cst_112 [1] : vector<2x16x64xf32> to vector<2x64xf32>
      %298 = vector.broadcast %85 : vector<1x64xf32> to vector<2x64xf32>
      %299 = arith.mulf %298, %276 : vector<2x64xf32>
      %300 = arith.addf %297, %299 : vector<2x64xf32>
      %301 = vector.extract_strided_slice %171 {offsets = [10, 0], sizes = [2, 64], strides = [1, 1]} : vector<16x64xf32> to vector<2x64xf32>
      %302 = vector.extract_strided_slice %173 {offsets = [10, 0], sizes = [2, 64], strides = [1, 1]} : vector<16x64xf32> to vector<2x64xf32>
      %303 = vector.extract_strided_slice %175 {offsets = [10, 0], sizes = [2, 16], strides = [1, 1]} : vector<16x32xf32> to vector<2x16xf32>
      %304 = vector.shape_cast %303 : vector<2x16xf32> to vector<2x16x1xf32>
      %305 = vector.extract_strided_slice %175 {offsets = [10, 16], sizes = [2, 16], strides = [1, 1]} : vector<16x32xf32> to vector<2x16xf32>
      %306 = vector.shape_cast %305 : vector<2x16xf32> to vector<2x16x1xf32>
      %307 = vector.shape_cast %302 : vector<2x64xf32> to vector<2x1x64xf32>
      %308 = vector.shape_cast %84 : vector<16x64xf32> to vector<1x16x64xf32>
      %309 = vector.broadcast %307 : vector<2x1x64xf32> to vector<2x16x64xf32>
      %310 = vector.broadcast %308 : vector<1x16x64xf32> to vector<2x16x64xf32>
      %311 = arith.mulf %309, %310 : vector<2x16x64xf32>
      %312 = math.exp %311 : vector<2x16x64xf32>
      %313 = arith.mulf %302, %301 : vector<2x64xf32>
      %314 = vector.shape_cast %313 : vector<2x64xf32> to vector<2x1x64xf32>
      %315 = vector.broadcast %304 : vector<2x16x1xf32> to vector<2x16x64xf32>
      %316 = vector.broadcast %314 : vector<2x1x64xf32> to vector<2x16x64xf32>
      %317 = arith.mulf %315, %316 : vector<2x16x64xf32>
      %318 = arith.mulf %312, %294 : vector<2x16x64xf32>
      %319 = arith.addf %318, %317 : vector<2x16x64xf32>
      %320 = vector.broadcast %306 : vector<2x16x1xf32> to vector<2x16x64xf32>
      %321 = arith.mulf %319, %320 : vector<2x16x64xf32>
      %cst_113 = arith.constant dense<0.000000e+00> : vector<2x64xf32>
      %322 = vector.multi_reduction <add>, %321, %cst_113 [1] : vector<2x16x64xf32> to vector<2x64xf32>
      %323 = vector.broadcast %85 : vector<1x64xf32> to vector<2x64xf32>
      %324 = arith.mulf %323, %301 : vector<2x64xf32>
      %325 = arith.addf %322, %324 : vector<2x64xf32>
      %326 = vector.extract_strided_slice %171 {offsets = [12, 0], sizes = [2, 64], strides = [1, 1]} : vector<16x64xf32> to vector<2x64xf32>
      %327 = vector.extract_strided_slice %173 {offsets = [12, 0], sizes = [2, 64], strides = [1, 1]} : vector<16x64xf32> to vector<2x64xf32>
      %328 = vector.extract_strided_slice %175 {offsets = [12, 0], sizes = [2, 16], strides = [1, 1]} : vector<16x32xf32> to vector<2x16xf32>
      %329 = vector.shape_cast %328 : vector<2x16xf32> to vector<2x16x1xf32>
      %330 = vector.extract_strided_slice %175 {offsets = [12, 16], sizes = [2, 16], strides = [1, 1]} : vector<16x32xf32> to vector<2x16xf32>
      %331 = vector.shape_cast %330 : vector<2x16xf32> to vector<2x16x1xf32>
      %332 = vector.shape_cast %327 : vector<2x64xf32> to vector<2x1x64xf32>
      %333 = vector.shape_cast %84 : vector<16x64xf32> to vector<1x16x64xf32>
      %334 = vector.broadcast %332 : vector<2x1x64xf32> to vector<2x16x64xf32>
      %335 = vector.broadcast %333 : vector<1x16x64xf32> to vector<2x16x64xf32>
      %336 = arith.mulf %334, %335 : vector<2x16x64xf32>
      %337 = math.exp %336 : vector<2x16x64xf32>
      %338 = arith.mulf %327, %326 : vector<2x64xf32>
      %339 = vector.shape_cast %338 : vector<2x64xf32> to vector<2x1x64xf32>
      %340 = vector.broadcast %329 : vector<2x16x1xf32> to vector<2x16x64xf32>
      %341 = vector.broadcast %339 : vector<2x1x64xf32> to vector<2x16x64xf32>
      %342 = arith.mulf %340, %341 : vector<2x16x64xf32>
      %343 = arith.mulf %337, %319 : vector<2x16x64xf32>
      %344 = arith.addf %343, %342 : vector<2x16x64xf32>
      %345 = vector.broadcast %331 : vector<2x16x1xf32> to vector<2x16x64xf32>
      %346 = arith.mulf %344, %345 : vector<2x16x64xf32>
      %cst_114 = arith.constant dense<0.000000e+00> : vector<2x64xf32>
      %347 = vector.multi_reduction <add>, %346, %cst_114 [1] : vector<2x16x64xf32> to vector<2x64xf32>
      %348 = vector.broadcast %85 : vector<1x64xf32> to vector<2x64xf32>
      %349 = arith.mulf %348, %326 : vector<2x64xf32>
      %350 = arith.addf %347, %349 : vector<2x64xf32>
      %351 = vector.extract_strided_slice %171 {offsets = [14, 0], sizes = [2, 64], strides = [1, 1]} : vector<16x64xf32> to vector<2x64xf32>
      %352 = vector.extract_strided_slice %173 {offsets = [14, 0], sizes = [2, 64], strides = [1, 1]} : vector<16x64xf32> to vector<2x64xf32>
      %353 = vector.extract_strided_slice %175 {offsets = [14, 0], sizes = [2, 16], strides = [1, 1]} : vector<16x32xf32> to vector<2x16xf32>
      %354 = vector.shape_cast %353 : vector<2x16xf32> to vector<2x16x1xf32>
      %355 = vector.extract_strided_slice %175 {offsets = [14, 16], sizes = [2, 16], strides = [1, 1]} : vector<16x32xf32> to vector<2x16xf32>
      %356 = vector.shape_cast %355 : vector<2x16xf32> to vector<2x16x1xf32>
      %357 = vector.shape_cast %352 : vector<2x64xf32> to vector<2x1x64xf32>
      %358 = vector.shape_cast %84 : vector<16x64xf32> to vector<1x16x64xf32>
      %359 = vector.broadcast %357 : vector<2x1x64xf32> to vector<2x16x64xf32>
      %360 = vector.broadcast %358 : vector<1x16x64xf32> to vector<2x16x64xf32>
      %361 = arith.mulf %359, %360 : vector<2x16x64xf32>
      %362 = math.exp %361 : vector<2x16x64xf32>
      %363 = arith.mulf %352, %351 : vector<2x64xf32>
      %364 = vector.shape_cast %363 : vector<2x64xf32> to vector<2x1x64xf32>
      %365 = vector.broadcast %354 : vector<2x16x1xf32> to vector<2x16x64xf32>
      %366 = vector.broadcast %364 : vector<2x1x64xf32> to vector<2x16x64xf32>
      %367 = arith.mulf %365, %366 : vector<2x16x64xf32>
      %368 = arith.mulf %362, %344 : vector<2x16x64xf32>
      %369 = arith.addf %368, %367 : vector<2x16x64xf32>
      %370 = vector.broadcast %356 : vector<2x16x1xf32> to vector<2x16x64xf32>
      %371 = arith.mulf %369, %370 : vector<2x16x64xf32>
      %cst_115 = arith.constant dense<0.000000e+00> : vector<2x64xf32>
      %372 = vector.multi_reduction <add>, %371, %cst_115 [1] : vector<2x16x64xf32> to vector<2x64xf32>
      %373 = vector.broadcast %85 : vector<1x64xf32> to vector<2x64xf32>
      %374 = arith.mulf %373, %351 : vector<2x64xf32>
      %375 = arith.addf %372, %374 : vector<2x64xf32>
      %376 = tpu.concatenate %200, %225, %250, %275, %300, %325, %350, %375 in 0 : vector<2x64xf32>, vector<2x64xf32>, vector<2x64xf32>, vector<2x64xf32>, vector<2x64xf32>, vector<2x64xf32>, vector<2x64xf32>, vector<2x64xf32> -> vector<16x64xf32>
      %377 = arith.index_cast %169 : i32 to index
      %c0_116 = arith.constant 0 : index
      %378 = vector.load %arg26[%377, %c0_116] : memref<32x64xf32, #tpu.memory_space<vmem>>, vector<16x64xf32>
      tpu.vector_store %arg26[%377, %c0_116], %376 {strides = array<i32>} : memref<32x64xf32, #tpu.memory_space<vmem>>, vector<16x64xf32>,
      scf.yield %369 : vector<2x16x64xf32>
    }
    %c2_i32_51 = arith.constant 2 : i32
    %cst_52 = arith.constant 0.000000e+00 : f32
    %89 = vector.broadcast %cst_52 : f32 to vector<32x64xf32>
    %c12 = arith.constant 12 : index
    %c0_53 = arith.constant 0 : index
    %90 = vector.load %arg21[%c12, %c0_53] : memref<44x64xf32, #tpu.memory_space<vmem>>, vector<32x64xf32>
    %c0_54 = arith.constant 0 : index
    %c0_55 = arith.constant 0 : index
    %91 = vector.load %arg13[%c0_54, %c0_55] : memref<4x64xf32, #tpu.memory_space<vmem>>, vector<1x64xf32>
    %92 = vector.shape_cast %91 : vector<1x64xf32> to vector<64xf32>
    %93 = vector.shape_cast %92 : vector<64xf32> to vector<1x64xf32>
    %94 = vector.broadcast %93 : vector<1x64xf32> to vector<32x64xf32>
    %95 = arith.mulf %90, %94 : vector<32x64xf32>
    %96 = arith.addf %89, %95 : vector<32x64xf32>
    %c10 = arith.constant 10 : index
    %c0_56 = arith.constant 0 : index
    %97 = vector.load %arg21[%c10, %c0_56] : memref<44x64xf32, #tpu.memory_space<vmem>>, vector<32x64xf32>
    %c1_57 = arith.constant 1 : index
    %c0_58 = arith.constant 0 : index
    %98 = vector.load %arg13[%c1_57, %c0_58] : memref<4x64xf32, #tpu.memory_space<vmem>>, vector<1x64xf32>
    %99 = vector.shape_cast %98 : vector<1x64xf32> to vector<64xf32>
    %100 = vector.shape_cast %99 : vector<64xf32> to vector<1x64xf32>
    %101 = vector.broadcast %100 : vector<1x64xf32> to vector<32x64xf32>
    %102 = arith.mulf %97, %101 : vector<32x64xf32>
    %103 = arith.addf %96, %102 : vector<32x64xf32>
    %c8 = arith.constant 8 : index
    %c0_59 = arith.constant 0 : index
    %104 = vector.load %arg21[%c8, %c0_59] : memref<44x64xf32, #tpu.memory_space<vmem>>, vector<32x64xf32>
    %c2_60 = arith.constant 2 : index
    %c0_61 = arith.constant 0 : index
    %105 = vector.load %arg13[%c2_60, %c0_61] : memref<4x64xf32, #tpu.memory_space<vmem>>, vector<1x64xf32>
    %106 = vector.shape_cast %105 : vector<1x64xf32> to vector<64xf32>
    %107 = vector.shape_cast %106 : vector<64xf32> to vector<1x64xf32>
    %108 = vector.broadcast %107 : vector<1x64xf32> to vector<32x64xf32>
    %109 = arith.mulf %104, %108 : vector<32x64xf32>
    %110 = arith.addf %103, %109 : vector<32x64xf32>
    %c6_62 = arith.constant 6 : index
    %c0_63 = arith.constant 0 : index
    %111 = vector.load %arg21[%c6_62, %c0_63] : memref<44x64xf32, #tpu.memory_space<vmem>>, vector<32x64xf32>
    %c3_64 = arith.constant 3 : index
    %c0_65 = arith.constant 0 : index
    %112 = vector.load %arg13[%c3_64, %c0_65] : memref<4x64xf32, #tpu.memory_space<vmem>>, vector<1x64xf32>
    %113 = vector.shape_cast %112 : vector<1x64xf32> to vector<64xf32>
    %114 = vector.shape_cast %113 : vector<64xf32> to vector<1x64xf32>
    %115 = vector.broadcast %114 : vector<1x64xf32> to vector<32x64xf32>
    %116 = arith.mulf %111, %115 : vector<32x64xf32>
    %117 = arith.addf %110, %116 : vector<32x64xf32>
    %c0_66 = arith.constant 0 : index
    %c0_67 = arith.constant 0 : index
    %118 = vector.load %arg14[%c0_66, %c0_67] : memref<1x64xf32, #tpu.memory_space<vmem>>, vector<1x64xf32>
    %119 = vector.broadcast %118 : vector<1x64xf32> to vector<32x64xf32>
    %120 = arith.addf %117, %119 : vector<32x64xf32>
    %121 = arith.negf %120 : vector<32x64xf32>
    %122 = math.exp %121 : vector<32x64xf32>
    %cst_68 = arith.constant 1.000000e+00 : f32
    %123 = vector.broadcast %cst_68 : f32 to vector<32x64xf32>
    %124 = arith.addf %123, %122 : vector<32x64xf32>
    %125 = arith.divf %123, %124 : vector<32x64xf32>
    %126 = arith.mulf %120, %125 : vector<32x64xf32>
    %c0_69 = arith.constant 0 : index
    %c0_70 = arith.constant 0 : index
    %127 = vector.load %arg23[%c0_69, %c0_70] : memref<32x64xf32, #tpu.memory_space<vmem>>, vector<32x64xf32>
    tpu.vector_store %arg23[%c0_69, %c0_70], %126 {strides = array<i32>} : memref<32x64xf32, #tpu.memory_space<vmem>>, vector<32x64xf32>,
    %c0_71 = arith.constant 0 : index
    %c0_72 = arith.constant 0 : index
    %128 = vector.load %arg15[%c0_71, %c0_72] : memref<64x34xf32, #tpu.memory_space<vmem>>, vector<64x34xf32>
    %cst_73 = arith.constant dense<0.000000e+00> : vector<32x34xf32>
    %129 = tpu.matmul %126, %128, %cst_73 {dimension_numbers = #tpu.dot_dimension_numbers<[1], [0], [0], [1], [0, 0, 1, 1], [], []>} : vector<32x64xf32>, vector<64x34xf32>, vector<32x34xf32> -> vector<32x34xf32>
    %130 = vector.extract_strided_slice %129 {offsets = [0, 0], sizes = [32, 2], strides = [1, 1]} : vector<32x34xf32> to vector<32x2xf32>
    %c0_74 = arith.constant 0 : index
    %c0_75 = arith.constant 0 : index
    %131 = vector.load %arg16[%c0_74, %c0_75] : memref<2x64xf32, #tpu.memory_space<vmem>>, vector<2x64xf32>
    %cst_76 = arith.constant dense<0.000000e+00> : vector<32x64xf32>
    %132 = tpu.matmul %130, %131, %cst_76 {dimension_numbers = #tpu.dot_dimension_numbers<[1], [0], [0], [1], [0, 0, 1, 1], [], []>} : vector<32x2xf32>, vector<2x64xf32>, vector<32x64xf32> -> vector<32x64xf32>
    %c0_77 = arith.constant 0 : index
    %c0_78 = arith.constant 0 : index
    %133 = vector.load %arg17[%c0_77, %c0_78] : memref<1x64xf32, #tpu.memory_space<vmem>>, vector<1x64xf32>
    %134 = vector.broadcast %133 : vector<1x64xf32> to vector<32x64xf32>
    %135 = arith.addf %132, %134 : vector<32x64xf32>
    %cst_79 = arith.constant 0.000000e+00 : f32
    %136 = vector.broadcast %cst_79 : f32 to vector<32x64xf32>
    %137 = arith.maximumf %135, %136 : vector<32x64xf32>
    %138 = vector.broadcast %cst_79 : f32 to vector<32x64xf32>
    %139 = arith.subf %135, %138 : vector<32x64xf32>
    %140 = arith.cmpf one, %139, %139 : vector<32x64xf32>
    %141 = vector.broadcast %cst_79 : f32 to vector<32x64xf32>
    %142 = arith.addf %135, %141 : vector<32x64xf32>
    %143 = math.absf %139 : vector<32x64xf32>
    %cst_80 = arith.constant 0.000000e+00 : f32
    %144 = vector.broadcast %cst_80 : f32 to vector<32x64xf32>
    %145 = arith.subf %144, %143 : vector<32x64xf32>
    %146 = math.exp %145 : vector<32x64xf32>
    %147 = math.log1p %146 : vector<32x64xf32>
    %148 = arith.addf %137, %147 : vector<32x64xf32>
    %149 = arith.select %140, %142, %148 : vector<32x64xi1>, vector<32x64xf32>
    %c0_81 = arith.constant 0 : index
    %c0_82 = arith.constant 0 : index
    %150 = vector.load %arg24[%c0_81, %c0_82] : memref<32x64xf32, #tpu.memory_space<vmem>>, vector<32x64xf32>
    tpu.vector_store %arg24[%c0_81, %c0_82], %149 {strides = array<i32>} : memref<32x64xf32, #tpu.memory_space<vmem>>, vector<32x64xf32>,
    %151 = vector.extract_strided_slice %129 {offsets = [0, 2], sizes = [32, 32], strides = [1, 1]} : vector<32x34xf32> to vector<32x32xf32>
    %c0_83 = arith.constant 0 : index
    %c0_84 = arith.constant 0 : index
    %152 = vector.load %arg25[%c0_83, %c0_84] : memref<32x32xf32, #tpu.memory_space<vmem>>, vector<32x32xf32>
    tpu.vector_store %arg25[%c0_83, %c0_84], %151 {strides = array<i32>} : memref<32x32xf32, #tpu.memory_space<vmem>>, vector<32x32xf32>,
    %c0_85 = arith.constant 0 : index
    %c0_86 = arith.constant 0 : index
    %153 = vector.load %arg18[%c0_85, %c0_86] : memref<16x64xf32, #tpu.memory_space<vmem>>, vector<16x64xf32>
    %c0_87 = arith.constant 0 : index
    %c0_88 = arith.constant 0 : index
    %154 = vector.load %arg19[%c0_87, %c0_88] : memref<1x64xf32, #tpu.memory_space<vmem>>, vector<1x64xf32>
    %cst_89 = arith.constant 0.000000e+00 : f32
    %155 = vector.broadcast %cst_89 : f32 to vector<2x16x64xf32>
    %c0_i32_90 = arith.constant 0 : i32
    %c2_i32_91 = arith.constant 2 : i32
    %156 = arith.addi %c0_i32_90, %c2_i32_91 : i32
    %c1_i32_92 = arith.constant 1 : i32
    %157 = scf.for %arg27 = %c0_i32_90 to %156 step %c1_i32_92 iter_args(%arg28 = %155) -> (vector<2x16x64xf32>)  : i32 {
      %c1_i32_105 = arith.constant 1 : i32
      %168 = arith.subi %c1_i32_105, %arg27 : i32
      %c16_i32 = arith.constant 16 : i32
      %169 = arith.muli %168, %c16_i32 : i32
      %170 = tpu.assume_multiple %169, 8 : i32
      %171 = arith.index_cast %170 : i32 to index
      %c0_106 = arith.constant 0 : index
      %172 = vector.load %arg23[%171, %c0_106] : memref<32x64xf32, #tpu.memory_space<vmem>>, vector<16x64xf32>
      %173 = arith.index_cast %170 : i32 to index
      %c0_107 = arith.constant 0 : index
      %174 = vector.load %arg24[%173, %c0_107] : memref<32x64xf32, #tpu.memory_space<vmem>>, vector<16x64xf32>
      %175 = arith.index_cast %170 : i32 to index
      %c0_108 = arith.constant 0 : index
      %176 = vector.load %arg25[%175, %c0_108] : memref<32x32xf32, #tpu.memory_space<vmem>>, vector<16x32xf32>
      %177 = arith.index_cast %170 : i32 to index
      %c0_109 = arith.constant 0 : index
      %178 = vector.load %arg26[%177, %c0_109] : memref<32x64xf32, #tpu.memory_space<vmem>>, vector<16x64xf32>
      %179 = vector.extract_strided_slice %172 {offsets = [14, 0], sizes = [2, 64], strides = [1, 1]} : vector<16x64xf32> to vector<2x64xf32>
      %180 = vector.extract_strided_slice %174 {offsets = [14, 0], sizes = [2, 64], strides = [1, 1]} : vector<16x64xf32> to vector<2x64xf32>
      %181 = vector.extract_strided_slice %176 {offsets = [14, 0], sizes = [2, 16], strides = [1, 1]} : vector<16x32xf32> to vector<2x16xf32>
      %182 = vector.shape_cast %181 : vector<2x16xf32> to vector<2x16x1xf32>
      %183 = vector.extract_strided_slice %176 {offsets = [14, 16], sizes = [2, 16], strides = [1, 1]} : vector<16x32xf32> to vector<2x16xf32>
      %184 = vector.shape_cast %183 : vector<2x16xf32> to vector<2x16x1xf32>
      %185 = vector.shape_cast %180 : vector<2x64xf32> to vector<2x1x64xf32>
      %186 = vector.shape_cast %153 : vector<16x64xf32> to vector<1x16x64xf32>
      %187 = vector.broadcast %185 : vector<2x1x64xf32> to vector<2x16x64xf32>
      %188 = vector.broadcast %186 : vector<1x16x64xf32> to vector<2x16x64xf32>
      %189 = arith.mulf %187, %188 : vector<2x16x64xf32>
      %190 = math.exp %189 : vector<2x16x64xf32>
      %191 = arith.mulf %180, %179 : vector<2x64xf32>
      %192 = vector.shape_cast %191 : vector<2x64xf32> to vector<2x1x64xf32>
      %193 = vector.broadcast %182 : vector<2x16x1xf32> to vector<2x16x64xf32>
      %194 = vector.broadcast %192 : vector<2x1x64xf32> to vector<2x16x64xf32>
      %195 = arith.mulf %193, %194 : vector<2x16x64xf32>
      %196 = arith.mulf %190, %arg28 : vector<2x16x64xf32>
      %197 = arith.addf %196, %195 : vector<2x16x64xf32>
      %198 = vector.broadcast %184 : vector<2x16x1xf32> to vector<2x16x64xf32>
      %199 = arith.mulf %197, %198 : vector<2x16x64xf32>
      %cst_110 = arith.constant dense<0.000000e+00> : vector<2x64xf32>
      %200 = vector.multi_reduction <add>, %199, %cst_110 [1] : vector<2x16x64xf32> to vector<2x64xf32>
      %201 = vector.broadcast %154 : vector<1x64xf32> to vector<2x64xf32>
      %202 = arith.mulf %201, %179 : vector<2x64xf32>
      %203 = arith.addf %200, %202 : vector<2x64xf32>
      %204 = vector.extract_strided_slice %172 {offsets = [12, 0], sizes = [2, 64], strides = [1, 1]} : vector<16x64xf32> to vector<2x64xf32>
      %205 = vector.extract_strided_slice %174 {offsets = [12, 0], sizes = [2, 64], strides = [1, 1]} : vector<16x64xf32> to vector<2x64xf32>
      %206 = vector.extract_strided_slice %176 {offsets = [12, 0], sizes = [2, 16], strides = [1, 1]} : vector<16x32xf32> to vector<2x16xf32>
      %207 = vector.shape_cast %206 : vector<2x16xf32> to vector<2x16x1xf32>
      %208 = vector.extract_strided_slice %176 {offsets = [12, 16], sizes = [2, 16], strides = [1, 1]} : vector<16x32xf32> to vector<2x16xf32>
      %209 = vector.shape_cast %208 : vector<2x16xf32> to vector<2x16x1xf32>
      %210 = vector.shape_cast %205 : vector<2x64xf32> to vector<2x1x64xf32>
      %211 = vector.shape_cast %153 : vector<16x64xf32> to vector<1x16x64xf32>
      %212 = vector.broadcast %210 : vector<2x1x64xf32> to vector<2x16x64xf32>
      %213 = vector.broadcast %211 : vector<1x16x64xf32> to vector<2x16x64xf32>
      %214 = arith.mulf %212, %213 : vector<2x16x64xf32>
      %215 = math.exp %214 : vector<2x16x64xf32>
      %216 = arith.mulf %205, %204 : vector<2x64xf32>
      %217 = vector.shape_cast %216 : vector<2x64xf32> to vector<2x1x64xf32>
      %218 = vector.broadcast %207 : vector<2x16x1xf32> to vector<2x16x64xf32>
      %219 = vector.broadcast %217 : vector<2x1x64xf32> to vector<2x16x64xf32>
      %220 = arith.mulf %218, %219 : vector<2x16x64xf32>
      %221 = arith.mulf %215, %197 : vector<2x16x64xf32>
      %222 = arith.addf %221, %220 : vector<2x16x64xf32>
      %223 = vector.broadcast %209 : vector<2x16x1xf32> to vector<2x16x64xf32>
      %224 = arith.mulf %222, %223 : vector<2x16x64xf32>
      %cst_111 = arith.constant dense<0.000000e+00> : vector<2x64xf32>
      %225 = vector.multi_reduction <add>, %224, %cst_111 [1] : vector<2x16x64xf32> to vector<2x64xf32>
      %226 = vector.broadcast %154 : vector<1x64xf32> to vector<2x64xf32>
      %227 = arith.mulf %226, %204 : vector<2x64xf32>
      %228 = arith.addf %225, %227 : vector<2x64xf32>
      %229 = vector.extract_strided_slice %172 {offsets = [10, 0], sizes = [2, 64], strides = [1, 1]} : vector<16x64xf32> to vector<2x64xf32>
      %230 = vector.extract_strided_slice %174 {offsets = [10, 0], sizes = [2, 64], strides = [1, 1]} : vector<16x64xf32> to vector<2x64xf32>
      %231 = vector.extract_strided_slice %176 {offsets = [10, 0], sizes = [2, 16], strides = [1, 1]} : vector<16x32xf32> to vector<2x16xf32>
      %232 = vector.shape_cast %231 : vector<2x16xf32> to vector<2x16x1xf32>
      %233 = vector.extract_strided_slice %176 {offsets = [10, 16], sizes = [2, 16], strides = [1, 1]} : vector<16x32xf32> to vector<2x16xf32>
      %234 = vector.shape_cast %233 : vector<2x16xf32> to vector<2x16x1xf32>
      %235 = vector.shape_cast %230 : vector<2x64xf32> to vector<2x1x64xf32>
      %236 = vector.shape_cast %153 : vector<16x64xf32> to vector<1x16x64xf32>
      %237 = vector.broadcast %235 : vector<2x1x64xf32> to vector<2x16x64xf32>
      %238 = vector.broadcast %236 : vector<1x16x64xf32> to vector<2x16x64xf32>
      %239 = arith.mulf %237, %238 : vector<2x16x64xf32>
      %240 = math.exp %239 : vector<2x16x64xf32>
      %241 = arith.mulf %230, %229 : vector<2x64xf32>
      %242 = vector.shape_cast %241 : vector<2x64xf32> to vector<2x1x64xf32>
      %243 = vector.broadcast %232 : vector<2x16x1xf32> to vector<2x16x64xf32>
      %244 = vector.broadcast %242 : vector<2x1x64xf32> to vector<2x16x64xf32>
      %245 = arith.mulf %243, %244 : vector<2x16x64xf32>
      %246 = arith.mulf %240, %222 : vector<2x16x64xf32>
      %247 = arith.addf %246, %245 : vector<2x16x64xf32>
      %248 = vector.broadcast %234 : vector<2x16x1xf32> to vector<2x16x64xf32>
      %249 = arith.mulf %247, %248 : vector<2x16x64xf32>
      %cst_112 = arith.constant dense<0.000000e+00> : vector<2x64xf32>
      %250 = vector.multi_reduction <add>, %249, %cst_112 [1] : vector<2x16x64xf32> to vector<2x64xf32>
      %251 = vector.broadcast %154 : vector<1x64xf32> to vector<2x64xf32>
      %252 = arith.mulf %251, %229 : vector<2x64xf32>
      %253 = arith.addf %250, %252 : vector<2x64xf32>
      %254 = vector.extract_strided_slice %172 {offsets = [8, 0], sizes = [2, 64], strides = [1, 1]} : vector<16x64xf32> to vector<2x64xf32>
      %255 = vector.extract_strided_slice %174 {offsets = [8, 0], sizes = [2, 64], strides = [1, 1]} : vector<16x64xf32> to vector<2x64xf32>
      %256 = vector.extract_strided_slice %176 {offsets = [8, 0], sizes = [2, 16], strides = [1, 1]} : vector<16x32xf32> to vector<2x16xf32>
      %257 = vector.shape_cast %256 : vector<2x16xf32> to vector<2x16x1xf32>
      %258 = vector.extract_strided_slice %176 {offsets = [8, 16], sizes = [2, 16], strides = [1, 1]} : vector<16x32xf32> to vector<2x16xf32>
      %259 = vector.shape_cast %258 : vector<2x16xf32> to vector<2x16x1xf32>
      %260 = vector.shape_cast %255 : vector<2x64xf32> to vector<2x1x64xf32>
      %261 = vector.shape_cast %153 : vector<16x64xf32> to vector<1x16x64xf32>
      %262 = vector.broadcast %260 : vector<2x1x64xf32> to vector<2x16x64xf32>
      %263 = vector.broadcast %261 : vector<1x16x64xf32> to vector<2x16x64xf32>
      %264 = arith.mulf %262, %263 : vector<2x16x64xf32>
      %265 = math.exp %264 : vector<2x16x64xf32>
      %266 = arith.mulf %255, %254 : vector<2x64xf32>
      %267 = vector.shape_cast %266 : vector<2x64xf32> to vector<2x1x64xf32>
      %268 = vector.broadcast %257 : vector<2x16x1xf32> to vector<2x16x64xf32>
      %269 = vector.broadcast %267 : vector<2x1x64xf32> to vector<2x16x64xf32>
      %270 = arith.mulf %268, %269 : vector<2x16x64xf32>
      %271 = arith.mulf %265, %247 : vector<2x16x64xf32>
      %272 = arith.addf %271, %270 : vector<2x16x64xf32>
      %273 = vector.broadcast %259 : vector<2x16x1xf32> to vector<2x16x64xf32>
      %274 = arith.mulf %272, %273 : vector<2x16x64xf32>
      %cst_113 = arith.constant dense<0.000000e+00> : vector<2x64xf32>
      %275 = vector.multi_reduction <add>, %274, %cst_113 [1] : vector<2x16x64xf32> to vector<2x64xf32>
      %276 = vector.broadcast %154 : vector<1x64xf32> to vector<2x64xf32>
      %277 = arith.mulf %276, %254 : vector<2x64xf32>
      %278 = arith.addf %275, %277 : vector<2x64xf32>
      %279 = vector.extract_strided_slice %172 {offsets = [6, 0], sizes = [2, 64], strides = [1, 1]} : vector<16x64xf32> to vector<2x64xf32>
      %280 = vector.extract_strided_slice %174 {offsets = [6, 0], sizes = [2, 64], strides = [1, 1]} : vector<16x64xf32> to vector<2x64xf32>
      %281 = vector.extract_strided_slice %176 {offsets = [6, 0], sizes = [2, 16], strides = [1, 1]} : vector<16x32xf32> to vector<2x16xf32>
      %282 = vector.shape_cast %281 : vector<2x16xf32> to vector<2x16x1xf32>
      %283 = vector.extract_strided_slice %176 {offsets = [6, 16], sizes = [2, 16], strides = [1, 1]} : vector<16x32xf32> to vector<2x16xf32>
      %284 = vector.shape_cast %283 : vector<2x16xf32> to vector<2x16x1xf32>
      %285 = vector.shape_cast %280 : vector<2x64xf32> to vector<2x1x64xf32>
      %286 = vector.shape_cast %153 : vector<16x64xf32> to vector<1x16x64xf32>
      %287 = vector.broadcast %285 : vector<2x1x64xf32> to vector<2x16x64xf32>
      %288 = vector.broadcast %286 : vector<1x16x64xf32> to vector<2x16x64xf32>
      %289 = arith.mulf %287, %288 : vector<2x16x64xf32>
      %290 = math.exp %289 : vector<2x16x64xf32>
      %291 = arith.mulf %280, %279 : vector<2x64xf32>
      %292 = vector.shape_cast %291 : vector<2x64xf32> to vector<2x1x64xf32>
      %293 = vector.broadcast %282 : vector<2x16x1xf32> to vector<2x16x64xf32>
      %294 = vector.broadcast %292 : vector<2x1x64xf32> to vector<2x16x64xf32>
      %295 = arith.mulf %293, %294 : vector<2x16x64xf32>
      %296 = arith.mulf %290, %272 : vector<2x16x64xf32>
      %297 = arith.addf %296, %295 : vector<2x16x64xf32>
      %298 = vector.broadcast %284 : vector<2x16x1xf32> to vector<2x16x64xf32>
      %299 = arith.mulf %297, %298 : vector<2x16x64xf32>
      %cst_114 = arith.constant dense<0.000000e+00> : vector<2x64xf32>
      %300 = vector.multi_reduction <add>, %299, %cst_114 [1] : vector<2x16x64xf32> to vector<2x64xf32>
      %301 = vector.broadcast %154 : vector<1x64xf32> to vector<2x64xf32>
      %302 = arith.mulf %301, %279 : vector<2x64xf32>
      %303 = arith.addf %300, %302 : vector<2x64xf32>
      %304 = vector.extract_strided_slice %172 {offsets = [4, 0], sizes = [2, 64], strides = [1, 1]} : vector<16x64xf32> to vector<2x64xf32>
      %305 = vector.extract_strided_slice %174 {offsets = [4, 0], sizes = [2, 64], strides = [1, 1]} : vector<16x64xf32> to vector<2x64xf32>
      %306 = vector.extract_strided_slice %176 {offsets = [4, 0], sizes = [2, 16], strides = [1, 1]} : vector<16x32xf32> to vector<2x16xf32>
      %307 = vector.shape_cast %306 : vector<2x16xf32> to vector<2x16x1xf32>
      %308 = vector.extract_strided_slice %176 {offsets = [4, 16], sizes = [2, 16], strides = [1, 1]} : vector<16x32xf32> to vector<2x16xf32>
      %309 = vector.shape_cast %308 : vector<2x16xf32> to vector<2x16x1xf32>
      %310 = vector.shape_cast %305 : vector<2x64xf32> to vector<2x1x64xf32>
      %311 = vector.shape_cast %153 : vector<16x64xf32> to vector<1x16x64xf32>
      %312 = vector.broadcast %310 : vector<2x1x64xf32> to vector<2x16x64xf32>
      %313 = vector.broadcast %311 : vector<1x16x64xf32> to vector<2x16x64xf32>
      %314 = arith.mulf %312, %313 : vector<2x16x64xf32>
      %315 = math.exp %314 : vector<2x16x64xf32>
      %316 = arith.mulf %305, %304 : vector<2x64xf32>
      %317 = vector.shape_cast %316 : vector<2x64xf32> to vector<2x1x64xf32>
      %318 = vector.broadcast %307 : vector<2x16x1xf32> to vector<2x16x64xf32>
      %319 = vector.broadcast %317 : vector<2x1x64xf32> to vector<2x16x64xf32>
      %320 = arith.mulf %318, %319 : vector<2x16x64xf32>
      %321 = arith.mulf %315, %297 : vector<2x16x64xf32>
      %322 = arith.addf %321, %320 : vector<2x16x64xf32>
      %323 = vector.broadcast %309 : vector<2x16x1xf32> to vector<2x16x64xf32>
      %324 = arith.mulf %322, %323 : vector<2x16x64xf32>
      %cst_115 = arith.constant dense<0.000000e+00> : vector<2x64xf32>
      %325 = vector.multi_reduction <add>, %324, %cst_115 [1] : vector<2x16x64xf32> to vector<2x64xf32>
      %326 = vector.broadcast %154 : vector<1x64xf32> to vector<2x64xf32>
      %327 = arith.mulf %326, %304 : vector<2x64xf32>
      %328 = arith.addf %325, %327 : vector<2x64xf32>
      %329 = vector.extract_strided_slice %172 {offsets = [2, 0], sizes = [2, 64], strides = [1, 1]} : vector<16x64xf32> to vector<2x64xf32>
      %330 = vector.extract_strided_slice %174 {offsets = [2, 0], sizes = [2, 64], strides = [1, 1]} : vector<16x64xf32> to vector<2x64xf32>
      %331 = vector.extract_strided_slice %176 {offsets = [2, 0], sizes = [2, 16], strides = [1, 1]} : vector<16x32xf32> to vector<2x16xf32>
      %332 = vector.shape_cast %331 : vector<2x16xf32> to vector<2x16x1xf32>
      %333 = vector.extract_strided_slice %176 {offsets = [2, 16], sizes = [2, 16], strides = [1, 1]} : vector<16x32xf32> to vector<2x16xf32>
      %334 = vector.shape_cast %333 : vector<2x16xf32> to vector<2x16x1xf32>
      %335 = vector.shape_cast %330 : vector<2x64xf32> to vector<2x1x64xf32>
      %336 = vector.shape_cast %153 : vector<16x64xf32> to vector<1x16x64xf32>
      %337 = vector.broadcast %335 : vector<2x1x64xf32> to vector<2x16x64xf32>
      %338 = vector.broadcast %336 : vector<1x16x64xf32> to vector<2x16x64xf32>
      %339 = arith.mulf %337, %338 : vector<2x16x64xf32>
      %340 = math.exp %339 : vector<2x16x64xf32>
      %341 = arith.mulf %330, %329 : vector<2x64xf32>
      %342 = vector.shape_cast %341 : vector<2x64xf32> to vector<2x1x64xf32>
      %343 = vector.broadcast %332 : vector<2x16x1xf32> to vector<2x16x64xf32>
      %344 = vector.broadcast %342 : vector<2x1x64xf32> to vector<2x16x64xf32>
      %345 = arith.mulf %343, %344 : vector<2x16x64xf32>
      %346 = arith.mulf %340, %322 : vector<2x16x64xf32>
      %347 = arith.addf %346, %345 : vector<2x16x64xf32>
      %348 = vector.broadcast %334 : vector<2x16x1xf32> to vector<2x16x64xf32>
      %349 = arith.mulf %347, %348 : vector<2x16x64xf32>
      %cst_116 = arith.constant dense<0.000000e+00> : vector<2x64xf32>
      %350 = vector.multi_reduction <add>, %349, %cst_116 [1] : vector<2x16x64xf32> to vector<2x64xf32>
      %351 = vector.broadcast %154 : vector<1x64xf32> to vector<2x64xf32>
      %352 = arith.mulf %351, %329 : vector<2x64xf32>
      %353 = arith.addf %350, %352 : vector<2x64xf32>
      %354 = vector.extract_strided_slice %172 {offsets = [0, 0], sizes = [2, 64], strides = [1, 1]} : vector<16x64xf32> to vector<2x64xf32>
      %355 = vector.extract_strided_slice %174 {offsets = [0, 0], sizes = [2, 64], strides = [1, 1]} : vector<16x64xf32> to vector<2x64xf32>
      %356 = vector.extract_strided_slice %176 {offsets = [0, 0], sizes = [2, 16], strides = [1, 1]} : vector<16x32xf32> to vector<2x16xf32>
      %357 = vector.shape_cast %356 : vector<2x16xf32> to vector<2x16x1xf32>
      %358 = vector.extract_strided_slice %176 {offsets = [0, 16], sizes = [2, 16], strides = [1, 1]} : vector<16x32xf32> to vector<2x16xf32>
      %359 = vector.shape_cast %358 : vector<2x16xf32> to vector<2x16x1xf32>
      %360 = vector.shape_cast %355 : vector<2x64xf32> to vector<2x1x64xf32>
      %361 = vector.shape_cast %153 : vector<16x64xf32> to vector<1x16x64xf32>
      %362 = vector.broadcast %360 : vector<2x1x64xf32> to vector<2x16x64xf32>
      %363 = vector.broadcast %361 : vector<1x16x64xf32> to vector<2x16x64xf32>
      %364 = arith.mulf %362, %363 : vector<2x16x64xf32>
      %365 = math.exp %364 : vector<2x16x64xf32>
      %366 = arith.mulf %355, %354 : vector<2x64xf32>
      %367 = vector.shape_cast %366 : vector<2x64xf32> to vector<2x1x64xf32>
      %368 = vector.broadcast %357 : vector<2x16x1xf32> to vector<2x16x64xf32>
      %369 = vector.broadcast %367 : vector<2x1x64xf32> to vector<2x16x64xf32>
      %370 = arith.mulf %368, %369 : vector<2x16x64xf32>
      %371 = arith.mulf %365, %347 : vector<2x16x64xf32>
      %372 = arith.addf %371, %370 : vector<2x16x64xf32>
      %373 = vector.broadcast %359 : vector<2x16x1xf32> to vector<2x16x64xf32>
      %374 = arith.mulf %372, %373 : vector<2x16x64xf32>
      %cst_117 = arith.constant dense<0.000000e+00> : vector<2x64xf32>
      %375 = vector.multi_reduction <add>, %374, %cst_117 [1] : vector<2x16x64xf32> to vector<2x64xf32>
      %376 = vector.broadcast %154 : vector<1x64xf32> to vector<2x64xf32>
      %377 = arith.mulf %376, %354 : vector<2x64xf32>
      %378 = arith.addf %375, %377 : vector<2x64xf32>
      %379 = tpu.concatenate %378, %353, %328, %303, %278, %253, %228, %203 in 0 : vector<2x64xf32>, vector<2x64xf32>, vector<2x64xf32>, vector<2x64xf32>, vector<2x64xf32>, vector<2x64xf32>, vector<2x64xf32>, vector<2x64xf32> -> vector<16x64xf32>
      %380 = arith.addf %379, %178 : vector<16x64xf32>
      %381 = arith.index_cast %170 : i32 to index
      %c0_118 = arith.constant 0 : index
      %382 = vector.load %arg26[%381, %c0_118] : memref<32x64xf32, #tpu.memory_space<vmem>>, vector<16x64xf32>
      tpu.vector_store %arg26[%381, %c0_118], %380 {strides = array<i32>} : memref<32x64xf32, #tpu.memory_space<vmem>>, vector<16x64xf32>,
      scf.yield %372 : vector<2x16x64xf32>
    }
    %c2_i32_93 = arith.constant 2 : i32
    %c0_94 = arith.constant 0 : index
    %c0_95 = arith.constant 0 : index
    %158 = vector.load %arg26[%c0_94, %c0_95] : memref<32x64xf32, #tpu.memory_space<vmem>>, vector<32x64xf32>
    %c0_96 = arith.constant 0 : index
    %c0_97 = arith.constant 0 : index
    %159 = vector.load %arg22[%c0_96, %c0_97] : memref<32x64xf32, #tpu.memory_space<vmem>>, vector<32x64xf32>
    %160 = arith.mulf %158, %159 : vector<32x64xf32>
    %161 = arith.truncf %160 : vector<32x64xf32> to vector<32x64xbf16>
    %c0_98 = arith.constant 0 : index
    %c0_99 = arith.constant 0 : index
    %162 = vector.load %arg4[%c0_98, %c0_99] : memref<64x128xbf16, #tpu.memory_space<vmem>>, vector<64x128xbf16>
    %cst_100 = arith.constant dense<0.000000e+00> : vector<32x128xf32>
    %163 = tpu.matmul %161, %162, %cst_100 {dimension_numbers = #tpu.dot_dimension_numbers<[1], [0], [0], [1], [0, 0, 1, 1], [], []>} : vector<32x64xbf16>, vector<64x128xbf16>, vector<32x128xf32> -> vector<32x128xf32>
    %c0_101 = arith.constant 0 : index
    %c0_102 = arith.constant 0 : index
    %164 = vector.load %arg5[%c0_101, %c0_102] : memref<1x128xf32, #tpu.memory_space<vmem>>, vector<1x128xf32>
    %165 = vector.broadcast %164 : vector<1x128xf32> to vector<32x128xf32>
    %166 = arith.addf %163, %165 : vector<32x128xf32>
    %c0_103 = arith.constant 0 : index
    %c0_104 = arith.constant 0 : index
    %167 = vector.load %arg20[%c0_103, %c0_104] : memref<32x128xf32, #tpu.memory_space<vmem>>, vector<32x128xf32>
    tpu.vector_store %arg20[%c0_103, %c0_104], %166 {strides = array<i32>} : memref<32x128xf32, #tpu.memory_space<vmem>>, vector<32x128xf32>,
    return
  }
  func.func @transform_0(%arg0: i32) -> (i32, i32) {
    %c0_i32 = arith.constant 0 : i32
    %c0_i32_0 = arith.constant 0 : i32
    return %arg0, %c0_i32 : i32, i32
  }
  func.func @transform_1(%arg0: i32) -> (i32, i32) {
    %c0_i32 = arith.constant 0 : i32
    %c0_i32_0 = arith.constant 0 : i32
    %c0_i32_1 = arith.constant 0 : i32
    return %c0_i32, %c0_i32_0 : i32, i32
  }
  func.func @transform_2(%arg0: i32) -> (i32, i32) {
    %c0_i32 = arith.constant 0 : i32
    %c0_i32_0 = arith.constant 0 : i32
    %c0_i32_1 = arith.constant 0 : i32
    return %c0_i32, %c0_i32_0 : i32, i32
  }
  func.func @transform_3(%arg0: i32) -> (i32, i32) {
    %c0_i32 = arith.constant 0 : i32
    %c0_i32_0 = arith.constant 0 : i32
    %c0_i32_1 = arith.constant 0 : i32
    return %c0_i32, %c0_i32_0 : i32, i32
  }
  func.func @transform_4(%arg0: i32) -> (i32, i32) {
    %c0_i32 = arith.constant 0 : i32
    %c0_i32_0 = arith.constant 0 : i32
    %c0_i32_1 = arith.constant 0 : i32
    return %c0_i32, %c0_i32_0 : i32, i32
  }
  func.func @transform_5(%arg0: i32) -> (i32, i32) {
    %c0_i32 = arith.constant 0 : i32
    %c0_i32_0 = arith.constant 0 : i32
    %c0_i32_1 = arith.constant 0 : i32
    return %c0_i32, %c0_i32_0 : i32, i32
  }
  func.func @transform_6(%arg0: i32) -> (i32, i32) {
    %c0_i32 = arith.constant 0 : i32
    %c0_i32_0 = arith.constant 0 : i32
    %c0_i32_1 = arith.constant 0 : i32
    return %c0_i32, %c0_i32_0 : i32, i32
  }
  func.func @transform_7(%arg0: i32) -> (i32, i32) {
    %c0_i32 = arith.constant 0 : i32
    %c0_i32_0 = arith.constant 0 : i32
    %c0_i32_1 = arith.constant 0 : i32
    return %c0_i32, %c0_i32_0 : i32, i32
  }
  func.func @transform_8(%arg0: i32) -> (i32, i32) {
    %c0_i32 = arith.constant 0 : i32
    %c0_i32_0 = arith.constant 0 : i32
    %c0_i32_1 = arith.constant 0 : i32
    return %c0_i32, %c0_i32_0 : i32, i32
  }
  func.func @transform_9(%arg0: i32) -> (i32, i32) {
    %c0_i32 = arith.constant 0 : i32
    %c0_i32_0 = arith.constant 0 : i32
    %c0_i32_1 = arith.constant 0 : i32
    return %c0_i32, %c0_i32_0 : i32, i32
  }
  func.func @transform_10(%arg0: i32) -> (i32, i32) {
    %c0_i32 = arith.constant 0 : i32
    %c0_i32_0 = arith.constant 0 : i32
    %c0_i32_1 = arith.constant 0 : i32
    return %c0_i32, %c0_i32_0 : i32, i32
  }
  func.func @transform_11(%arg0: i32) -> (i32, i32) {
    %c0_i32 = arith.constant 0 : i32
    %c0_i32_0 = arith.constant 0 : i32
    %c0_i32_1 = arith.constant 0 : i32
    return %c0_i32, %c0_i32_0 : i32, i32
  }
  func.func @transform_12(%arg0: i32) -> (i32, i32) {
    %c0_i32 = arith.constant 0 : i32
    %c0_i32_0 = arith.constant 0 : i32
    %c0_i32_1 = arith.constant 0 : i32
    return %c0_i32, %c0_i32_0 : i32, i32
  }
  func.func @transform_13(%arg0: i32) -> (i32, i32) {
    %c0_i32 = arith.constant 0 : i32
    %c0_i32_0 = arith.constant 0 : i32
    %c0_i32_1 = arith.constant 0 : i32
    return %c0_i32, %c0_i32_0 : i32, i32
  }
  func.func @transform_14(%arg0: i32) -> (i32, i32) {
    %c0_i32 = arith.constant 0 : i32
    %c0_i32_0 = arith.constant 0 : i32
    %c0_i32_1 = arith.constant 0 : i32
    return %c0_i32, %c0_i32_0 : i32, i32
  }
  func.func @transform_15(%arg0: i32) -> (i32, i32) {
    %c0_i32 = arith.constant 0 : i32
    %c0_i32_0 = arith.constant 0 : i32
    %c0_i32_1 = arith.constant 0 : i32
    return %c0_i32, %c0_i32_0 : i32, i32
  }
  func.func @transform_16(%arg0: i32) -> (i32, i32) {
    %c0_i32 = arith.constant 0 : i32
    %c0_i32_0 = arith.constant 0 : i32
    %c0_i32_1 = arith.constant 0 : i32
    return %c0_i32, %c0_i32_0 : i32, i32
  }
  func.func @transform_17(%arg0: i32) -> (i32, i32) {
    %c0_i32 = arith.constant 0 : i32
    %c0_i32_0 = arith.constant 0 : i32
    %c0_i32_1 = arith.constant 0 : i32
    return %c0_i32, %c0_i32_0 : i32, i32
  }
  func.func @transform_18(%arg0: i32) -> (i32, i32) {
    %c0_i32 = arith.constant 0 : i32
    %c0_i32_0 = arith.constant 0 : i32
    %c0_i32_1 = arith.constant 0 : i32
    return %c0_i32, %c0_i32_0 : i32, i32
  }
  func.func @transform_19(%arg0: i32) -> (i32, i32) {
    %c0_i32 = arith.constant 0 : i32
    %c0_i32_0 = arith.constant 0 : i32
    return %arg0, %c0_i32 : i32, i32
  }
}

</mosaic_0001>

<bundles_post_ra>
// kernel: bimamba_forward.1
= control target key start
LH: loop header
LB: loop body
LE: loop exit
PB: predicated region body
PF: predicated region fallthrough
CT: control target
= control target key end

     0   :  { %s6281_s0 = inlined_call_operand.vmem [shape: bf16[64,32], index: 0, kind: input, shape index: {}]   ;;  %s6282_s1 = inlined_call_operand.vmem [shape: bf16[32,128], index: 1, kind: input, shape index: {}]   ;;  %s6283_s2 = inlined_call_operand.vmem [shape: f32[1,128], index: 2, kind: input, shape index: {}]   ;;  %s6284_s3 = inlined_call_operand.vmem [shape: bf16[64,128], index: 3, kind: input, shape index: {}]   ;;  %s6285_s4 = inlined_call_operand.vmem [shape: f32[1,128], index: 4, kind: input, shape index: {}]   ;;  %s6286_s5 = inlined_call_operand.vmem [shape: f32[4,64], index: 5, kind: input, shape index: {}]   ;;  %s6287_s6 = inlined_call_operand.vmem [shape: f32[1,64], index: 6, kind: input, shape index: {}]   ;;  %s6288_s7 = inlined_call_operand.vmem [shape: f32[64,34], index: 7, kind: input, shape index: {}]   ;;  %s6289_s8 = inlined_call_operand.vmem [shape: f32[2,64], index: 8, kind: input, shape index: {}]   ;;  %s6290_s9 = inlined_call_operand.vmem [shape: f32[1,64], index: 9, kind: input, shape index: {}]   ;;  %s6291_s10 = inlined_call_operand.vmem [shape: f32[16,64], index: 10, kind: input, shape index: {}]   ;;  %s6292_s11 = inlined_call_operand.vmem [shape: f32[1,64], index: 11, kind: input, shape index: {}]   ;;  %s6293_s12 = inlined_call_operand.vmem [shape: f32[4,64], index: 12, kind: input, shape index: {}]   ;;  %s6294_s13 = inlined_call_operand.vmem [shape: f32[1,64], index: 13, kind: input, shape index: {}]   ;;  %s6295_s14 = inlined_call_operand.vmem [shape: f32[64,34], index: 14, kind: input, shape index: {}]   ;;  %s6296_s15 = inlined_call_operand.vmem [shape: f32[2,64], index: 15, kind: input, shape index: {}]   ;;  %s6297_s16 = inlined_call_operand.vmem [shape: f32[1,64], index: 16, kind: input, shape index: {}]   ;;  %s6298_s17 = inlined_call_operand.vmem [shape: f32[16,64], index: 17, kind: input, shape index: {}]   ;;  %s6299_s18 = inlined_call_operand.vmem [shape: f32[1,64], index: 18, kind: input, shape index: {}]   ;;  %s6300_s19 = inlined_call_operand.vmem [shape: f32[64,128], index: 19, kind: output, shape index: {}]  }
   0x1   :  { %6319 = sst [smem:[#allocation16_spill]] %s6281_s0  ;;  %s4860_s0 = smov 0  }
   0x2   :  { %6320 = sst [smem:[#allocation17_spill]] %s6282_s1 }
   0x3   :  { %6321 = sst [smem:[#allocation18_spill]] %s6283_s2 }
   0x4   :  { %6322 = sst [smem:[#allocation19_spill]] %s6284_s3 }
   0x5 LB: > { %6323 = sst [smem:[#allocation8_spill]] %s4714_s0  ;;  %s4161_s30 = sadd.s32 4294967295, %s4714_s0   ;;  %s4714_s0 = sphi %s4860_s0, %s29_s0  }
   0x6   : > { %p4165_p0 = scmp.ge.s32.totalorder %s4714_s0, 1  ;;  %p538_p1 = scmp.lt.s32.totalorder %s4714_s0, 3 }
   0x8   : > { %p539_p2 = pnand %p4165_p0, %p538_p1 }
   0xa   : > { %542 = sbr.rel (%p539_p2) target bundleno = 1955 (0x7a3), region = 96 }
   0xf   : > { %s6324_s1 = sld [smem:[#allocation17_spill]]  ;;  %s4166_s22 = sshll.u32 %s4161_s30, 2  ;;  %vm644_vm0 = vcmask 261120   ;;  %vm700_vm1 = vcmask 521216   ;;  %v4756_v4 = vmov 0.0   ;;  %v874_v5 = vld [vmem:[%s6288_s7 + $0x38] sm:$0xff] }
  0x10   : > { %p595_p3 = scmp.lt.s32.totalorder %s4166_s22, 7  ;;  %s6325_s27 = sld [smem:[#allocation16_spill]]  ;;  %701 = vst.msk [vmem:[#allocation2] sm:$0x3f] %vm700_vm1, %v4756_v4  ;;  %702 = vst.msk [vmem:[#allocation2 + $0x26] sm:$0x3f] %vm700_vm1, %v4756_v4  ;;  %4284 = vmatprep.subr.mxu1 %v874_v5 }
  0x11   : > { %v873_v6 = vld [vmem:[%s6288_s7 + $0x30] sm:$0xff]  ;;  %4285 = vmatpush3.msra.mxu1 %v874_v5  ;;  %v872_v7 = vld [vmem:[%s6288_s7 + $0x28] sm:$0xff]  ;;  %v871_v8 = vld [vmem:[%s6288_s7 + $0x20] sm:$0xff]  ;;  %s6326_s23 = sld [smem:[#allocation18_spill]]  ;;  %vm703_vm2 = vcmask 523264   ;;  %vm993_vm3 = vcmask 1041408  }
  0x12   : > { %s6348_s22 = smov (!%p595_p3, %s4166_s22), 7  ;;  %4286 = vmatprep.subr.mxu1 %v873_v6  ;;  %v870_v9 = vld [vmem:[%s6288_s7 + $0x18] sm:$0xff]  ;;  %v869_v10 = vld [vmem:[%s6288_s7 + $0x10] sm:$0xff]  ;;  %v868_v11 = vld [vmem:[%s6288_s7 + $0x8] sm:$0xff]  ;;  %vm980_vm4 = vcmask 15360  }
  0x13   : > { %s4167_s24 = sshll.u32 %s6348_s22, 2  ;;  %s4169_s25 = sshll.u32 %s6348_s22, 3  ;;  %4287 = vmatpush3.msra.mxu1 %v873_v6  ;;  %v867_v12 = vld [vmem:[%s6288_s7] sm:$0xff] }
  0x14   : > { %s4880_s20 = scalar_lea.vmem %s6300_s19, %s4169_s25  ;;  %4288 = vmatprep.subr.mxu1 %v872_v7  ;;  %v4181_v26 = vld [vmem:[%s6286_s5] ss:$0 sm:$0xff]  ;;  %v4182_v27 = vld [vmem:[%s6286_s5 + $0x1] ss:$0 sm:$0xff]  ;;  %v4183_v28 = vld [vmem:[%s6286_s5 + $0x2] ss:$0 sm:$0xff] }
  0x15   : > { %v4448_v0 = vld [vmem:[%s6324_s1 + $0x8] sm:$0xff]   ;;  %v4449_v1 = vld [vmem:[%s6324_s1] sm:$0xff]   ;;  %4289 = vmatpush3.msra.mxu1 %v872_v7  ;;  %s5037_s22 = smov 0  }
  0x16   : > { %4276 = vmatprep.subr.bf16.mxu0 %v4448_v0  ;;  %s598_s28 = scalar_lea.vmem %s6325_s27, %s4167_s24  ;;  %4290 = vmatprep.subr.mxu1 %v871_v8  ;;  %v4184_v40 = vld [vmem:[%s6286_s5 + $0x3] ss:$0 sm:$0xff]  ;;  %v4185_v56 = vld [vmem:[%s6287_s6] ss:$0 sm:$0xff]  ;;  %s4758_s24 = smov 126  }
  0x17   : > { %4277 = vmatpush3.bf16.msra.mxu0 %v4448_v0  ;;  %v4450_v2 = vld [vmem:[%s598_s28] sm:$0xff]   ;;  %v4451_v3 = vld [vmem:[%s598_s28 + $0x8] sm:$0xff]   ;;  %4291 = vmatpush3.msra.mxu1 %v871_v8 }
  0x18   : > { %4278 = vmatprep.subr.bf16.mxu0 %v4449_v1  ;;  %4280 = vmatprep.mubr.msk.bf16.mxu0 %vm644_vm0, %v4450_v2  ;;  %v4170_v13 = vld [vmem:[%s6326_s23] ss:$0 sm:$0xff]  ;;  %s4757_s23 = smov 64  }
  0x19   : > { %4292 = vmatprep.subr.mxu1 %v870_v9 }
  0x1a   : > { %4293 = vmatpush3.msra.mxu1 %v870_v9 }
  0x1b   : > { %4279 = vmatpush3.bf16.msra.mxu0 %v4449_v1  ;;  %4294 = vmatprep.subr.mxu1 %v869_v10 }
  0x1c   : > { %4295 = vmatpush3.msra.mxu1 %v869_v10 }
  0x1d   : > { %4296 = vmatprep.subr.mxu1 %v868_v11 }
  0x1e   : > { %4281 = vmatmul.mubr.msk.bf16.vlgmr.msra.gmra.mxu0 %vm644_vm0, %v4451_v3  ;;  %4297 = vmatpush3.msra.mxu1 %v868_v11 }
  0x1f   : > { %4298 = vmatprep.subr.mxu1 %v867_v12 }
  0x20   : > { %4299 = vmatpush3.msra.mxu1 %v867_v12 }
  0xde   : > { %v4282_v14 = vpop.f32.mrf.mxu0 }
  0xdf   : > { %v4911_v15 = vadd.f32 %v4282_v14, %v4170_v13 }
  0xe0   : > { %v685_v16 = vpop.f32.mrf.mxu0 }
  0xe1   : > { %706 = vst.msk [vmem:[#allocation2 + $0x16] sm:$0xff] %vm703_vm2, %v4911_v15  ;;  %v4179_v17 = vmul.f32 -1.442695, %v4911_v15  ;;  %v4916_v18 = vadd.f32 %v4170_v13, %v685_v16 }
  0xe2   : > { %v4283_v19 = vpop.f32.mrf.mxu0 }
  0xe3   : > { %4452 = vpow2.f32 %v4179_v17  ;;  %704 = vst.msk [vmem:[#allocation2 + $0x6] sm:$0xff] %vm703_vm2, %v4916_v18  ;;  %v4177_v20 = vmul.f32 -1.442695, %v4916_v18  ;;  %v4921_v21 = vadd.f32 %v4283_v19, %v4170_v13 }
  0xe4   : > { %v688_v22 = vpop.f32.mrf.mxu0 }
  0xe5   : > { %4454 = vpow2.f32 %v4177_v20  ;;  %707 = vst.msk [vmem:[#allocation2 + $0x1e] sm:$0xff] %vm703_vm2, %v4921_v21  ;;  %v4180_v23 = vmul.f32 -1.442695, %v4921_v21  ;;  %v4926_v24 = vadd.f32 %v4170_v13, %v688_v22 }
  0xe7   : > { %4456 = vpow2.f32 %v4180_v23  ;;  %705 = vst.msk [vmem:[#allocation2 + $0xe] sm:$0xff] %vm703_vm2, %v4926_v24  ;;  %v4178_v25 = vmul.f32 -1.442695, %v4926_v24 }
  0xe8   : > { %v809_v2 = vld [vmem:[#allocation2 + $0x16] sm:$0xff] }
  0xe9   : > { %4458 = vpow2.f32 %v4178_v25  ;;  %v818_v13 = vmul.f32 %v4184_v40, %v809_v2 }
  0xea   : > { %v756_v29 = vld [vmem:[#allocation2] sm:$0xff] }
  0xeb   : > { %v773_v30 = vld [vmem:[#allocation2 + $0x2] sm:$0xff]  ;;  %v765_v32 = vmul.f32 %v4181_v26, %v756_v29 }
  0xec   : > { %v790_v31 = vld [vmem:[#allocation2 + $0x4] sm:$0xff]  ;;  %v782_v33 = vmul.f32 %v4182_v27, %v773_v30  ;;  %v759_v35 = vld [vmem:[#allocation2 + $0x18] sm:$0xff] }
  0xed   : > { %v807_v34 = vld [vmem:[#allocation2 + $0x6] sm:$0xff]  ;;  %v776_v36 = vld [vmem:[#allocation2 + $0x1a] sm:$0xff]  ;;  %v799_v39 = vmul.f32 %v4183_v28, %v790_v31  ;;  %v768_v41 = vmul.f32 %v4181_v26, %v759_v35 }
  0xee   : > { %v793_v37 = vld [vmem:[#allocation2 + $0x1c] sm:$0xff]  ;;  %v786_v38 = vadd.f32 %v782_v33, %v765_v32  ;;  %v785_v42 = vmul.f32 %v4182_v27, %v776_v36  ;;  %v816_v44 = vmul.f32 %v4184_v40, %v807_v34  ;;  %v757_v45 = vld [vmem:[#allocation2 + $0x8] sm:$0xff]  ;;  %v758_v52 = vld [vmem:[#allocation2 + $0x10] sm:$0xff] }
  0xef   : > { %v810_v43 = vld [vmem:[#allocation2 + $0x1e] sm:$0xff]  ;;  %v774_v46 = vld [vmem:[#allocation2 + $0xa] sm:$0xff]  ;;  %v766_v49 = vmul.f32 %v4181_v26, %v757_v45  ;;  %v775_v53 = vld [vmem:[#allocation2 + $0x12] sm:$0xff]  ;;  %v802_v54 = vmul.f32 %v4183_v28, %v793_v37  ;;  %v767_v57 = vmul.f32 %v4181_v26, %v758_v52 }
  0xf0   : > { %v791_v47 = vld [vmem:[#allocation2 + $0xc] sm:$0xff]  ;;  %v803_v48 = vadd.f32 %v799_v39, %v786_v38  ;;  %v783_v50 = vmul.f32 %v4182_v27, %v774_v46  ;;  %v4453_v55 = vpop.eup %4452  ;;  %v784_v58 = vmul.f32 %v4182_v27, %v775_v53  ;;  %v792_v59 = vld [vmem:[#allocation2 + $0x14] sm:$0xff]  ;;  %v789_v60 = vadd.f32 %v785_v42, %v768_v41  ;;  %v972_v31 = vld [vmem:[%s6289_s8] sm:$0x3] }
  0xf1   : > { %v808_v51 = vld [vmem:[#allocation2 + $0xe] sm:$0xff]  ;;  %v819_v61 = vmul.f32 %v4184_v40, %v810_v43  ;;  %v722_v62 = vadd.f32 1.0, %v4453_v55  ;;  %v800_v1 = vmul.f32 %v4183_v28, %v791_v47  ;;  %v801_v6 = vmul.f32 %v4183_v28, %v792_v59  ;;  %4306 = vmatprep.subr.msk.mxu0 %vm993_vm3, %v972_v31 }
  0xf2   : > { %v820_v63 = vadd.f32 %v816_v44, %v803_v48  ;;  %v787_v0 = vadd.f32 %v783_v50, %v766_v49  ;;  %v4455_v3 = vpop.eup %4454  ;;  %v817_v4 = vmul.f32 %v4184_v40, %v808_v51  ;;  %v788_v5 = vadd.f32 %v784_v58, %v767_v57  ;;  %4307 = vmatpush3.msk.msra.mxu0 %vm993_vm3, %v972_v31 }
  0xf3   : > { %v806_v7 = vadd.f32 %v802_v54, %v789_v60  ;;  %4460 = vrcp.f32 %v722_v62  ;;  %v720_v8 = vadd.f32 1.0, %v4455_v3  ;;  %v4194_v3 = vld [vmem:[%s6290_s9] ss:$0 sm:$0xff] }
  0xf4   : > { %v831_v9 = vadd.f32 %v4185_v56, %v820_v63  ;;  %v804_v10 = vadd.f32 %v800_v1, %v787_v0  ;;  %v4457_v11 = vpop.eup %4456  ;;  %v805_v12 = vadd.f32 %v801_v6, %v788_v5  ;;  %v4981_v63 = vld [vmem:[%s6291_s10] sm:$0xff]  ;;  %v4986_v0 = vld [vmem:[%s6291_s10 + $0x8] sm:$0xff] }
  0xf5   : > { %v823_v14 = vadd.f32 %v819_v61, %v806_v7  ;;  %4462 = vrcp.f32 %v720_v8  ;;  %v723_v16 = vadd.f32 1.0, %v4457_v11  ;;  %v4991_v1 = vld [vmem:[%s6292_s11] ss:$0 sm:$0xff] }
  0xf6   : > { %v4186_v17 = vmul.f32 -1.442695, %v831_v9  ;;  %v821_v19 = vadd.f32 %v817_v4, %v804_v10  ;;  %v4459_v20 = vpop.eup %4458  ;;  %v822_v22 = vadd.f32 %v818_v13, %v805_v12 }
  0xf7   : > { %v834_v23 = vadd.f32 %v4185_v56, %v823_v14  ;;  %4464 = vrcp.f32 %v723_v16  ;;  %v721_v25 = vadd.f32 1.0, %v4459_v20 }
  0xf8   : > { %v832_v26 = vadd.f32 %v4185_v56, %v821_v19  ;;  %4466 = vpow2.f32 %v4186_v17  ;;  %v833_v27 = vadd.f32 %v4185_v56, %v822_v22 }
  0xf9   : > { %v4189_v28 = vmul.f32 -1.442695, %v834_v23  ;;  %4468 = vrcp.f32 %v721_v25 }
  0xfa   : > { %v4187_v29 = vmul.f32 -1.442695, %v832_v26  ;;  %v4188_v30 = vmul.f32 -1.442695, %v833_v27 }
  0xfb   : > { %4470 = vpow2.f32 %v4189_v28 }
  0xfc   : > { %4472 = vpow2.f32 %v4187_v29 }
  0xfd   : > { %4474 = vpow2.f32 %v4188_v30 }
 0x100   : > { %v4461_v32 = vpop.eup %4460 }
 0x101   : > { %v734_v33 = vmul.f32 %v4461_v32, %v4911_v15 }
 0x102   : > { %v4463_v34 = vpop.eup %4462 }
 0x103   : > { %744 = vrot.lane.b32.xlu1 %v734_v33, %s4757_s23  ;;  %v732_v35 = vmul.f32 %v4463_v34, %v4916_v18 }
 0x104   : > { %v4465_v36 = vpop.eup %4464 }
 0x105   : > { %v4467_v37 = vpop.eup %4466  ;;  %740 = vrot.lane.b32.xlu0 %v732_v35, %s4757_s23  ;;  %v735_v38 = vmul.f32 %v4465_v36, %v4921_v21 }
 0x106   : > { %v4469_v39 = vpop.eup %4468  ;;  %v847_v40 = vadd.f32 1.0, %v4467_v37 }
 0x107   : > { %746 = vrot.lane.b32.xlu1 %v735_v38, %s4757_s23  ;;  %v733_v42 = vmul.f32 %v4469_v39, %v4926_v24 }
 0x108   : > { %v4471_v41 = vpop.eup %4470  ;;  %4476 = vrcp.f32 %v847_v40 }
 0x109   : > { %v4473_v43 = vpop.eup %4472  ;;  %v850_v44 = vadd.f32 1.0, %v4471_v41  ;;  %742 = vrot.lane.b32.xlu0 %v733_v42, %s4757_s23 }
 0x10a   : > { %v4475_v15 = vpop.eup %4474  ;;  %v848_v45 = vadd.f32 1.0, %v4473_v43 }
 0x10b   : > { %v849_v46 = vadd.f32 1.0, %v4475_v15  ;;  %4478 = vrcp.f32 %v850_v44 }
 0x10c   : > { %4480 = vrcp.f32 %v848_v45 }
 0x10d   : > { %4482 = vrcp.f32 %v849_v46 }
 0x115   : > { %v4477_v18 = vpop.eup %4476 }
 0x116   : > { %v859_v47 = vmul.f32 %v4477_v18, %v831_v9 }
 0x118   : > { %v4479_v48 = vpop.eup %4478  ;;  %863 = vst.msk [vmem:[#allocation4] sm:$0xff] %vm703_vm2, %v859_v47  ;;  %4300 = vmatprep.mubr.msk.f32.mxu1 %vm703_vm2, %v859_v47 }
 0x119   : > { %v4481_v21 = vpop.eup %4480  ;;  %v862_v49 = vmul.f32 %v4479_v48, %v834_v23 }
 0x11a   : > { %v4483_v24 = vpop.eup %4482  ;;  %v860_v50 = vmul.f32 %v4481_v21, %v832_v26 }
 0x11b   : > { %v861_v51 = vmul.f32 %v4483_v24, %v833_v27  ;;  %866 = vst.msk [vmem:[#allocation4 + $0x18] sm:$0xff] %vm703_vm2, %v862_v49 }
 0x11c   : > { %864 = vst.msk [vmem:[#allocation4 + $0x8] sm:$0xff] %vm703_vm2, %v860_v50  ;;  %4301 = vmatmul.mubr.msk.f32.vlgmr.msra.gmra.mxu1 %vm703_vm2, %v860_v50 }
 0x11d   : > { %865 = vst.msk [vmem:[#allocation4 + $0x10] sm:$0xff] %vm703_vm2, %v861_v51  ;;  %4303 = vmatprep.mubr.msk.f32.mxu1 %vm703_vm2, %v861_v51 }
 0x120   : > { %4304 = vmatmul.mubr.msk.f32.gmra.mxu1 %vm703_vm2, %v862_v49 }
 0x175   : > { %v745_v52 = vpop.permute.xlu1 %744 }
 0x176   : > { %754 = vst.msk [vmem:[#allocation3 + $0x10] sm:$0xff] %vm703_vm2, %v745_v52 }
 0x177   : > { %v741_v53 = vpop.permute.xlu0 %740 }
 0x178   : > { %752 = vst.msk [vmem:[#allocation3] sm:$0xff] %vm703_vm2, %v741_v53 }
 0x179   : > { %v747_v54 = vpop.permute.xlu1 %746 }
 0x17a   : > { %755 = vst.msk [vmem:[#allocation3 + $0x18] sm:$0xff] %vm703_vm2, %v747_v54 }
 0x17b   : > { %v743_v55 = vpop.permute.xlu0 %742 }
 0x17c   : > { %753 = vst.msk [vmem:[#allocation3 + $0x8] sm:$0xff] %vm703_vm2, %v743_v55 }
 0x1dc   : > { %v4302_v56 = vpop.f32.mrf.mxu1 }
 0x1dd   : > { %1160 = vrot.lane.b32.xlu1 %v4302_v56, %s4758_s24 }
 0x1de   : > { %v953_v57 = vpop.f32.mrf.mxu1 }
 0x1df   : > { %1158 = vrot.lane.b32.xlu0 %v953_v57, %s4758_s24  ;;  %4308 = vmatprep.mubr.msk.f32.mxu0 %vm980_vm4, %v953_v57 }
 0x1e0   : > { %v4305_v58 = vpop.f32.mrf.mxu1  ;;  %4309 = vmatmul.mubr.msk.f32.vlgmr.msra.gmra.mxu0 %vm980_vm4, %v4302_v56 }
 0x1e1   : > { %1164 = vrot.lane.b32.xlu1 %v4305_v58, %s4758_s24 }
 0x1e2   : > { %v963_v59 = vpop.f32.mrf.mxu1 }
 0x1e3   : > { %1162 = vrot.lane.b32.xlu0 %v963_v59, %s4758_s24  ;;  %4311 = vmatprep.mubr.msk.f32.mxu0 %vm980_vm4, %v963_v59 }
 0x1e4   : > { %4312 = vmatmul.mubr.msk.f32.gmra.mxu0 %vm980_vm4, %v4305_v58 }
 0x24f   : > { %v1161_v60 = vpop.permute.xlu1 %1160 }
 0x250   : > { %1171 = vst.msk [vmem:[#allocation6 + $0x8] sm:$0xff] %vm644_vm0, %v1161_v60 }
 0x251   : > { %v1159_v61 = vpop.permute.xlu0 %1158 }
 0x252   : > { %1170 = vst.msk [vmem:[#allocation6] sm:$0xff] %vm644_vm0, %v1159_v61 }
 0x253   : > { %v1165_v62 = vpop.permute.xlu1 %1164 }
 0x254   : > { %1173 = vst.msk [vmem:[#allocation6 + $0x18] sm:$0xff] %vm644_vm0, %v1165_v62 }
 0x255   : > { %v1163_v2 = vpop.permute.xlu0 %1162 }
 0x256   : > { %1172 = vst.msk [vmem:[#allocation6 + $0x10] sm:$0xff] %vm644_vm0, %v1163_v2 }
 0x2a0   : > { %v4310_v4 = vpop.f32.mrf.mxu0 }
 0x2a1   : > { %v4997_v5 = vadd.f32 %v4310_v4, %v4194_v3 }
 0x2a2   : > { %v1063_v6 = vpop.f32.mrf.mxu0 }
 0x2a3   : > { %v1095_v7 = vand.u32 2147483647, %v4997_v5  ;;  %v5000_v8 = vadd.f32 %v4194_v3, %v1063_v6  ;;  %v1083_v18 = vmax.f32 %v4997_v5, 0.0  ;;  %vm1087_vm7 = vcmp.ne.f32.partialorder %v4997_v5, %v4997_v5 }
 0x2a4   : > { %v4313_v9 = vpop.f32.mrf.mxu0 }
 0x2a5   : > { %v1099_v10 = vsub.f32 0.0, %v1095_v7  ;;  %v1094_v11 = vand.u32 2147483647, %v5000_v8  ;;  %v5003_v12 = vadd.f32 %v4313_v9, %v4194_v3  ;;  %v1082_v51 = vmax.f32 %v5000_v8, 0.0 }
 0x2a6   : > { %v1073_v13 = vpop.f32.mrf.mxu0  ;;  %vm1086_vm8 = vcmp.ne.f32.partialorder %v5000_v8, %v5000_v8 }
 0x2a7   : > { %v1104_v14 = vmul.f32 1.442695, %v1099_v10  ;;  %v1098_v16 = vsub.f32 0.0, %v1094_v11  ;;  %v5005_v17 = vadd.f32 %v4194_v3, %v1073_v13  ;;  %v1097_v19 = vand.u32 2147483647, %v5003_v12 }
 0x2a8   : > { %v1085_v61 = vmax.f32 %v5003_v12, 0.0  ;;  %vm1089_vm11 = vcmp.ne.f32.partialorder %v5003_v12, %v5003_v12  ;;  %v5029_v11 = vmov 0.0   ;;  %v5031_v13 = vmov 0.0  }
 0x2a9   : > { %4484 = vpow2.f32 %v1104_v14  ;;  %v1102_v20 = vmul.f32 1.442695, %v1098_v16  ;;  %v1101_v22 = vsub.f32 0.0, %v1097_v19  ;;  %v1096_v23 = vand.u32 2147483647, %v5005_v17 }
 0x2aa   : > { %v1084_v6 = vmax.f32 %v5005_v17, 0.0  ;;  %vm1088_vm12 = vcmp.ne.f32.partialorder %v5005_v17, %v5005_v17  ;;  %v5033_v14 = vmov 0.0   ;;  %v5035_v16 = vmov 0.0  }
 0x2ab   : > { %4486 = vpow2.f32 %v1102_v20  ;;  %v1108_v25 = vmul.f32 1.442695, %v1101_v22  ;;  %v1100_v26 = vsub.f32 0.0, %v1096_v23 }
 0x2ad   : > { %4488 = vpow2.f32 %v1108_v25  ;;  %v1106_v27 = vmul.f32 1.442695, %v1100_v26 }
 0x2af   : > { %4490 = vpow2.f32 %v1106_v27 }
 0x2b6   : > { %v4485_v28 = vpop.eup %4484 }
 0x2b7   : > { %v1119_v29 = vadd.f32 1.0, %v4485_v28  ;;  %v1122_v36 = vmul.f32 -0.5, %v4485_v28  ;;  %v1125_v39 = vand.u32 2147483647, %v4485_v28 }
 0x2b8   : > { %v4487_v30 = vpop.eup %4486 }
 0x2b9   : > { %4492 = vlog2.f32 %v1119_v29  ;;  %v1110_v31 = vadd.f32 1.0, %v4487_v30  ;;  %v1113_v37 = vmul.f32 -0.5, %v4487_v30  ;;  %v1123_v38 = vadd.f32 1.0, %v1122_v36 }
 0x2ba   : > { %v4489_v32 = vpop.eup %4488  ;;  %v1116_v43 = vand.u32 2147483647, %v4487_v30  ;;  %vm1126_vm5 = vcmp.lt.f32.partialorder %v1125_v39, 0.0004427343 }
 0x2bb   : > { %4494 = vlog2.f32 %v1110_v31  ;;  %v1137_v33 = vadd.f32 1.0, %v4489_v32  ;;  %v1140_v40 = vmul.f32 -0.5, %v4489_v32  ;;  %v1114_v41 = vadd.f32 1.0, %v1113_v37 }
 0x2bc   : > { %v4491_v34 = vpop.eup %4490  ;;  %v1124_v45 = vmul.f32 %v4485_v28, %v1123_v38  ;;  %v1143_v24 = vand.u32 2147483647, %v4489_v32  ;;  %vm1117_vm6 = vcmp.lt.f32.partialorder %v1116_v43, 0.0004427343 }
 0x2bd   : > { %4496 = vlog2.f32 %v1137_v33  ;;  %v1128_v35 = vadd.f32 1.0, %v4491_v34  ;;  %v1131_v44 = vmul.f32 -0.5, %v4491_v34  ;;  %v1141_v47 = vadd.f32 1.0, %v1140_v40 }
 0x2be   : > { %v1115_v49 = vmul.f32 %v4487_v30, %v1114_v41  ;;  %v1134_v55 = vand.u32 2147483647, %v4491_v34  ;;  %vm1144_vm9 = vcmp.lt.f32.partialorder %v1143_v24, 0.0004427343 }
 0x2bf   : > { %4498 = vlog2.f32 %v1128_v35  ;;  %v1132_v52 = vadd.f32 1.0, %v1131_v44  ;;  %v1142_v59 = vmul.f32 %v4489_v32, %v1141_v47 }
 0x2c0   : > { %vm1135_vm10 = vcmp.lt.f32.partialorder %v1134_v55, 0.0004427343 }
 0x2c1   : > { %v1133_v4 = vmul.f32 %v4491_v34, %v1132_v52 }
 0x2c6   : > { %v4493_v42 = vpop.eup %4492 }
 0x2c7   : > { %v1121_v15 = vmul.f32 0.6931472, %v4493_v42 }
 0x2c8   : > { %v4495_v46 = vpop.eup %4494 }
 0x2c9   : > { %v1127_v48 = vsel %vm1126_vm5, %v1124_v45, %v1121_v15  ;;  %v1112_v21 = vmul.f32 0.6931472, %v4495_v46 }
 0x2ca   : > { %v1147_v50 = vadd.f32 %v1127_v48, %v1083_v18  ;;  %v4497_v53 = vpop.eup %4496 }
 0x2cb   : > { %v1118_v54 = vsel %vm1117_vm6, %v1115_v49, %v1112_v21  ;;  %v1139_v58 = vmul.f32 0.6931472, %v4497_v53 }
 0x2cc   : > { %v1151_v56 = vsel %vm1087_vm7, %v4997_v5, %v1147_v50  ;;  %v1146_v57 = vadd.f32 %v1118_v54, %v1082_v51  ;;  %v4499_v60 = vpop.eup %4498 }
 0x2cd   : > { %1155 = vst.msk [vmem:[#allocation5 + $0x8] sm:$0xff] %vm703_vm2, %v1151_v56  ;;  %v1145_v2 = vsel %vm1144_vm9, %v1142_v59, %v1139_v58  ;;  %v1130_v3 = vmul.f32 0.6931472, %v4499_v60 }
 0x2ce   : > { %v1150_v62 = vsel %vm1086_vm8, %v5000_v8, %v1146_v57  ;;  %v1149_v5 = vadd.f32 %v1145_v2, %v1085_v61 }
 0x2cf   : > { %1154 = vst.msk [vmem:[#allocation5] sm:$0xff] %vm703_vm2, %v1150_v62  ;;  %v1136_v7 = vsel %vm1135_vm10, %v1133_v4, %v1130_v3 }
 0x2d0   : > { %v1153_v9 = vsel %vm1089_vm11, %v5003_v12, %v1149_v5  ;;  %v1148_v10 = vadd.f32 %v1136_v7, %v1084_v6 }
 0x2d1   : > { %1157 = vst.msk [vmem:[#allocation5 + $0x18] sm:$0xff] %vm703_vm2, %v1153_v9 }
 0x2d2   : > { %v1152_v8 = vsel %vm1088_vm12, %v5005_v17, %v1148_v10 }
 0x2d3   : > { %1156 = vst.msk [vmem:[#allocation5 + $0x10] sm:$0xff] %vm703_vm2, %v1152_v8 }
 0x2d4 LB: >> { %v1197_v12 = vlaneseq  ;;  %v4759_v17 = vmov 1966171168   ;;  %s5055_s0 = sshll.u32 %s4734_s22, 4  ;;  %vm2290_vm13 = vcmask 1041409   ;;  %vm2297_vm14 = vcmask 1043459   ;;  %s1182_s22 = sadd.s32 1, %s4734_s22   ;;  %s4734_s22 = sphi %s5037_s22, %s1182_s22   ;;  %v4730_v16 = vphi %v5035_v16, %v6336_v16   ;;  %v4726_v14 = vphi %v5033_v14, %v5493_v14   ;;  %v4722_v13 = vphi %v5031_v13, %v6335_v13   ;;  %v4718_v11 = vphi %v5029_v11, %v5499_v11  }
 0x2d5   : >> { %v1237_v19 = vunpack.c.l.s4 %v4759_v17  ;;  %s1194_s2 = scalar_lea.vmem [#allocation6], %s5055_s0  ;;  %s1188_s23 = scalar_lea.vmem [#allocation4], %s5055_s0  ;;  %vm2304_vm15 = vcmask 1045509   ;;  %vm2338_vm1 = vcmask 1043456   ;;  %vm2311_vm5 = vcmask 1047559  }
 0x2d6   : >> { %v5057_v20 = vshrl.u32 %v1197_v12, 7  ;;  %v5062_v23 = vld [vmem:[%s1194_s2] sm:$0xff]  ;;  %s1191_s25 = scalar_lea.vmem [#allocation5], %s5055_s0  ;;  %vm2340_vm6 = vcmask 1045504   ;;  %s2345_s3 = scalar_lea.vmem [#allocation7], %s5055_s0 }
 0x2d7   : >> { %v1238_v22 = vunpack.c.0.s8 %v1237_v19  ;;  %v5080_v30 = vld [vmem:[%s1188_s23] sm:$0xff]  ;;  %p1179_p4 = scmp.ge.s32.totalorder %s1182_s22, 2  }
 0x2d8   : >> { %v5065_v25 = vsub.s32 0, %v5057_v20  ;;  %v5068_v26 = vsub.s32 1, %v5057_v20  ;;  %v5096_v15 = vsub.s32 2, %v5057_v20  ;;  %v5115_v51 = vsub.s32 3, %v5057_v20 }
 0x2d9   : >> { %v5075_v29 = vsub.s32 %v1238_v22, %v5057_v20  ;;  %v5136_v59 = vsub.s32 4, %v5057_v20  ;;  %v5157_v8 = vsub.s32 5, %v5057_v20 }
 0x2da   : >> { %6327 = vst [vmem:[#allocation9_spill] sm:$0xff] %v5065_v25  ;;  %6328 = vst [vmem:[#allocation10_spill] sm:$0xff] %v5068_v26  ;;  %v1211_v27 = vrot.slane %v5062_v23, %v5068_v26  ;;  %v1200_v28 = vrot.slane %v5062_v23, %v5065_v25  ;;  %v1192_v31 = vld [vmem:[%s1191_s25] sm:$0xff]  ;;  %v5120_v53 = vrot.slane %v5062_v23, %v5096_v15  ;;  %v1193_v56 = vld [vmem:[%s1191_s25 + $0x8] sm:$0xff] }
 0x2db   : >> { %6329 = vst [vmem:[#allocation11_spill] sm:$0xff] %v5075_v29  ;;  %v1280_v32 = vmul.f32 %v1192_v31, %v5080_v30  ;;  %v1242_v33 = vrot.slane %v1192_v31, %v5075_v29  ;;  %v1513_v34 = vcombine.high %v1192_v31, %v1192_v31  ;;  %6330 = vst [vmem:[#allocation12_spill] sm:$0xff] %v5096_v15 }
 0x2dc   : >> { %1213 = vbcast.lane.b32.xlu1 %v1211_v27, 256  ;;  %1202 = vbcast.lane.b32.xlu0 %v1200_v28, 256  ;;  %6331 = vst [vmem:[#allocation13_spill] sm:$0xff] %v5115_v51  ;;  %v5133_v58 = vrot.slane %v5062_v23, %v5115_v51  ;;  %v1790_v61 = vrot.slane %v1193_v56, %v5075_v29  ;;  %6332 = vst [vmem:[#allocation14_spill] sm:$0xff] %v5157_v8 }
 0x2dd   : >> { %v1288_v35 = vrot.slane %v1280_v32, %v5075_v29  ;;  %v1250_v36 = vrot.slane %v1242_v33, %v5075_v29  ;;  %v1243_v37 = vcombine.high %v1242_v33, %v1242_v33  ;;  %v1558_v40 = vcombine.high %v1280_v32, %v1280_v32 }
 0x2de   : >> { %v1520_v44 = vrot.slane %v1513_v34, %v5075_v29  ;;  %v5151_v6 = vrot.slane %v5062_v23, %v5136_v59  ;;  %v1791_v10 = vcombine.high %v1790_v61, %v1790_v61  ;;  %v1798_v19 = vrot.slane %v1790_v61, %v5075_v29 }
 0x2df   : >> { %v1289_v38 = vcombine.high %v1288_v35, %v1288_v35  ;;  %v1296_v39 = vrot.slane %v1288_v35, %v5075_v29  ;;  %v5091_v41 = vrot.slane %v1250_v36, %v5065_v25  ;;  %v1257_v42 = vrot.slane %v1243_v37, %v5075_v29 }
 0x2e0   : >> { %1217 = vbcast.lane.b32.xlu1 %v1211_v27, 264  ;;  %1206 = vbcast.lane.b32.xlu0 %v1200_v28, 264  ;;  %v1399_v43 = vcombine.high %v1250_v36, %v1250_v36  ;;  %v1528_v52 = vrot.slane %v1520_v44, %v5075_v29  ;;  %v1565_v55 = vrot.slane %v1558_v40, %v5075_v29  ;;  %v5182_v35 = vsub.s32 6, %v5057_v20 }
 0x2e1   : >> { %v1303_v45 = vrot.slane %v1289_v38, %v5075_v29  ;;  %v5100_v46 = vrot.slane %v1296_v39, %v5065_v25  ;;  %v1423_v18 = vcombine.high %v1296_v39, %v1296_v39  ;;  %v5103_v47 = vrot.slane %v1257_v42, %v5065_v25  ;;  %v5193_v39 = vld [vmem:[%s1188_s23 + $0x8] sm:$0xff] }
 0x2e2   : >> { %v5106_v48 = vrot.slane %v1399_v43, %v5065_v25  ;;  %v1400_v24 = vcombine.high %v1257_v42, %v1257_v42  ;;  %v5139_v60 = vrot.slane %v1528_v52, %v5065_v25  ;;  %v1573_v62 = vrot.slane %v1565_v55, %v5075_v29  ;;  %6333 = vst [vmem:[#allocation15_spill] sm:$0xff] %v5193_v39 }
 0x2e3   : >> { %v5109_v21 = vrot.slane %v1303_v45, %v5065_v25  ;;  %v5112_v49 = vrot.slane %v1423_v18, %v5065_v25  ;;  %v1424_v50 = vcombine.high %v1303_v45, %v1303_v45  ;;  %v1521_v2 = vcombine.high %v1520_v44, %v1520_v44 }
 0x2e4   : >> { %1225 = vbcast.lane.b32.xlu1 %v1200_v28, 280  ;;  %1221 = vbcast.lane.b32.xlu0 %v1200_v28, 272  ;;  %v5123_v54 = vrot.slane %v1400_v24, %v5065_v25  ;;  %v1566_v3 = vcombine.high %v1565_v55, %v1565_v55  ;;  %v5146_v4 = vrot.slane %v1573_v62, %v5065_v25  ;;  %v5199_v42 = vsub.s32 7, %v5057_v20 }
 0x2e5   : >> { %v5129_v57 = vrot.slane %v1424_v50, %v5065_v25  ;;  %v1535_v5 = vrot.slane %v1521_v2, %v5075_v29  ;;  %v1669_v9 = vcombine.high %v1528_v52, %v1528_v52  ;;  %v1693_v17 = vcombine.high %v1573_v62, %v1573_v62  ;;  %v1196_v52 = vld [vmem:[%s1194_s2 + $0x8] sm:$0xff] }
 0x2e6   : >> { %v1580_v7 = vrot.slane %v1566_v3, %v5075_v29  ;;  %v5179_v34 = vrot.slane %v5062_v23, %v5157_v8  ;;  %v1805_v36 = vrot.slane %v1791_v10, %v5075_v29  ;;  %v5186_v37 = vrot.slane %v1798_v19, %v5065_v25 }
 0x2e7   : >> { %v5160_v12 = vrot.slane %v1535_v5, %v5065_v25  ;;  %v1670_v28 = vcombine.high %v1535_v5, %v1535_v5  ;;  %v5170_v31 = vrot.slane %v1693_v17, %v5065_v25  ;;  %v5205_v43 = vrot.slane %v5062_v23, %v5182_v35 }
 0x2e8   : >> { %1233 = vbcast.lane.b32.xlu1 %v1211_v27, 280  ;;  %1229 = vbcast.lane.b32.xlu0 %v1211_v27, 272  ;;  %v5164_v22 = vrot.slane %v1580_v7, %v5065_v25  ;;  %v5167_v27 = vrot.slane %v1669_v9, %v5065_v25  ;;  %v1694_v33 = vcombine.high %v1580_v7, %v1580_v7 }
 0x2e9   : >> { %v5173_v32 = vrot.slane %v1670_v28, %v5065_v25  ;;  %v5196_v40 = vrot.slane %v1805_v36, %v5065_v25  ;;  %v1828_v44 = vmul.f32 %v1193_v56, %v5193_v39  ;;  %v1941_v18 = vcombine.high %v1798_v19, %v1798_v19 }
 0x2ea   : >> { %v5189_v38 = vrot.slane %v1694_v33, %v5065_v25  ;;  %v5211_v24 = vrot.slane %v5062_v23, %v5199_v42  ;;  %v1942_v50 = vcombine.high %v1805_v36, %v1805_v36  ;;  %v2055_v20 = vcombine.high %v1193_v56, %v1193_v56 }
 0x2eb   : >> { %v1836_v45 = vrot.slane %v1828_v44, %v5075_v29  ;;  %v5219_v61 = vrot.slane %v1941_v18, %v5065_v25  ;;  %v5230_v7 = vrot.slane %v1196_v52, %v5065_v25  ;;  %v2100_v17 = vcombine.high %v1828_v44, %v1828_v44 }
 0x2ec   : >> { %1370 = vbcast.lane.b32.xlu1 %v5120_v53, 264  ;;  %1366 = vbcast.lane.b32.xlu0 %v5120_v53, 256  ;;  %v5222_v2 = vrot.slane %v1942_v50, %v5065_v25  ;;  %v2062_v23 = vrot.slane %v2055_v20, %v5075_v29 }
 0x2ed   : >> { %v1844_v55 = vrot.slane %v1836_v45, %v5075_v29  ;;  %v1837_v62 = vcombine.high %v1836_v45, %v1836_v45  ;;  %v2107_v50 = vrot.slane %v2100_v17, %v5075_v29  ;;  %v1906_v17 = vrot.slane %v1196_v52, %v5096_v15 }
 0x2ee   : >> { %v2063_v9 = vcombine.high %v2062_v23, %v2062_v23  ;;  %v2070_v10 = vrot.slane %v2062_v23, %v5075_v29  ;;  %v1759_v23 = vrot.slane %v1196_v52, %v5068_v26  ;;  %v1917_v26 = vrot.slane %v1196_v52, %v5115_v51 }
 0x2ef   : >> { %v5226_v3 = vrot.slane %v1844_v55, %v5065_v25  ;;  %v1851_v56 = vrot.slane %v1837_v62, %v5075_v29  ;;  %v1965_v5 = vcombine.high %v1844_v55, %v1844_v55  ;;  %v2115_v62 = vrot.slane %v2107_v50, %v5075_v29 }
 0x2f0   : >> { %1381 = vbcast.lane.b32.xlu1 %v5133_v58, 264  ;;  %1377 = vbcast.lane.b32.xlu0 %v5133_v58, 256  ;;  %v2077_v36 = vrot.slane %v2063_v9, %v5075_v29  ;;  %v5243_v45 = vrot.slane %v2070_v10, %v5065_v25  ;;  %v2211_v18 = vcombine.high %v2070_v10, %v2070_v10 }
 0x2f1   : >> { %v5236_v19 = vrot.slane %v1851_v56, %v5065_v25  ;;  %v5239_v28 = vrot.slane %v1965_v5, %v5065_v25  ;;  %v1966_v33 = vcombine.high %v1851_v56, %v1851_v56  ;;  %v5260_v56 = vrot.slane %v2115_v62, %v5065_v25 }
 0x2f2   : >> { %v5250_v20 = vrot.slane %v2077_v36, %v5065_v25  ;;  %v5253_v55 = vrot.slane %v2211_v18, %v5065_v25  ;;  %v2108_v5 = vcombine.high %v2107_v50, %v2107_v50  ;;  %v2212_v9 = vcombine.high %v2077_v36, %v2077_v36 }
 0x2f3   : >> { %v5247_v44 = vrot.slane %v1966_v33, %v5065_v25  ;;  %v2235_v39 = vcombine.high %v2115_v62, %v2115_v62  ;;  %v5280_v62 = vrot.slane %v1196_v52, %v5182_v35 }
 0x2f4   : >> { %1484 = vbcast.lane.b32.xlu1 %v5151_v6, 264  ;;  %1480 = vbcast.lane.b32.xlu0 %v5151_v6, 256  ;;  %v2122_v10 = vrot.slane %v2108_v5, %v5075_v29  ;;  %v5268_v18 = vrot.slane %v2212_v9, %v5065_v25  ;;  %v2020_v5 = vrot.slane %v1196_v52, %v5136_v59 }
 0x2f5   : >> { %v5272_v50 = vrot.slane %v2235_v39, %v5065_v25  ;;  %v2031_v9 = vrot.slane %v1196_v52, %v5157_v8  ;;  %v5285_v39 = vrot.slane %v1196_v52, %v5199_v42  ;;  %v1268_v52 = vmul.f32 %v5091_v41, %v4981_v63 }
 0x2f6   : >> { %v5265_v33 = vrot.slane %v2122_v10, %v5065_v25  ;;  %v2236_v36 = vcombine.high %v2122_v10, %v2122_v10  ;;  %v1270_v10 = vmul.f32 %v5103_v47, %v4981_v63 }
 0x2f8   : >> { %1495 = vbcast.lane.b32.xlu1 %v5179_v34, 264  ;;  %1491 = vbcast.lane.b32.xlu0 %v5179_v34, 256  ;;  %v5276_v29 = vrot.slane %v2236_v36, %v5065_v25  ;;  %v1413_v36 = vmul.f32 %v5123_v54, %v4981_v63 }
 0x2fc   : >> { %1640 = vbcast.lane.b32.xlu1 %v5205_v43, 264  ;;  %1636 = vbcast.lane.b32.xlu0 %v5205_v43, 256 }
 0x300   : >> { %1651 = vbcast.lane.b32.xlu1 %v5211_v24, 264  ;;  %1647 = vbcast.lane.b32.xlu0 %v5211_v24, 256 }
 0x304   : >> { %1754 = vbcast.lane.b32.xlu1 %v5230_v7, 264  ;;  %1750 = vbcast.lane.b32.xlu0 %v5230_v7, 256 }
 0x308   : >> { %1765 = vbcast.lane.b32.xlu1 %v1759_v23, 264  ;;  %1761 = vbcast.lane.b32.xlu0 %v1759_v23, 256 }
 0x30c   : >> { %1912 = vbcast.lane.b32.xlu1 %v1906_v17, 264  ;;  %1908 = vbcast.lane.b32.xlu0 %v1906_v17, 256 }
 0x310   : >> { %1923 = vbcast.lane.b32.xlu1 %v1917_v26, 264  ;;  %1919 = vbcast.lane.b32.xlu0 %v1917_v26, 256 }
 0x314   : >> { %2026 = vbcast.lane.b32.xlu1 %v2020_v5, 264  ;;  %2022 = vbcast.lane.b32.xlu0 %v2020_v5, 256 }
 0x318   : >> { %2037 = vbcast.lane.b32.xlu1 %v2031_v9, 264  ;;  %2033 = vbcast.lane.b32.xlu0 %v2031_v9, 256 }
 0x31c   : >> { %2182 = vbcast.lane.b32.xlu1 %v5280_v62, 264  ;;  %2178 = vbcast.lane.b32.xlu0 %v5280_v62, 256 }
 0x320   : >> { %2193 = vbcast.lane.b32.xlu1 %v5285_v39, 264  ;;  %2189 = vbcast.lane.b32.xlu0 %v5285_v39, 256 }
 0x324   : >> { %1389 = vbcast.lane.b32.xlu1 %v5120_v53, 280  ;;  %1385 = vbcast.lane.b32.xlu0 %v5120_v53, 272  ;;  %v1269_v53 = vmul.f32 %v5091_v41, %v4986_v0  ;;  %v1412_v41 = vmul.f32 %v5106_v48, %v4986_v0 }
 0x326   : >> { %v1274_v25 = vmul.f32 1.442695, %v1269_v53  ;;  %v1417_v15 = vmul.f32 1.442695, %v1412_v41 }
 0x328   : >> { %1397 = vbcast.lane.b32.xlu1 %v5133_v58, 280  ;;  %1393 = vbcast.lane.b32.xlu0 %v5133_v58, 272  ;;  %v1272_v58 = vmul.f32 1.442695, %v1268_v52 }
 0x32a   : >> { %4502 = vpow2.f32 %v1272_v58 }
 0x32c   : >> { %1781 = vbcast.lane.b32.xlu1 %v1759_v23, 280  ;;  %1777 = vbcast.lane.b32.xlu0 %v1759_v23, 272  ;;  %v1271_v23 = vmul.f32 %v5103_v47, %v4986_v0  ;;  %v1414_v47 = vmul.f32 %v5123_v54, %v4986_v0 }
 0x32e   : >> { %v1421_v51 = vmul.f32 1.442695, %v1414_v47 }
 0x330   : >> { %1931 = vbcast.lane.b32.xlu1 %v1906_v17, 280  ;;  %1927 = vbcast.lane.b32.xlu0 %v1906_v17, 272  ;;  %v1276_v17 = vmul.f32 1.442695, %v1270_v10  ;;  %v1419_v10 = vmul.f32 1.442695, %v1413_v36 }
 0x332   : >> { %4504 = vpow2.f32 %v1276_v17 }
 0x333   : >> { %4506 = vpow2.f32 %v1274_v25  ;;  %v1546_v25 = vmul.f32 %v5139_v60, %v4981_v63 }
 0x334   : >> { %1939 = vbcast.lane.b32.xlu1 %v1917_v26, 280  ;;  %1935 = vbcast.lane.b32.xlu0 %v1917_v26, 272  ;;  %v1411_v26 = vmul.f32 %v5106_v48, %v4981_v63  ;;  %v1547_v48 = vmul.f32 %v5139_v60, %v4986_v0  ;;  %v1548_v60 = vmul.f32 %v5160_v12, %v4981_v63 }
 0x335   : >> { %v1550_v17 = vmul.f32 1.442695, %v1546_v25 }
 0x336   : >> { %v1415_v52 = vmul.f32 1.442695, %v1411_v26 }
 0x337   : >> { %v4503_v54 = vpop.eup %4502 }
 0x338   : >> { %1503 = vbcast.lane.b32.xlu1 %v5151_v6, 280  ;;  %1499 = vbcast.lane.b32.xlu0 %v5151_v6, 272  ;;  %v1278_v6 = vmul.f32 1.442695, %v1271_v23 }
 0x33a   : >> { %4508 = vpow2.f32 %v1278_v6 }
 0x33b   : >> { %4510 = vpow2.f32 %v1415_v52 }
 0x33c   : >> { %1511 = vbcast.lane.b32.xlu1 %v5179_v34, 280  ;;  %1507 = vbcast.lane.b32.xlu0 %v5179_v34, 272  ;;  %4512 = vpow2.f32 %v1419_v10 }
 0x33d   : >> { %4514 = vpow2.f32 %v1417_v15  ;;  %v1549_v15 = vmul.f32 %v5160_v12, %v4986_v0 }
 0x33e   : >> { %4516 = vpow2.f32 %v1421_v51 }
 0x33f   : >> { %v4505_v34 = vpop.eup %4504 }
 0x340   : >> { %2045 = vbcast.lane.b32.xlu1 %v2020_v5, 280  ;;  %2041 = vbcast.lane.b32.xlu0 %v2020_v5, 272  ;;  %v1552_v5 = vmul.f32 1.442695, %v1547_v48  ;;  %v4507_v51 = vpop.eup %4506 }
 0x341   : >> { %v1319_v41 = vmul.f32 %v4726_v14, %v4507_v51 }
 0x342   : >> { %4518 = vpow2.f32 %v1552_v5 }
 0x343   : >> { %4520 = vpow2.f32 %v1550_v17 }
 0x344   : >> { %2053 = vbcast.lane.b32.xlu1 %v2031_v9, 280  ;;  %2049 = vbcast.lane.b32.xlu0 %v2031_v9, 272  ;;  %v1318_v9 = vmul.f32 %v4730_v16, %v4503_v54  ;;  %v1556_v16 = vmul.f32 1.442695, %v1549_v15  ;;  %v1554_v54 = vmul.f32 1.442695, %v1548_v60 }
 0x346   : >> { %4522 = vpow2.f32 %v1556_v16 }
 0x347   : >> { %v4509_v53 = vpop.eup %4508  ;;  %4524 = vpow2.f32 %v1554_v54 }
 0x348   : >> { %1659 = vbcast.lane.b32.xlu1 %v5205_v43, 280  ;;  %1655 = vbcast.lane.b32.xlu0 %v5205_v43, 272  ;;  %v1320_v43 = vmul.f32 %v4722_v13, %v4505_v34  ;;  %v4511_v26 = vpop.eup %4510  ;;  %v1682_v13 = vmul.f32 %v5167_v27, %v4986_v0  ;;  %v1321_v12 = vmul.f32 %v4718_v11, %v4509_v53 }
 0x349   : >> { %v4513_v6 = vpop.eup %4512  ;;  %v1681_v34 = vmul.f32 %v5167_v27, %v4981_v63 }
 0x34a   : >> { %v4515_v25 = vpop.eup %4514 }
 0x34b   : >> { %v4517_v14 = vpop.eup %4516  ;;  %v1685_v27 = vmul.f32 1.442695, %v1681_v34 }
 0x34c   : >> { %1667 = vbcast.lane.b32.xlu1 %v5211_v24, 280  ;;  %1663 = vbcast.lane.b32.xlu0 %v5211_v24, 272 }
 0x34e   : >> { %v1214_v58 = vpop.permute.xlu1 %1213  ;;  %v1203_v23 = vpop.permute.xlu0 %1202 }
 0x34f   : >> { %v1316_v36 = vmul.f32 %v5109_v21, %v1214_v58  ;;  %v1314_v24 = vmul.f32 %v5100_v46, %v1203_v23  ;;  %v4519_v54 = vpop.eup %4518 }
 0x350   : >> { %1773 = vbcast.lane.b32.xlu1 %v5230_v7, 280  ;;  %1769 = vbcast.lane.b32.xlu0 %v5230_v7, 272 }
 0x351   : >> { %v1322_v52 = vadd.f32 %v1318_v9, %v1314_v24  ;;  %v1324_v47 = vadd.f32 %v1320_v43, %v1316_v36  ;;  %v1687_v9 = vmul.f32 1.442695, %v1682_v13  ;;  %v1817_v24 = vmul.f32 %v5186_v37, %v4986_v0 }
 0x352   : >> { %v1218_v10 = vpop.permute.xlu1 %1217  ;;  %v1207_v48 = vpop.permute.xlu0 %1206 }
 0x353   : >> { %v1317_v7 = vmul.f32 %v5109_v21, %v1218_v10  ;;  %v1315_v5 = vmul.f32 %v5100_v46, %v1207_v48  ;;  %v1439_v15 = vmul.f32 %v4511_v26, %v1322_v52  ;;  %v5339_v58 = vmul.f32 %v4513_v6, %v1324_v47 }
 0x354   : >> { %2201 = vbcast.lane.b32.xlu1 %v5280_v62, 280  ;;  %2197 = vbcast.lane.b32.xlu0 %v5280_v62, 272  ;;  %v1684_v21 = vmul.f32 %v5173_v32, %v4986_v0  ;;  %v1683_v46 = vmul.f32 %v5173_v32, %v4981_v63  ;;  %4526 = vpow2.f32 %v1687_v9  ;;  %v1819_v48 = vmul.f32 %v5196_v40, %v4986_v0  ;;  %v4521_v9 = vpop.eup %4520 }
 0x355   : >> { %v1323_v11 = vadd.f32 %v1319_v41, %v1315_v5  ;;  %v1325_v51 = vadd.f32 %v1321_v12, %v1317_v7  ;;  %v1816_v41 = vmul.f32 %v5186_v37, %v4981_v63  ;;  %4528 = vpow2.f32 %v1685_v27 }
 0x356   : >> { %v1226_v43 = vpop.permute.xlu1 %1225  ;;  %v1222_v53 = vpop.permute.xlu0 %1221  ;;  %v1691_v32 = vmul.f32 1.442695, %v1684_v21  ;;  %v1689_v10 = vmul.f32 1.442695, %v1683_v46  ;;  %v1822_v7 = vmul.f32 1.442695, %v1817_v24  ;;  %v1818_v5 = vmul.f32 %v5196_v40, %v4981_v63 }
 0x357   : >> { %v1327_v23 = vmul.f32 %v1323_v11, %v1226_v43  ;;  %v1326_v17 = vmul.f32 %v1322_v52, %v1222_v53  ;;  %v1440_v60 = vmul.f32 %v4515_v25, %v1323_v11  ;;  %v1442_v26 = vmul.f32 %v4517_v14, %v1325_v51 }
 0x358   : >> { %2209 = vbcast.lane.b32.xlu1 %v5285_v39, 280  ;;  %2205 = vbcast.lane.b32.xlu0 %v5285_v39, 272  ;;  %4530 = vpow2.f32 %v1691_v32  ;;  %v1826_v46 = vmul.f32 1.442695, %v1819_v48 }
 0x359   : >> { %v1331_v62 = vsel %vm703_vm2, %v1327_v23, 0.0  ;;  %v1330_v36 = vsel %vm703_vm2, %v1326_v17, 0.0  ;;  %4532 = vpow2.f32 %v1689_v10  ;;  %v1954_v23 = vmul.f32 %v5219_v61, %v4986_v0 }
 0x35a   : >> { %v1332_v6 = vadd.f32 %v1331_v62, %v1330_v36  ;;  %v1234_v16 = vpop.permute.xlu1 %1233  ;;  %v1230_v13 = vpop.permute.xlu0 %1229  ;;  %4534 = vpow2.f32 %v1822_v7  ;;  %v1824_v62 = vmul.f32 1.442695, %v1818_v5 }
 0x35b   : >> { %v1329_v52 = vmul.f32 %v1325_v51, %v1234_v16  ;;  %v1328_v12 = vmul.f32 %v1324_v47, %v1230_v13  ;;  %v1820_v47 = vmul.f32 1.442695, %v1816_v41  ;;  %v4523_v36 = vpop.eup %4522 }
 0x35c   : >> { %v1333_v39 = vrot.slane %v1332_v6, 4  ;;  %v4525_v32 = vpop.eup %4524 }
 0x35d   : >> { %v1340_v34 = vsel %vm703_vm2, %v1329_v52, 0.0  ;;  %v1339_v25 = vsel %vm703_vm2, %v1328_v12, 0.0  ;;  %4536 = vpow2.f32 %v1820_v47  ;;  %v5377_v12 = vmul.f32 %v4991_v1, %v5080_v30 }
 0x35e   : >> { %v1334_v14 = vadd.f32 %v1333_v39, %v1332_v6  ;;  %v1341_v11 = vadd.f32 %v1340_v34, %v1339_v25  ;;  %v1371_v37 = vpop.permute.xlu1 %1370  ;;  %v1367_v51 = vpop.permute.xlu0 %1366  ;;  %4538 = vpow2.f32 %v1826_v46  ;;  %v1959_v39 = vmul.f32 1.442695, %v1954_v23 }
 0x35f   : >> { %v1436_v43 = vmul.f32 %v5112_v49, %v1371_v37  ;;  %v1435_v53 = vmul.f32 %v5112_v49, %v1367_v51  ;;  %v1953_v49 = vmul.f32 %v5219_v61, %v4981_v63  ;;  %4540 = vpow2.f32 %v1824_v62 }
 0x360   : >> { %v1335_v27 = vrot.slane %v1334_v14, 2  ;;  %v1342_v21 = vrot.slane %v1341_v11, 4  ;;  %v1955_v30 = vmul.f32 %v5222_v2, %v4981_v63  ;;  %4542 = vpow2.f32 %v1959_v39 }
 0x361   : >> { %v5365_v17 = vadd.f32 %v1440_v60, %v1436_v43  ;;  %v5367_v40 = vadd.f32 %v1439_v15, %v1435_v53  ;;  %v1957_v5 = vmul.f32 1.442695, %v1953_v49  ;;  %v2089_v43 = vmul.f32 %v5243_v45, %v4986_v0 }
 0x362   : >> { %v1336_v24 = vadd.f32 %v1335_v27, %v1334_v14  ;;  %v1343_v6 = vadd.f32 %v1342_v21, %v1341_v11  ;;  %v1382_v16 = vpop.permute.xlu1 %1381  ;;  %v1378_v13 = vpop.permute.xlu0 %1377 }
 0x363   : >> { %v1438_v41 = vmul.f32 %v5129_v57, %v1382_v16  ;;  %v1437_v52 = vmul.f32 %v5129_v57, %v1378_v13  ;;  %v1596_v60 = vmul.f32 %v4519_v54, %v5365_v17  ;;  %v1595_v15 = vmul.f32 %v4521_v9, %v5367_v40  ;;  %v4527_v14 = vpop.eup %4526 }
 0x364   : >> { %v1344_v10 = vrot.slane %v1343_v6, 2  ;;  %v1956_v57 = vmul.f32 %v5222_v2, %v4986_v0  ;;  %v1337_v34 = vrot.slane %v1336_v24, 1  ;;  %v4529_v51 = vpop.eup %4528  ;;  %v1356_v9 = vrot.slane %v5377_v12, 1 }
 0x365   : >> { %v5379_v48 = vadd.f32 %v1442_v26, %v1438_v41  ;;  %v5382_v61 = vadd.f32 %v5339_v58, %v1437_v52  ;;  %4544 = vpow2.f32 %v1957_v5 }
 0x366   : >> { %v1345_v54 = vadd.f32 %v1344_v10, %v1343_v6  ;;  %v1485_v25 = vpop.permute.xlu1 %1484  ;;  %v1481_v7 = vpop.permute.xlu0 %1480  ;;  %v1963_v27 = vmul.f32 1.442695, %v1956_v57  ;;  %v1338_v21 = vadd.f32 %v1337_v34, %v1336_v24 }
 0x367   : >> { %v1592_v11 = vmul.f32 %v5146_v4, %v1485_v25  ;;  %v1591_v26 = vmul.f32 %v5146_v4, %v1481_v7  ;;  %v1598_v58 = vmul.f32 %v4523_v36, %v5379_v48  ;;  %v1597_v37 = vmul.f32 %v4525_v32, %v5382_v61  ;;  %v4531_v6 = vpop.eup %4530 }
 0x368   : >> { %v1346_v47 = vrot.slane %v1345_v54, 1  ;;  %v2088_v4 = vmul.f32 %v5243_v45, %v4981_v63  ;;  %v1961_v36 = vmul.f32 1.442695, %v1955_v30  ;;  %v4533_v41 = vpop.eup %4532  ;;  %v2091_v45 = vmul.f32 %v5250_v20, %v4986_v0 }
 0x369   : >> { %v5395_v53 = vadd.f32 %v1596_v60, %v1592_v11  ;;  %v5397_v2 = vadd.f32 %v1595_v15, %v1591_v26  ;;  %v2094_v60 = vmul.f32 1.442695, %v2089_v43  ;;  %4546 = vpow2.f32 %v1963_v27  ;;  %v4535_v39 = vpop.eup %4534 }
 0x36a   : >> { %v1347_v46 = vadd.f32 %v1346_v47, %v1345_v54  ;;  %v1496_v23 = vpop.permute.xlu1 %1495  ;;  %v1492_v62 = vpop.permute.xlu0 %1491  ;;  %v2092_v10 = vmul.f32 1.442695, %v2088_v4  ;;  %4548 = vpow2.f32 %v1961_v36  ;;  %v2090_v25 = vmul.f32 %v5250_v20, %v4981_v63 }
 0x36b   : >> { %v1594_v16 = vmul.f32 %v5164_v22, %v1496_v23  ;;  %v1593_v13 = vmul.f32 %v5164_v22, %v1492_v62  ;;  %v1710_v49 = vmul.f32 %v4527_v14, %v5395_v53  ;;  %v1709_v32 = vmul.f32 %v4529_v51, %v5397_v2  ;;  %v4537_v7 = vpop.eup %4536 }
 0x36c   : >> { %v1360_v52 = vadd.f32 %v1356_v9, %v1347_v46  ;;  %v1359_v22 = vadd.f32 %v5377_v12, %v1338_v21  ;;  %4550 = vpow2.f32 %v2094_v60  ;;  %v2098_v20 = vmul.f32 1.442695, %v2091_v45 }
 0x36d   : >> { %v5407_v24 = vadd.f32 %v1598_v58, %v1594_v16  ;;  %v5409_v15 = vadd.f32 %v1597_v37, %v1593_v13  ;;  %v2224_v58 = vmul.f32 %v5253_v55, %v4986_v0  ;;  %v4539_v37 = vpop.eup %4538  ;;  %4552 = vpow2.f32 %v2092_v10 }
 0x36e   : >> { %v2289_v57 = vrot.slane %v1360_v52, 7  ;;  %v1641_v34 = vpop.permute.xlu1 %1640  ;;  %v1637_v54 = vpop.permute.xlu0 %1636  ;;  %v2096_v27 = vmul.f32 1.442695, %v2090_v25  ;;  %v2223_v4 = vmul.f32 %v5253_v55, %v4981_v63  ;;  %4554 = vpow2.f32 %v2098_v20 }
 0x36f   : >> { %v1706_v5 = vmul.f32 %v5170_v31, %v1641_v34  ;;  %v1705_v30 = vmul.f32 %v5170_v31, %v1637_v54  ;;  %v1712_v14 = vmul.f32 %v4531_v6, %v5407_v24  ;;  %v1711_v11 = vmul.f32 %v4533_v41, %v5409_v15  ;;  %v4541_v9 = vpop.eup %4540 }
 0x370   : >> { %v5419_v26 = vsel %vm2290_vm13, %v2289_v57, %v1359_v22  ;;  %v2229_v36 = vmul.f32 1.442695, %v2224_v58  ;;  %v4543_v6 = vpop.eup %4542  ;;  %4556 = vpow2.f32 %v2096_v27  ;;  %v2227_v41 = vmul.f32 1.442695, %v2223_v4 }
 0x371   : >> { %v5423_v51 = vadd.f32 %v1710_v49, %v1706_v5  ;;  %v5425_v47 = vadd.f32 %v1709_v32, %v1705_v30  ;;  %v2226_v49 = vmul.f32 %v5268_v18, %v4986_v0  ;;  %v2365_v0 = vld [vmem:[#allocation2 + $0xa] sm:$0xff] (%p1179_p4) }
 0x372   : >> { %v1652_v43 = vpop.permute.xlu1 %1651  ;;  %v1648_v31 = vpop.permute.xlu0 %1647  ;;  %4558 = vpow2.f32 %v2229_v36 }
 0x373   : >> { %v1708_v21 = vmul.f32 %v5189_v38, %v1652_v43  ;;  %v1707_v46 = vmul.f32 %v5189_v38, %v1648_v31  ;;  %v1867_v23 = vmul.f32 %v4535_v39, %v5423_v51  ;;  %v1866_v62 = vmul.f32 %v4537_v7, %v5425_v47  ;;  %v4545_v52 = vpop.eup %4544 }
 0x374   : >> { %v2225_v38 = vmul.f32 %v5268_v18, %v4981_v63  ;;  %v2233_v34 = vmul.f32 1.442695, %v2226_v49  ;;  %4560 = vpow2.f32 %v2227_v41  ;;  %v4202_v63 = vld [vmem:[%s6293_s12] ss:$0 sm:$0xff] (%p1179_p4) }
 0x375   : >> { %v5433_v16 = vadd.f32 %v1712_v14, %v1708_v21  ;;  %v5435_v13 = vadd.f32 %v1711_v11, %v1707_v46 }
 0x376   : >> { %v1755_v32 = vpop.permute.xlu1 %1754  ;;  %v1751_v55 = vpop.permute.xlu0 %1750  ;;  %v2231_v18 = vmul.f32 1.442695, %v2225_v38  ;;  %4562 = vpow2.f32 %v2233_v34 }
 0x377   : >> { %v1863_v60 = vmul.f32 %v5226_v3, %v1755_v32  ;;  %v1862_v45 = vmul.f32 %v5226_v3, %v1751_v55  ;;  %v1869_v10 = vmul.f32 %v4539_v37, %v5433_v16  ;;  %v1868_v39 = vmul.f32 %v4541_v9, %v5435_v13  ;;  %v4547_v54 = vpop.eup %4546 }
 0x378   : >> { %v4549_v5 = vpop.eup %4548  ;;  %4564 = vpow2.f32 %v2231_v18 }
 0x379   : >> { %v5445_v22 = vadd.f32 %v1867_v23, %v1863_v60  ;;  %v5447_v57 = vadd.f32 %v1866_v62, %v1862_v45  ;;  %v4551_v20 = vpop.eup %4550 }
 0x37a   : >> { %v1766_v25 = vpop.permute.xlu1 %1765  ;;  %v1762_v7 = vpop.permute.xlu0 %1761 }
 0x37b   : >> { %v1865_v30 = vmul.f32 %v5236_v19, %v1766_v25  ;;  %v1864_v3 = vmul.f32 %v5236_v19, %v1762_v7  ;;  %v1982_v14 = vmul.f32 %v4543_v6, %v5445_v22  ;;  %v1981_v11 = vmul.f32 %v4545_v52, %v5447_v57  ;;  %v4553_v31 = vpop.eup %4552 }
 0x37c   : >> { %v4555_v62 = vpop.eup %4554 }
 0x37d   : >> { %v5453_v58 = vadd.f32 %v1869_v10, %v1865_v30  ;;  %v5455_v37 = vadd.f32 %v1868_v39, %v1864_v3  ;;  %v4557_v49 = vpop.eup %4556 }
 0x37e   : >> { %v1913_v9 = vpop.permute.xlu1 %1912  ;;  %v1909_v43 = vpop.permute.xlu0 %1908 }
 0x37f   : >> { %v1978_v27 = vmul.f32 %v5239_v28, %v1913_v9  ;;  %v1977_v4 = vmul.f32 %v5239_v28, %v1909_v43  ;;  %v1984_v19 = vmul.f32 %v4547_v54, %v5453_v58  ;;  %v1983_v21 = vmul.f32 %v4549_v5, %v5455_v37  ;;  %v4559_v60 = vpop.eup %4558 }
 0x381   : >> { %v5461_v46 = vadd.f32 %v1982_v14, %v1978_v27  ;;  %v5463_v23 = vadd.f32 %v1981_v11, %v1977_v4  ;;  %v4561_v39 = vpop.eup %4560 }
 0x382   : >> { %v1924_v36 = vpop.permute.xlu1 %1923  ;;  %v1920_v6 = vpop.permute.xlu0 %1919 }
 0x383   : >> { %v1980_v32 = vmul.f32 %v5247_v44, %v1924_v36  ;;  %v1979_v55 = vmul.f32 %v5247_v44, %v1920_v6  ;;  %v2138_v41 = vmul.f32 %v4551_v20, %v5461_v46  ;;  %v2137_v28 = vmul.f32 %v4553_v31, %v5463_v23  ;;  %v4563_v5 = vpop.eup %4562 }
 0x385   : >> { %v5469_v38 = vadd.f32 %v1984_v19, %v1980_v32  ;;  %v5471_v52 = vadd.f32 %v1983_v21, %v1979_v55  ;;  %v4565_v14 = vpop.eup %4564 }
 0x386   : >> { %v2027_v45 = vpop.permute.xlu1 %2026  ;;  %v2023_v10 = vpop.permute.xlu0 %2022 }
 0x387   : >> { %v2134_v34 = vmul.f32 %v5260_v56, %v2027_v45  ;;  %v2133_v54 = vmul.f32 %v5260_v56, %v2023_v10  ;;  %v2140_v25 = vmul.f32 %v4555_v62, %v5469_v38  ;;  %v2139_v44 = vmul.f32 %v4557_v49, %v5471_v52 }
 0x389   : >> { %v5477_v7 = vadd.f32 %v2138_v41, %v2134_v34  ;;  %v5479_v18 = vadd.f32 %v2137_v28, %v2133_v54 }
 0x38a   : >> { %v2038_v30 = vpop.permute.xlu1 %2037  ;;  %v2034_v3 = vpop.permute.xlu0 %2033 }
 0x38b   : >> { %v2136_v11 = vmul.f32 %v5265_v33, %v2038_v30  ;;  %v2135_v20 = vmul.f32 %v5265_v33, %v2034_v3  ;;  %v2252_v9 = vmul.f32 %v4559_v60, %v5477_v7  ;;  %v2251_v56 = vmul.f32 %v4561_v39, %v5479_v18 }
 0x38d   : >> { %v5485_v43 = vadd.f32 %v2140_v25, %v2136_v11  ;;  %v5487_v31 = vadd.f32 %v2139_v44, %v2135_v20 }
 0x38e   : >> { %v2183_v27 = vpop.permute.xlu1 %2182  ;;  %v2179_v4 = vpop.permute.xlu0 %2178 }
 0x38f   : >> { %v2248_v19 = vmul.f32 %v5272_v50, %v2183_v27  ;;  %v2247_v21 = vmul.f32 %v5272_v50, %v2179_v4  ;;  %v2254_v62 = vmul.f32 %v4563_v5, %v5485_v43  ;;  %v2253_v36 = vmul.f32 %v4565_v14, %v5487_v31 }
 0x391   : >> { %v5493_v14 = vadd.f32 %v2252_v9, %v2248_v19   ;;  %v5495_v33 = vadd.f32 %v2251_v56, %v2247_v21  }
 0x392   : >> { %v2194_v6 = vpop.permute.xlu1 %2193  ;;  %v2190_v49 = vpop.permute.xlu0 %2189 }
 0x393   : >> { %v2250_v32 = vmul.f32 %v5276_v29, %v2194_v6  ;;  %v2249_v55 = vmul.f32 %v5276_v29, %v2190_v49 }
 0x395   : >> { %v5499_v11 = vadd.f32 %v2254_v62, %v2250_v32   ;;  %v5501_v41 = vadd.f32 %v2253_v36, %v2249_v55  }
 0x396   : >> { %v1390_v28 = vpop.permute.xlu1 %1389  ;;  %v1386_v50 = vpop.permute.xlu0 %1385 }
 0x397   : >> { %v1448_v60 = vmul.f32 %v5365_v17, %v1390_v28  ;;  %v1447_v45 = vmul.f32 %v5367_v40, %v1386_v50 }
 0x399   : >> { %v1452_v10 = vsel %vm703_vm2, %v1448_v60, 0.0  ;;  %v1451_v39 = vsel %vm703_vm2, %v1447_v45, 0.0  ;;  %v1469_v45 = vrot.slane %v5377_v12, 2 }
 0x39a   : >> { %v1453_v34 = vadd.f32 %v1452_v10, %v1451_v39  ;;  %v1398_v54 = vpop.permute.xlu1 %1397  ;;  %v1394_v25 = vpop.permute.xlu0 %1393 }
 0x39b   : >> { %v1450_v44 = vmul.f32 %v5379_v48, %v1398_v54  ;;  %v1449_v29 = vmul.f32 %v5382_v61, %v1394_v25 }
 0x39c   : >> { %v1454_v5 = vrot.slane %v1453_v34, 4 }
 0x39d   : >> { %v1461_v30 = vsel %vm703_vm2, %v1450_v44, 0.0  ;;  %v1460_v3 = vsel %vm703_vm2, %v1449_v29, 0.0 }
 0x39e   : >> { %v1455_v20 = vadd.f32 %v1454_v5, %v1453_v34  ;;  %v1462_v17 = vadd.f32 %v1461_v30, %v1460_v3  ;;  %v1782_v9 = vpop.permute.xlu1 %1781  ;;  %v1778_v40 = vpop.permute.xlu0 %1777 }
 0x39f   : >> { %v1877_v56 = vmul.f32 %v5453_v58, %v1782_v9  ;;  %v1876_v27 = vmul.f32 %v5455_v37, %v1778_v40 }
 0x3a0   : >> { %v1456_v4 = vrot.slane %v1455_v20, 2  ;;  %v1463_v19 = vrot.slane %v1462_v17, 4 }
 0x3a1   : >> { %v1888_v21 = vsel %vm703_vm2, %v1877_v56, 0.0  ;;  %v1887_v48 = vsel %vm703_vm2, %v1876_v27, 0.0 }
 0x3a2   : >> { %v1457_v61 = vadd.f32 %v1456_v4, %v1455_v20  ;;  %v1464_v62 = vadd.f32 %v1463_v19, %v1462_v17  ;;  %v5515_v36 = vadd.f32 %v1888_v21, %v1887_v48  ;;  %v1932_v6 = vpop.permute.xlu1 %1931  ;;  %v1928_v49 = vpop.permute.xlu0 %1927 }
 0x3a3   : >> { %v1990_v32 = vmul.f32 %v5461_v46, %v1932_v6  ;;  %v1989_v55 = vmul.f32 %v5463_v23, %v1928_v49  ;;  %v1470_v23 = vrot.slane %v5377_v12, 3 }
 0x3a4   : >> { %v1458_v28 = vrot.slane %v1457_v61, 1  ;;  %v1465_v58 = vrot.slane %v1464_v62, 2 }
 0x3a5   : >> { %v1994_v37 = vsel %vm703_vm2, %v1990_v32, 0.0  ;;  %v1993_v50 = vsel %vm703_vm2, %v1989_v55, 0.0 }
 0x3a6   : >> { %v1459_v60 = vadd.f32 %v1458_v28, %v1457_v61  ;;  %v1466_v10 = vadd.f32 %v1465_v58, %v1464_v62  ;;  %v1995_v39 = vadd.f32 %v1994_v37, %v1993_v50  ;;  %v1940_v34 = vpop.permute.xlu1 %1939  ;;  %v1936_v54 = vpop.permute.xlu0 %1935 }
 0x3a7   : >> { %v1992_v25 = vmul.f32 %v5469_v38, %v1940_v34  ;;  %v1991_v44 = vmul.f32 %v5471_v52, %v1936_v54 }
 0x3a8   : >> { %v1467_v46 = vrot.slane %v1466_v10, 1  ;;  %v1996_v29 = vrot.slane %v1995_v39, 4  ;;  %v1473_v3 = vadd.f32 %v1469_v45, %v1459_v60 }
 0x3a9   : >> { %v2003_v5 = vsel %vm703_vm2, %v1992_v25, 0.0  ;;  %v2002_v30 = vsel %vm703_vm2, %v1991_v44, 0.0 }
 0x3aa   : >> { %v1468_v20 = vadd.f32 %v1467_v46, %v1466_v10  ;;  %v1997_v17 = vadd.f32 %v1996_v29, %v1995_v39  ;;  %v1504_v9 = vpop.permute.xlu1 %1503  ;;  %v1500_v40 = vpop.permute.xlu0 %1499  ;;  %v2004_v56 = vadd.f32 %v2003_v5, %v2002_v30  ;;  %v2295_v61 = vrot.slane %v1473_v3, 6 }
 0x3ab   : >> { %v1604_v27 = vmul.f32 %v5395_v53, %v1504_v9  ;;  %v1603_v38 = vmul.f32 %v5397_v2, %v1500_v40  ;;  %v6334_v2 = vld [vmem:[#allocation15_spill] sm:$0xff] }
 0x3ac   : >> { %v1474_v4 = vadd.f32 %v1470_v23, %v1468_v20  ;;  %v1998_v52 = vrot.slane %v1997_v17, 2  ;;  %v2005_v19 = vrot.slane %v2004_v56, 4  ;;  %v5535_v37 = vmul.f32 %v4991_v1, %v6334_v2  ;;  %v4203_v1 = vld [vmem:[%s6293_s12 + $0x1] ss:$0 sm:$0xff] (%p1179_p4) }
 0x3ad   : >> { %v1608_v21 = vsel %vm703_vm2, %v1604_v27, 0.0  ;;  %v1607_v48 = vsel %vm703_vm2, %v1603_v38, 0.0 }
 0x3ae   : >> { %v2296_v62 = vrot.slane %v1474_v4, 5  ;;  %v1999_v6 = vadd.f32 %v1998_v52, %v1997_v17  ;;  %v1609_v49 = vadd.f32 %v1608_v21, %v1607_v48  ;;  %v1512_v32 = vpop.permute.xlu1 %1511  ;;  %v1508_v55 = vpop.permute.xlu0 %1507  ;;  %v2006_v28 = vadd.f32 %v2005_v19, %v2004_v56 }
 0x3af   : >> { %v1606_v58 = vmul.f32 %v5407_v24, %v1512_v32  ;;  %v1605_v53 = vmul.f32 %v5409_v15, %v1508_v55  ;;  %v2011_v24 = vrot.slane %v5535_v37, 2  ;;  %v1890_v17 = vrot.slane %v5515_v36, 4 }
 0x3b0   : >> { %v2298_v50 = vsel %vm2297_vm14, %v2296_v62, %v2295_v61  ;;  %v2000_v60 = vrot.slane %v1999_v6, 1  ;;  %v1610_v45 = vrot.slane %v1609_v49, 4  ;;  %v2007_v39 = vrot.slane %v2006_v28, 2 }
 0x3b1   : >> { %v5540_v10 = vsel %vm993_vm3, %v5419_v26, %v2298_v50  ;;  %v1617_v34 = vsel %vm703_vm2, %v1606_v58, 0.0  ;;  %v1616_v54 = vsel %vm703_vm2, %v1605_v53, 0.0  ;;  %v2012_v26 = vrot.slane %v5535_v37, 3 }
 0x3b2   : >> { %v1611_v15 = vadd.f32 %v1610_v45, %v1609_v49  ;;  %v1618_v25 = vadd.f32 %v1617_v34, %v1616_v54  ;;  %v2046_v44 = vpop.permute.xlu1 %2045  ;;  %v2042_v46 = vpop.permute.xlu0 %2041  ;;  %v2001_v23 = vadd.f32 %v2000_v60, %v1999_v6  ;;  %v2008_v29 = vadd.f32 %v2007_v39, %v2006_v28 }
 0x3b3   : >> { %v2146_v5 = vmul.f32 %v5477_v7, %v2046_v44  ;;  %v2145_v30 = vmul.f32 %v5479_v18, %v2042_v46  ;;  %v1898_v27 = vrot.slane %v5535_v37, 1  ;;  %v1625_v6 = vrot.slane %v5377_v12, 4 }
 0x3b4   : >> { %v1612_v3 = vrot.slane %v1611_v15, 2  ;;  %v1619_v20 = vrot.slane %v1618_v25, 4  ;;  %v2009_v9 = vrot.slane %v2008_v29, 1  ;;  %v2015_v21 = vadd.f32 %v2011_v24, %v2001_v23 }
 0x3b5   : >> { %v2150_v40 = vsel %vm703_vm2, %v2146_v5, 0.0  ;;  %v2149_v56 = vsel %vm703_vm2, %v2145_v30, 0.0  ;;  %v1891_v55 = vadd.f32 %v1890_v17, %v5515_v36 }
 0x3b6   : >> { %v1613_v38 = vadd.f32 %v1612_v3, %v1611_v15  ;;  %v1620_v4 = vadd.f32 %v1619_v20, %v1618_v25  ;;  %v2151_v52 = vadd.f32 %v2150_v40, %v2149_v56  ;;  %v2054_v19 = vpop.permute.xlu1 %2053  ;;  %v2050_v7 = vpop.permute.xlu0 %2049  ;;  %v2010_v18 = vadd.f32 %v2009_v9, %v2008_v29 }
 0x3b7   : >> { %v2148_v48 = vmul.f32 %v5485_v43, %v2054_v19  ;;  %v2147_v61 = vmul.f32 %v5487_v31, %v2050_v7  ;;  %v2321_v39 = vrot.slane %v2015_v21, 6  ;;  %v1626_v15 = vrot.slane %v5377_v12, 5 }
 0x3b8   : >> { %v1614_v62 = vrot.slane %v1613_v38, 1  ;;  %v1621_v49 = vrot.slane %v1620_v4, 2  ;;  %v2152_v32 = vrot.slane %v2151_v52, 4  ;;  %v2016_v28 = vadd.f32 %v2012_v26, %v2010_v18 }
 0x3b9   : >> { %v2159_v58 = vsel %vm703_vm2, %v2148_v48, 0.0  ;;  %v2158_v53 = vsel %vm703_vm2, %v2147_v61, 0.0  ;;  %v2167_v3 = vrot.slane %v5535_v37, 4  ;;  %v1892_v17 = vrot.slane %v1891_v55, 2 }
 0x3ba   : >> { %v1615_v2 = vadd.f32 %v1614_v62, %v1613_v38  ;;  %v1622_v50 = vadd.f32 %v1621_v49, %v1620_v4  ;;  %v2153_v60 = vadd.f32 %v2152_v32, %v2151_v52  ;;  %v2160_v43 = vadd.f32 %v2159_v58, %v2158_v53  ;;  %v1660_v45 = vpop.permute.xlu1 %1659  ;;  %v1656_v31 = vpop.permute.xlu0 %1655 }
 0x3bb   : >> { %v2322_v34 = vrot.slane %v2016_v28, 5  ;;  %v1718_v54 = vmul.f32 %v5423_v51, %v1660_v45  ;;  %v1717_v24 = vmul.f32 %v5425_v47, %v1656_v31  ;;  %v2168_v19 = vrot.slane %v5535_v37, 5 }
 0x3bc   : >> { %v1623_v36 = vrot.slane %v1622_v50, 1  ;;  %v2154_v25 = vrot.slane %v2153_v60, 2  ;;  %v2161_v44 = vrot.slane %v2160_v43, 4  ;;  %v1629_v23 = vadd.f32 %v1625_v6, %v1615_v2 }
 0x3bd   : >> { %v5562_v46 = vsel %vm2297_vm14, %v2322_v34, %v2321_v39  ;;  %v1722_v29 = vsel %vm703_vm2, %v1718_v54, 0.0  ;;  %v1721_v5 = vsel %vm703_vm2, %v1717_v24, 0.0 }
 0x3be   : >> { %v1624_v30 = vadd.f32 %v1623_v36, %v1622_v50  ;;  %v2155_v26 = vadd.f32 %v2154_v25, %v2153_v60  ;;  %v2162_v51 = vadd.f32 %v2161_v44, %v2160_v43  ;;  %v1668_v20 = vpop.permute.xlu1 %1667  ;;  %v1664_v47 = vpop.permute.xlu0 %1663  ;;  %v1723_v9 = vadd.f32 %v1722_v29, %v1721_v5 }
 0x3bf   : >> { %v1720_v40 = vmul.f32 %v5433_v16, %v1668_v20  ;;  %v1719_v56 = vmul.f32 %v5435_v13, %v1664_v47  ;;  %v2302_v7 = vrot.slane %v1629_v23, 4  ;;  %v1893_v16 = vadd.f32 %v1892_v17, %v1891_v55 }
 0x3c0   : >> { %v1630_v38 = vadd.f32 %v1626_v15, %v1624_v30  ;;  %v2156_v4 = vrot.slane %v2155_v26, 1  ;;  %v2163_v52 = vrot.slane %v2162_v51, 2  ;;  %v1724_v21 = vrot.slane %v1723_v9, 4 }
 0x3c1   : >> { %v1731_v18 = vsel %vm703_vm2, %v1720_v40, 0.0  ;;  %v1730_v48 = vsel %vm703_vm2, %v1719_v56, 0.0  ;;  %v1739_v55 = vrot.slane %v5377_v12, 6  ;;  %v1894_v15 = vrot.slane %v1893_v16, 1 }
 0x3c2   : >> { %v2303_v61 = vrot.slane %v1630_v38, 3  ;;  %v2157_v62 = vadd.f32 %v2156_v4, %v2155_v26  ;;  %v2164_v6 = vadd.f32 %v2163_v52, %v2162_v51  ;;  %v1732_v49 = vadd.f32 %v1731_v18, %v1730_v48  ;;  %v1774_v32 = vpop.permute.xlu1 %1773  ;;  %v1770_v28 = vpop.permute.xlu0 %1769 }
 0x3c3   : >> { %v1725_v58 = vadd.f32 %v1724_v21, %v1723_v9  ;;  %v1875_v13 = vmul.f32 %v5445_v22, %v1774_v32  ;;  %v1874_v53 = vmul.f32 %v5447_v57, %v1770_v28  ;;  %v1740_v5 = vrot.slane %v5377_v12, 7 }
 0x3c4   : >> { %v2305_v2 = vsel %vm2304_vm15, %v2303_v61, %v2302_v7  ;;  %v2171_v50 = vadd.f32 %v2167_v3, %v2157_v62  ;;  %v2165_v60 = vrot.slane %v2164_v6, 1  ;;  %v1733_v43 = vrot.slane %v1732_v49, 4 }
 0x3c5   : >> { %v2339_v45 = vsel %vm2338_vm1, %v5540_v10, %v2305_v2  ;;  %v1726_v31 = vrot.slane %v1725_v58, 2  ;;  %v1879_v39 = vsel %vm703_vm2, %v1875_v13, 0.0  ;;  %v1878_v34 = vsel %vm703_vm2, %v1874_v53, 0.0 }
 0x3c6   : >> { %v2166_v54 = vadd.f32 %v2165_v60, %v2164_v6  ;;  %v1734_v24 = vadd.f32 %v1733_v43, %v1732_v49  ;;  %v1880_v22 = vadd.f32 %v1879_v39, %v1878_v34  ;;  %v2202_v36 = vpop.permute.xlu1 %2201  ;;  %v2198_v57 = vpop.permute.xlu0 %2197  ;;  %v2327_v26 = vrot.slane %v2171_v50, 4 }
 0x3c7   : >> { %v1727_v25 = vadd.f32 %v1726_v31, %v1725_v58  ;;  %v2260_v44 = vmul.f32 %v5493_v14, %v2202_v36  ;;  %v2259_v23 = vmul.f32 %v5495_v33, %v2198_v57  ;;  %v1895_v4 = vadd.f32 %v1894_v15, %v1893_v16 }
 0x3c8   : >> { %v2172_v29 = vadd.f32 %v2168_v19, %v2166_v54  ;;  %v1735_v10 = vrot.slane %v1734_v24, 2  ;;  %v1881_v30 = vrot.slane %v1880_v22, 4 }
 0x3c9   : >> { %v1728_v3 = vrot.slane %v1727_v25, 1  ;;  %v2264_v51 = vsel %vm703_vm2, %v2260_v44, 0.0  ;;  %v2263_v20 = vsel %vm703_vm2, %v2259_v23, 0.0  ;;  %v1902_v16 = vadd.f32 %v1898_v27, %v1895_v4 }
 0x3ca   : >> { %v2328_v47 = vrot.slane %v2172_v29, 3  ;;  %v1736_v17 = vadd.f32 %v1735_v10, %v1734_v24  ;;  %v1882_v9 = vadd.f32 %v1881_v30, %v1880_v22  ;;  %v2265_v40 = vadd.f32 %v2264_v51, %v2263_v20  ;;  %v2210_v56 = vpop.permute.xlu1 %2209  ;;  %v2206_v38 = vpop.permute.xlu0 %2205 }
 0x3cb   : >> { %v1729_v52 = vadd.f32 %v1728_v3, %v1727_v25  ;;  %v2262_v19 = vmul.f32 %v5499_v11, %v2210_v56  ;;  %v2261_v7 = vmul.f32 %v5501_v41, %v2206_v38  ;;  %v2316_v54 = vrot.slane %v1902_v16, 7  ;;  %v2399_v56 = vld [vmem:[#allocation2 + $0x6] sm:$0xff] (%p1179_p4)  ;;  %v2462_v38 = vld [vmem:[%s6295_s14 + $0x18] sm:$0xff] (%p1179_p4) }
 0x3cc   : >> { %v2329_v12 = vsel %vm2304_vm15, %v2328_v47, %v2327_v26  ;;  %v1737_v21 = vrot.slane %v1736_v17, 1  ;;  %v1883_v18 = vrot.slane %v1882_v9, 2  ;;  %v2266_v48 = vrot.slane %v2265_v40, 4 }
 0x3cd   : >> { %v1743_v61 = vadd.f32 %v1739_v55, %v1729_v52  ;;  %v2273_v62 = vsel %vm703_vm2, %v2262_v19, 0.0  ;;  %v2272_v6 = vsel %vm703_vm2, %v2261_v7, 0.0  ;;  %v2281_v25 = vrot.slane %v5535_v37, 6  ;;  %v4205_v52 = vld [vmem:[%s6293_s12 + $0x3] ss:$0 sm:$0xff] (%p1179_p4)  ;;  %v2349_v19 = vld [vmem:[#allocation2 + $0x14] sm:$0xff] (%p1179_p4) }
 0x3ce   : >> { %v1738_v49 = vadd.f32 %v1737_v21, %v1736_v17  ;;  %v1884_v32 = vadd.f32 %v1883_v18, %v1882_v9  ;;  %v2267_v28 = vadd.f32 %v2266_v48, %v2265_v40  ;;  %v2274_v58 = vadd.f32 %v2273_v62, %v2272_v6  ;;  %v2348_v17 = vld [vmem:[#allocation2 + $0xc] sm:$0xff] (%p1179_p4)  ;;  %v4204_v40 = vld [vmem:[%s6293_s12 + $0x2] ss:$0 sm:$0xff] (%p1179_p4) }
 0x3cf   : >> { %v2309_v60 = vrot.slane %v1743_v61, 2  ;;  %v6336_v16 = vmov %v5495_v33  ;;  %v2463_v33 = vld [vmem:[%s6295_s14 + $0x20] sm:$0xff] (%p1179_p4)  ;;  %v2357_v14 = vmul.f32 (%p1179_p4), %v4202_v63, %v2348_v17  ;;  %v2374_v11 = vmul.f32 (%p1179_p4), %v4203_v1, %v2365_v0  ;;  %v2382_v9 = vld [vmem:[#allocation2 + $0x8] sm:$0xff] (%p1179_p4)  ;;  %v2461_v7 = vld [vmem:[%s6295_s14 + $0x10] sm:$0xff] (%p1179_p4) }
 0x3d0   : >> { %v1744_v13 = vadd.f32 %v1740_v5, %v1738_v49  ;;  %v1885_v53 = vrot.slane %v1884_v32, 1  ;;  %v2268_v2 = vrot.slane %v2267_v28, 2  ;;  %v2275_v50 = vrot.slane %v2274_v58, 4  ;;  %v2366_v48 = vld [vmem:[#allocation2 + $0x12] sm:$0xff] (%p1179_p4) }
 0x3d1   : >> { %v2282_v5 = vrot.slane %v5535_v37, 7  ;;  %v2391_v4 = vmul.f32 (%p1179_p4), %v4204_v40, %v2382_v9  ;;  %v2408_v21 = vmul.f32 (%p1179_p4), %v4205_v52, %v2399_v56  ;;  %v2358_v18 = vmul.f32 (%p1179_p4), %v4202_v63, %v2349_v19  ;;  %v2383_v61 = vld [vmem:[#allocation2 + $0x10] sm:$0xff] (%p1179_p4) }
 0x3d2   : >> { %v2310_v43 = vrot.slane %v1744_v13, 1  ;;  %v1886_v31 = vadd.f32 %v1885_v53, %v1884_v32  ;;  %v2269_v39 = vadd.f32 %v2268_v2, %v2267_v28  ;;  %v2276_v34 = vadd.f32 %v2275_v50, %v2274_v58  ;;  %v2400_v62 = vld [vmem:[#allocation2 + $0xe] sm:$0xff] (%p1179_p4)  ;;  %v2350_v32 = vld [vmem:[#allocation2 + $0x1c] sm:$0xff] (%p1179_p4) }
 0x3d3   : >> { %v6335_v13 = vmov %v5501_v41  ;;  %v2464_v41 = vld [vmem:[%s6295_s14 + $0x28] sm:$0xff] (%p1179_p4)  ;;  %v2375_v6 = vmul.f32 (%p1179_p4), %v4203_v1, %v2366_v48  ;;  %v2392_v49 = vmul.f32 (%p1179_p4), %v4204_v40, %v2383_v61  ;;  %v2367_v28 = vld [vmem:[#allocation2 + $0x1a] sm:$0xff] (%p1179_p4) }
 0x3d4   : >> { %v2312_v55 = vsel %vm2311_vm5, %v2310_v43, %v2309_v60  ;;  %v1901_v24 = vadd.f32 %v5535_v37, %v1886_v31  ;;  %v2270_v22 = vrot.slane %v2269_v39, 1  ;;  %v2277_v36 = vrot.slane %v2276_v34, 2  ;;  %v2466_v37 = vld [vmem:[%s6295_s14 + $0x38] sm:$0xff] (%p1179_p4)  ;;  %v2351_v60 = vld [vmem:[#allocation2 + $0x24] sm:$0xff] (%p1179_p4)  ;;  %v4206_v31 = vld [vmem:[%s6294_s13] ss:$0 sm:$0xff] (%p1179_p4) }
 0x3d5   : >> { %v2341_v27 = vsel %vm2340_vm6, %v2339_v45, %v2312_v55  ;;  %4314 = vmatprep.subr.mxu0 (%p1179_p4), %v2466_v37  ;;  %v2384_v58 = vld [vmem:[#allocation2 + $0x18] sm:$0xff] (%p1179_p4)  ;;  %v2359_v13 = vmul.f32 (%p1179_p4), %v4202_v63, %v2350_v32  ;;  %v2376_v53 = vmul.f32 (%p1179_p4), %v4203_v1, %v2367_v28  ;;  %v2368_v43 = vld [vmem:[#allocation2 + $0x22] sm:$0xff] (%p1179_p4)  ;;  %v2564_v48 = vld [vmem:[%s6296_s15] sm:$0x3] (%p1179_p4) }
 0x3d6   : >> { %2346 = vst.msk [vmem:[%s2345_s3] sm:$0xff] %vm703_vm2, %v2341_v27  ;;  %v2317_v57 = vsel %vm2290_vm13, %v2316_v54, %v1901_v24  ;;  %v2271_v15 = vadd.f32 %v2270_v22, %v2269_v39  ;;  %v2278_v44 = vadd.f32 %v2277_v36, %v2276_v34  ;;  %4315 = vmatpush3.msra.mxu0 (%p1179_p4), %v2466_v37  ;;  %v2401_v50 = vld [vmem:[#allocation2 + $0x16] sm:$0xff] (%p1179_p4)  ;;  %v2385_v24 = vld [vmem:[#allocation2 + $0x20] sm:$0xff] (%p1179_p4)  ;;  %v2460_v36 = vld [vmem:[%s6295_s14 + $0x8] sm:$0xff] (%p1179_p4) }
 0x3d7   : >> { %v2342_v23 = vsel %vm993_vm3, %v2317_v57, %v5562_v46  ;;  %v2465_v46 = vld [vmem:[%s6295_s14 + $0x30] sm:$0xff] (%p1179_p4)  ;;  %v2393_v2 = vmul.f32 (%p1179_p4), %v4204_v40, %v2384_v58  ;;  %v2379_v39 = vadd.f32 (%p1179_p4), %v2375_v6, %v2358_v18  ;;  %v2409_v34 = vmul.f32 (%p1179_p4), %v4205_v52, %v2400_v62  ;;  %v2402_v22 = vld [vmem:[#allocation2 + $0x1e] sm:$0xff] (%p1179_p4)  ;;  %4336 = vmatprep.subr.msk.mxu1 (%p1179_p4), %vm993_vm3, %v2564_v48  ;;  %v5690_v58 = vld [vmem:[%s6298_s17 + $0x8] sm:$0xff] (%p1179_p4) }
 0x3d8   : >> { %v2343_v29 = vsel %vm2338_vm1, %v2342_v23, %v2329_v12  ;;  %v2279_v10 = vrot.slane %v2278_v44, 1  ;;  %v2285_v30 = vadd.f32 %v2281_v25, %v2271_v15  ;;  %4316 = vmatprep.subr.mxu0 (%p1179_p4), %v2465_v46  ;;  %v2378_v12 = vadd.f32 (%p1179_p4), %v2374_v11, %v2357_v14  ;;  %4337 = vmatpush3.msk.msra.mxu1 (%p1179_p4), %vm993_vm3, %v2564_v48  ;;  %v5685_v28 = vld [vmem:[%s6298_s17] sm:$0xff] (%p1179_p4) }
 0x3d9   : > { %4317 = vmatpush3.msra.mxu0 (%p1179_p4), %v2465_v46  ;;  %v2360_v54 = vmul.f32 (%p1179_p4), %v4202_v63, %v2351_v60  ;;  %v2377_v55 = vmul.f32 (%p1179_p4), %v4203_v1, %v2368_v43  ;;  %v2380_v57 = vadd.f32 (%p1179_p4), %v2376_v53, %v2359_v13  ;;  %v2410_v15 = vmul.f32 (%p1179_p4), %v4205_v52, %v2401_v50  ;;  %v4215_v50 = vld [vmem:[%s6297_s16] ss:$0 sm:$0xff] (%p1179_p4) }
 0x3da   : >> { %v2280_v26 = vadd.f32 %v2279_v10, %v2278_v44  ;;  %v2333_v3 = vrot.slane %v2285_v30, 2  ;;  %4318 = vmatprep.subr.mxu0 (%p1179_p4), %v2464_v41  ;;  %v2395_v16 = vadd.f32 (%p1179_p4), %v2391_v4, %v2378_v12  ;;  %v2394_v25 = vmul.f32 (%p1179_p4), %v4204_v40, %v2385_v24  ;;  %v2459_v10 = vld [vmem:[%s6295_s14] sm:$0xff] (%p1179_p4) }
 0x3db   : > { %4319 = vmatpush3.msra.mxu0 (%p1179_p4), %v2464_v41  ;;  %v2396_v44 = vadd.f32 (%p1179_p4), %v2392_v49, %v2379_v39  ;;  %v2381_v23 = vadd.f32 (%p1179_p4), %v2377_v55, %v2360_v54  ;;  %v2397_v30 = vadd.f32 (%p1179_p4), %v2393_v2, %v2380_v57 }
 0x3dc   : >> { %v2286_v45 = vadd.f32 %v2282_v5, %v2280_v26  ;;  %4320 = vmatprep.subr.mxu0 (%p1179_p4), %v2463_v33  ;;  %v2412_v27 = vadd.f32 (%p1179_p4), %v2408_v21, %v2395_v16  ;;  %v5695_v16 = vld [vmem:[%s6299_s18] ss:$0 sm:$0xff] (%p1179_p4) }
 0x3dd   : > { %4321 = vmatpush3.msra.mxu0 (%p1179_p4), %v2463_v33  ;;  %v2413_v26 = vadd.f32 (%p1179_p4), %v2409_v34, %v2396_v44 }
 0x3de   : >> { %v2334_v51 = vrot.slane %v2286_v45, 1  ;;  %1181 = sbr.rel (!%p1179_p4) target bundleno = 724 (0x2d4), region = 148  ;;  %4322 = vmatprep.subr.mxu0 (%p1179_p4), %v2462_v38  ;;  %v2423_v5 = vadd.f32 (%p1179_p4), %v4206_v31, %v2412_v27  ;;  %v2398_v45 = vadd.f32 (%p1179_p4), %v2394_v25, %v2381_v23 }
 0x3df   : > { %4323 = vmatpush3.msra.mxu0 (%p1179_p4), %v2462_v38 }
 0x3e0   : >> { %v2335_v20 = vsel %vm2311_vm5, %v2334_v51, %v2333_v3  ;;  %4324 = vmatprep.subr.mxu0 (%p1179_p4), %v2461_v7  ;;  %v4207_v3 = vmul.f32 (%p1179_p4), -1.442695, %v2423_v5  ;;  %v2414_v51 = vadd.f32 (%p1179_p4), %v2410_v15, %v2397_v30 }
 0x3e1   : >> { %v2344_v47 = vsel %vm2340_vm6, %v2343_v29, %v2335_v20  ;;  %v2411_v29 = vmul.f32 (%p1179_p4), %v4205_v52, %v2402_v22  ;;  %4325 = vmatpush3.msra.mxu0 (%p1179_p4), %v2461_v7  ;;  %v2424_v20 = vadd.f32 (%p1179_p4), %v4206_v31, %v2413_v26 }
 0x3e2   : >> { %2347 = vst.msk [vmem:[%s2345_s3 + $0x8] sm:$0xff] %vm703_vm2, %v2344_v47  ;;  %4326 = vmatprep.subr.mxu0 (%p1179_p4), %v2460_v36  ;;  %4566 = vpow2.f32 (%p1179_p4), %v4207_v3  ;;  %v2425_v37 = vadd.f32 (%p1179_p4), %v4206_v31, %v2414_v51  ;;  %s5743_s3 = smov (%p1179_p4), 0  }
 0x3e3   : > { %4327 = vmatpush3.msra.mxu0 %v2460_v36  ;;  %v2415_v47 = vadd.f32 %v2411_v29, %v2398_v45  ;;  %v4208_v46 = vmul.f32 -1.442695, %v2424_v20 }
 0x3e4   : > { %4328 = vmatprep.subr.mxu0 %v2459_v10  ;;  %v4209_v33 = vmul.f32 -1.442695, %v2425_v37 }
 0x3e5   : > { %4329 = vmatpush3.msra.mxu0 %v2459_v10  ;;  %v2426_v41 = vadd.f32 %v4206_v31, %v2415_v47  ;;  %4568 = vpow2.f32 %v4208_v46 }
 0x3e6   : > { %4570 = vpow2.f32 %v4209_v33 }
 0x3e7   : > { %v4210_v17 = vmul.f32 -1.442695, %v2426_v41 }
 0x3e9   : > { %4572 = vpow2.f32 %v4210_v17 }
 0x3ef   : > { %v4567_v63 = vpop.eup %4566 }
 0x3f0   : > { %v2439_v0 = vadd.f32 1.0, %v4567_v63 }
 0x3f2   : > { %v4569_v1 = vpop.eup %4568  ;;  %4574 = vrcp.f32 %v2439_v0 }
 0x3f3   : > { %v4571_v14 = vpop.eup %4570  ;;  %v2440_v11 = vadd.f32 1.0, %v4569_v1 }
 0x3f4   : > { %v2441_v40 = vadd.f32 1.0, %v4571_v14 }
 0x3f5   : > { %4576 = vrcp.f32 %v2440_v11 }
 0x3f6   : > { %v4573_v9 = vpop.eup %4572  ;;  %4578 = vrcp.f32 %v2441_v40 }
 0x3f7   : > { %v2442_v56 = vadd.f32 1.0, %v4573_v9 }
 0x3f9   : > { %4580 = vrcp.f32 %v2442_v56 }
 0x3ff   : > { %v4575_v38 = vpop.eup %4574 }
 0x400   : > { %v2451_v4 = vmul.f32 %v4575_v38, %v2423_v5 }
 0x402   : > { %v4577_v52 = vpop.eup %4576  ;;  %2455 = vst.msk [vmem:[#allocation4] sm:$0xff] %vm703_vm2, %v2451_v4  ;;  %4330 = vmatprep.mubr.msk.f32.mxu0 %vm703_vm2, %v2451_v4 }
 0x403   : > { %v4579_v19 = vpop.eup %4578  ;;  %v2452_v7 = vmul.f32 %v4577_v52, %v2424_v20 }
 0x404   : > { %v2453_v21 = vmul.f32 %v4579_v19, %v2425_v37 }
 0x405   : > { %2456 = vst.msk [vmem:[#allocation4 + $0x8] sm:$0xff] %vm703_vm2, %v2452_v7  ;;  %4331 = vmatmul.mubr.msk.f32.vlgmr.msra.gmra.mxu0 %vm703_vm2, %v2452_v7 }
 0x406   : > { %v4581_v12 = vpop.eup %4580  ;;  %2457 = vst.msk [vmem:[#allocation4 + $0x10] sm:$0xff] %vm703_vm2, %v2453_v21  ;;  %4333 = vmatprep.mubr.msk.f32.mxu0 %vm703_vm2, %v2453_v21 }
 0x407   : > { %v2454_v18 = vmul.f32 %v4581_v12, %v2426_v41 }
 0x409   : > { %2458 = vst.msk [vmem:[#allocation4 + $0x18] sm:$0xff] %vm703_vm2, %v2454_v18  ;;  %4334 = vmatmul.mubr.msk.f32.gmra.mxu0 %vm703_vm2, %v2454_v18 }
 0x4c5   : > { %v4332_v61 = vpop.f32.mrf.mxu0 }
 0x4c7   : > { %v2545_v62 = vpop.f32.mrf.mxu0 }
 0x4c8   : > { %2748 = vrot.lane.b32.xlu0 %v2545_v62, %s4758_s24  ;;  %4338 = vmatprep.mubr.msk.f32.mxu1 %vm980_vm4, %v2545_v62 }
 0x4c9   : > { %v4335_v6 = vpop.f32.mrf.mxu0  ;;  %4339 = vmatmul.mubr.msk.f32.vlgmr.msra.gmra.mxu1 %vm980_vm4, %v4332_v61 }
 0x4cb   : > { %v2555_v49 = vpop.f32.mrf.mxu0 }
 0x4cc   : > { %2750 = vrot.lane.b32.xlu0 %v4332_v61, %s4758_s24  ;;  %2752 = vrot.lane.b32.xlu1 %v2555_v49, %s4758_s24 }
 0x4cd   : > { %4341 = vmatprep.mubr.msk.f32.mxu1 %vm980_vm4, %v2555_v49 }
 0x4ce   : > { %4342 = vmatmul.mubr.msk.f32.gmra.mxu1 %vm980_vm4, %v4335_v6 }
 0x4d0   : > { %2754 = vrot.lane.b32.xlu1 %v4335_v6, %s4758_s24 }
 0x53a   : > { %v2749_v32 = vpop.permute.xlu0 %2748 }
 0x53b   : > { %2760 = vst.msk [vmem:[#allocation6] sm:$0xff] %vm644_vm0, %v2749_v32 }
 0x53e   : > { %v2751_v13 = vpop.permute.xlu0 %2750  ;;  %v2753_v53 = vpop.permute.xlu1 %2752 }
 0x53f   : > { %2761 = vst.msk [vmem:[#allocation6 + $0x8] sm:$0xff] %vm644_vm0, %v2751_v13  ;;  %2762 = vst.msk [vmem:[#allocation6 + $0x10] sm:$0xff] %vm644_vm0, %v2753_v53 }
 0x542   : > { %v2755_v2 = vpop.permute.xlu1 %2754 }
 0x543   : > { %2763 = vst.msk [vmem:[#allocation6 + $0x18] sm:$0xff] %vm644_vm0, %v2755_v2 }
 0x589   : > { %v4340_v60 = vpop.f32.mrf.mxu1 }
 0x58a   : > { %v5703_v43 = vadd.f32 %v4340_v60, %v4215_v50 }
 0x58b   : > { %v2653_v31 = vpop.f32.mrf.mxu1 }
 0x58c   : > { %v2685_v39 = vand.u32 2147483647, %v5703_v43  ;;  %v5706_v34 = vadd.f32 %v4215_v50, %v2653_v31  ;;  %v2673_v4 = vmax.f32 %v5703_v43, 0.0  ;;  %vm2677_vm7 = vcmp.ne.f32.partialorder %v5703_v43, %v5703_v43 }
 0x58e   : > { %v2689_v54 = vsub.f32 0.0, %v2685_v39  ;;  %v2684_v55 = vand.u32 2147483647, %v5706_v34  ;;  %v4343_v24 = vpop.f32.mrf.mxu1  ;;  %v2672_v48 = vmax.f32 %v5706_v34, 0.0  ;;  %vm2676_vm8 = vcmp.ne.f32.partialorder %v5706_v34, %v5706_v34 }
 0x58f   : > { %v5709_v22 = vadd.f32 %v4343_v24, %v4215_v50 }
 0x590   : > { %v2694_v36 = vmul.f32 1.442695, %v2689_v54  ;;  %v2688_v27 = vsub.f32 0.0, %v2684_v55  ;;  %v2663_v57 = vpop.f32.mrf.mxu1 }
 0x591   : > { %v2687_v15 = vand.u32 2147483647, %v5709_v22  ;;  %v5712_v25 = vadd.f32 %v4215_v50, %v2663_v57  ;;  %v2675_v60 = vmax.f32 %v5709_v22, 0.0  ;;  %vm2679_vm11 = vcmp.ne.f32.partialorder %v5709_v22, %v5709_v22 }
 0x592   : > { %4582 = vpow2.f32 %v2694_v36  ;;  %v2692_v44 = vmul.f32 1.442695, %v2688_v27 }
 0x593   : > { %v2691_v23 = vsub.f32 0.0, %v2687_v15  ;;  %v2686_v29 = vand.u32 2147483647, %v5712_v25  ;;  %v2674_v24 = vmax.f32 %v5712_v25, 0.0  ;;  %vm2678_vm12 = vcmp.ne.f32.partialorder %v5712_v25, %v5712_v25 }
 0x594   : > { %4584 = vpow2.f32 %v2692_v44  ;;  %v5735_v15 = vmov 0.0   ;;  %v5737_v44 = vmov 0.0  }
 0x595   : > { %v2698_v10 = vmul.f32 1.442695, %v2691_v23  ;;  %v2690_v5 = vsub.f32 0.0, %v2686_v29  ;;  %v5739_v23 = vmov 0.0   ;;  %v5741_v29 = vmov 0.0  }
 0x597   : > { %4586 = vpow2.f32 %v2698_v10  ;;  %v2696_v30 = vmul.f32 1.442695, %v2690_v5 }
 0x599   : > { %4588 = vpow2.f32 %v2696_v30 }
 0x59f   : > { %v4583_v26 = vpop.eup %4582 }
 0x5a0   : > { %v2709_v45 = vadd.f32 1.0, %v4583_v26  ;;  %v2712_v41 = vmul.f32 -0.5, %v4583_v26  ;;  %v2715_v63 = vand.u32 2147483647, %v4583_v26 }
 0x5a1   : > { %v4585_v3 = vpop.eup %4584 }
 0x5a2   : > { %4590 = vlog2.f32 %v2709_v45  ;;  %v2700_v51 = vadd.f32 1.0, %v4585_v3  ;;  %v2703_v33 = vmul.f32 -0.5, %v4585_v3  ;;  %v2713_v17 = vadd.f32 1.0, %v2712_v41 }
 0x5a3   : > { %v2706_v11 = vand.u32 2147483647, %v4585_v3  ;;  %vm2716_vm0 = vcmp.lt.f32.partialorder %v2715_v63, 0.0004427343 }
 0x5a4   : > { %v4587_v20 = vpop.eup %4586  ;;  %4592 = vlog2.f32 %v2700_v51  ;;  %v2704_v1 = vadd.f32 1.0, %v2703_v33  ;;  %v2714_v56 = vmul.f32 %v4583_v26, %v2713_v17 }
 0x5a5   : > { %v2727_v47 = vadd.f32 1.0, %v4587_v20  ;;  %v2730_v0 = vmul.f32 -0.5, %v4587_v20  ;;  %v2733_v21 = vand.u32 2147483647, %v4587_v20  ;;  %vm2707_vm4 = vcmp.lt.f32.partialorder %v2706_v11, 0.0004427343 }
 0x5a6   : > { %v4589_v37 = vpop.eup %4588  ;;  %v2705_v12 = vmul.f32 %v4585_v3, %v2704_v1 }
 0x5a7   : > { %4594 = vlog2.f32 %v2727_v47  ;;  %v2718_v46 = vadd.f32 1.0, %v4589_v37  ;;  %v2721_v9 = vmul.f32 -0.5, %v4589_v37  ;;  %v2731_v52 = vadd.f32 1.0, %v2730_v0 }
 0x5a8   : > { %v2724_v49 = vand.u32 2147483647, %v4589_v37  ;;  %vm2734_vm9 = vcmp.lt.f32.partialorder %v2733_v21, 0.0004427343 }
 0x5a9   : > { %4596 = vlog2.f32 %v2718_v46  ;;  %v2722_v61 = vadd.f32 1.0, %v2721_v9  ;;  %v2732_v2 = vmul.f32 %v4587_v20, %v2731_v52 }
 0x5aa   : > { %vm2725_vm10 = vcmp.lt.f32.partialorder %v2724_v49, 0.0004427343 }
 0x5ab   : > { %v2723_v55 = vmul.f32 %v4589_v37, %v2722_v61 }
 0x5af   : > { %v4591_v14 = vpop.eup %4590 }
 0x5b0   : > { %v2711_v40 = vmul.f32 0.6931472, %v4591_v14 }
 0x5b1   : > { %v4593_v38 = vpop.eup %4592 }
 0x5b2   : > { %v2717_v19 = vsel %vm2716_vm0, %v2714_v56, %v2711_v40  ;;  %v2702_v7 = vmul.f32 0.6931472, %v4593_v38 }
 0x5b3   : > { %v2737_v18 = vadd.f32 %v2717_v19, %v2673_v4 }
 0x5b4   : > { %v4595_v62 = vpop.eup %4594  ;;  %v2708_v6 = vsel %vm2707_vm4, %v2705_v12, %v2702_v7 }
 0x5b5   : > { %v2741_v32 = vsel %vm2677_vm7, %v5703_v43, %v2737_v18  ;;  %v2736_v13 = vadd.f32 %v2708_v6, %v2672_v48  ;;  %v2729_v53 = vmul.f32 0.6931472, %v4595_v62 }
 0x5b6   : > { %v4597_v50 = vpop.eup %4596  ;;  %2745 = vst.msk [vmem:[#allocation5 + $0x8] sm:$0xff] %vm703_vm2, %v2741_v32 }
 0x5b7   : > { %v2740_v31 = vsel %vm2676_vm8, %v5706_v34, %v2736_v13  ;;  %v2735_v39 = vsel %vm2734_vm9, %v2732_v2, %v2729_v53  ;;  %v2720_v54 = vmul.f32 0.6931472, %v4597_v50 }
 0x5b8   : > { %2744 = vst.msk [vmem:[#allocation5] sm:$0xff] %vm703_vm2, %v2740_v31  ;;  %v2739_v43 = vadd.f32 %v2735_v39, %v2675_v60 }
 0x5b9   : > { %v2726_v36 = vsel %vm2725_vm10, %v2723_v55, %v2720_v54 }
 0x5ba   : > { %v2743_v27 = vsel %vm2679_vm11, %v5709_v22, %v2739_v43  ;;  %v2738_v57 = vadd.f32 %v2726_v36, %v2674_v24 }
 0x5bb   : > { %2747 = vst.msk [vmem:[#allocation5 + $0x18] sm:$0xff] %vm703_vm2, %v2743_v27 }
 0x5bc   : > { %v2742_v34 = vsel %vm2678_vm12, %v5712_v25, %v2738_v57 }
 0x5bd   : > { %2746 = vst.msk [vmem:[#allocation5 + $0x10] sm:$0xff] %vm703_vm2, %v2742_v34 }
 0x5be LB: >> { %v6337_v8 = vld [vmem:[#allocation14_spill] sm:$0xff]  ;;  %s2777_s26 = ssub.s32 1, %s4754_s3  ;;  %v6338_v26 = vld [vmem:[#allocation13_spill] sm:$0xff]  ;;  %v6339_v3 = vld [vmem:[#allocation12_spill] sm:$0xff]  ;;  %s2772_s3 = sadd.s32 1, %s4754_s3   ;;  %v4738_v15 = vphi %v5735_v15, %v6343_v15   ;;  %s4754_s3 = sphi %s5743_s3, %s2772_s3   ;;  %v4750_v29 = vphi %v5741_v29, %v6207_v29   ;;  %v4746_v23 = vphi %v5739_v23, %v6344_v23   ;;  %v4742_v44 = vphi %v5737_v44, %v6141_v44  }
 0x5bf   : >> { %s5761_s27 = sshll.u32 %s2777_s26, 4  ;;  %v6340_v20 = vld [vmem:[#allocation10_spill] sm:$0xff]  ;;  %v6341_v37 = vld [vmem:[#allocation9_spill] sm:$0xff]  ;;  %v6342_v38 = vld [vmem:[#allocation11_spill] sm:$0xff]  ;;  %p2769_p5 = scmp.ge.s32.totalorder %s2772_s3, 2  }
 0x5c0   : >> { %s2785_s28 = scalar_lea.vmem [#allocation6], %s5761_s27  ;;  %s2782_s29 = scalar_lea.vmem [#allocation5], %s5761_s27 }
 0x5c1   : >> { %v2787_v22 = vld [vmem:[%s2785_s28 + $0x8] sm:$0xff]  ;;  %v2786_v41 = vld [vmem:[%s2785_s28] sm:$0xff]  ;;  %s2779_s30 = scalar_lea.vmem [#allocation4], %s5761_s27  ;;  %s2788_s21 = scalar_lea.vmem [#allocation7], %s5761_s27 }
 0x5c2   : >> { %v2805_v25 = vrot.slane %v2787_v22, %v5199_v42  ;;  %v2794_v10 = vrot.slane %v2787_v22, %v5182_v35  ;;  %v5767_v5 = vrot.slane %v2787_v22, %v6337_v8  ;;  %v5772_v30 = vrot.slane %v2787_v22, %v5136_v59  ;;  %v2781_v21 = vld [vmem:[%s2779_s30 + $0x8] sm:$0xff]  ;;  %s6345_s22 = sld [smem:[#allocation19_spill]] (%p2769_p5) }
 0x5c3   : >> { %v3114_v45 = vrot.slane %v2787_v22, %v6338_v26  ;;  %v3103_v51 = vrot.slane %v2787_v22, %v6339_v3  ;;  %v3244_v47 = vrot.slane %v2787_v22, %v6340_v20  ;;  %v5780_v46 = vrot.slane %v2787_v22, %v6341_v37 }
 0x5c4   : >> { %2807 = vbcast.lane.b32.xlu1 %v2805_v25, 256  ;;  %2796 = vbcast.lane.b32.xlu0 %v2794_v10, 256  ;;  %v5785_v33 = vrot.slane %v2786_v41, %v5199_v42  ;;  %v5790_v17 = vrot.slane %v2786_v41, %v5182_v35  ;;  %v5795_v63 = vrot.slane %v2786_v41, %v6337_v8  ;;  %v2784_v40 = vld [vmem:[%s2782_s29 + $0x8] sm:$0xff]  ;;  %v5836_v24 = vld [vmem:[%s2782_s29] sm:$0xff] }
 0x5c5   : >> { %v5800_v0 = vrot.slane %v2786_v41, %v5136_v59  ;;  %v3656_v1 = vrot.slane %v2786_v41, %v6338_v26  ;;  %v3645_v14 = vrot.slane %v2786_v41, %v6339_v3  ;;  %v3786_v11 = vrot.slane %v2786_v41, %v6340_v20 }
 0x5c6   : >> { %v5808_v9 = vrot.slane %v2786_v41, %v6341_v37  ;;  %v2830_v56 = vcombine.high %v2784_v40, %v2784_v40  ;;  %v2891_v61 = vmul.f32 %v2784_v40, %v2781_v21  ;;  %v2837_v62 = vrot.slane %v2784_v40, %v6342_v38 }
 0x5c8   : >> { %2811 = vbcast.lane.b32.xlu1 %v2805_v25, 264  ;;  %2800 = vbcast.lane.b32.xlu0 %v2794_v10, 264  ;;  %v2844_v4 = vrot.slane %v2830_v56, %v6342_v38  ;;  %v2893_v13 = vcombine.high %v2891_v61, %v2891_v61  ;;  %v3138_v2 = vcombine.high %v2837_v62, %v2837_v62 }
 0x5c9   : >> { %v2852_v36 = vrot.slane %v2837_v62, %v6342_v38  ;;  %v2900_v22 = vrot.slane %v2891_v61, %v6342_v38 }
 0x5ca   : >> { %v2845_v52 = vcombine.high %v2844_v4, %v2844_v4  ;;  %v2859_v19 = vrot.slane %v2844_v4, %v6342_v38  ;;  %v2907_v39 = vrot.slane %v2893_v13, %v6342_v38  ;;  %v3145_v55 = vrot.slane %v3138_v2, %v6342_v38 }
 0x5cc   : >> { %2819 = vbcast.lane.b32.xlu1 %v2794_v10, 280  ;;  %2815 = vbcast.lane.b32.xlu0 %v2794_v10, 272  ;;  %v2866_v7 = vrot.slane %v2845_v52, %v6342_v38  ;;  %v2867_v12 = vcombine.high %v2859_v19, %v2859_v19  ;;  %v2908_v27 = vcombine.high %v2907_v39, %v2907_v39 }
 0x5cd   : >> { %v3147_v34 = vcombine.high %v3145_v55, %v3145_v55  ;;  %v2922_v10 = vrot.slane %v2907_v39, %v6342_v38  ;;  %v3275_v61 = vrot.slane %v3145_v55, %v6341_v37 }
 0x5ce   : >> { %v2868_v18 = vcombine.high %v2866_v7, %v2866_v7  ;;  %v2872_v48 = vrot.slane %v2867_v12, %v6341_v37  ;;  %v3035_v57 = vrot.slane %v2866_v7, %v6341_v37 }
 0x5cf   : >> { %v3155_v41 = vrot.slane %v3147_v34, %v6341_v37 }
 0x5d0   : >> { %2827 = vbcast.lane.b32.xlu1 %v2805_v25, 280  ;;  %2823 = vbcast.lane.b32.xlu0 %v2805_v25, 272  ;;  %v2876_v6 = vrot.slane %v2868_v18, %v6341_v37  ;;  %v2880_v49 = vmul.f32 %v2872_v48, %v5690_v58  ;;  %v2879_v32 = vmul.f32 %v2872_v48, %v5685_v28 }
 0x5d1   : >> { %v3378_v25 = vcombine.high %v5836_v24, %v5836_v24  ;;  %v3161_v12 = vmul.f32 %v3155_v41, %v5690_v58 }
 0x5d2   : >> { %v2882_v53 = vmul.f32 %v2876_v6, %v5690_v58  ;;  %v2885_v50 = vmul.f32 1.442695, %v2880_v49  ;;  %v2881_v60 = vmul.f32 %v2876_v6, %v5685_v28  ;;  %v2883_v31 = vmul.f32 1.442695, %v2879_v32 }
 0x5d3   : >> { %v3160_v49 = vmul.f32 %v3155_v41, %v5685_v28  ;;  %v3168_v55 = vmul.f32 1.442695, %v3161_v12  ;;  %v3280_v41 = vmul.f32 %v3275_v61, %v5685_v28 }
 0x5d4   : >> { %3010 = vbcast.lane.b32.xlu1 %v5767_v5, 264  ;;  %3006 = vbcast.lane.b32.xlu0 %v5767_v5, 256  ;;  %v2889_v54 = vmul.f32 1.442695, %v2882_v53  ;;  %4600 = vpow2.f32 %v2885_v50  ;;  %v2887_v43 = vmul.f32 1.442695, %v2881_v60 }
 0x5d5   : >> { %4602 = vpow2.f32 %v2883_v31  ;;  %v5879_v31 = vrot.slane %v2922_v10, %v6341_v37 }
 0x5d6   : >> { %4604 = vpow2.f32 %v2889_v54 }
 0x5d7   : >> { %4606 = vpow2.f32 %v2887_v43 }
 0x5d8   : >> { %2999 = vbcast.lane.b32.xlu1 %v5772_v30, 264  ;;  %2995 = vbcast.lane.b32.xlu0 %v5772_v30, 256 }
 0x5dc   : >> { %3120 = vbcast.lane.b32.xlu1 %v3114_v45, 264  ;;  %3116 = vbcast.lane.b32.xlu0 %v3114_v45, 256 }
 0x5e0   : >> { %3109 = vbcast.lane.b32.xlu1 %v3103_v51, 264  ;;  %3105 = vbcast.lane.b32.xlu0 %v3103_v51, 256 }
 0x5e1   : >> { %v4601_v48 = vpop.eup %4600 }
 0x5e2   : >> { %v4603_v32 = vpop.eup %4602 }
 0x5e3   : >> { %v4605_v54 = vpop.eup %4604 }
 0x5e4   : >> { %3250 = vbcast.lane.b32.xlu1 %v3244_v47, 264  ;;  %3246 = vbcast.lane.b32.xlu0 %v3244_v47, 256 }
 0x5e8   : >> { %3239 = vbcast.lane.b32.xlu1 %v5780_v46, 264  ;;  %3235 = vbcast.lane.b32.xlu0 %v5780_v46, 256 }
 0x5ec   : >> { %3359 = vbcast.lane.b32.xlu1 %v5785_v33, 264  ;;  %3355 = vbcast.lane.b32.xlu0 %v5785_v33, 256 }
 0x5f0   : >> { %3348 = vbcast.lane.b32.xlu1 %v5790_v17, 264  ;;  %3344 = vbcast.lane.b32.xlu0 %v5790_v17, 256 }
 0x5f4   : >> { %3552 = vbcast.lane.b32.xlu1 %v5795_v63, 264  ;;  %3548 = vbcast.lane.b32.xlu0 %v5795_v63, 256 }
 0x5f8   : >> { %3541 = vbcast.lane.b32.xlu1 %v5800_v0, 264  ;;  %3537 = vbcast.lane.b32.xlu0 %v5800_v0, 256 }
 0x5fc   : >> { %3662 = vbcast.lane.b32.xlu1 %v3656_v1, 264  ;;  %3658 = vbcast.lane.b32.xlu0 %v3656_v1, 256 }
 0x600   : >> { %3651 = vbcast.lane.b32.xlu1 %v3645_v14, 264  ;;  %3647 = vbcast.lane.b32.xlu0 %v3645_v14, 256 }
 0x604   : >> { %3792 = vbcast.lane.b32.xlu1 %v3786_v11, 264  ;;  %3788 = vbcast.lane.b32.xlu0 %v3786_v11, 256 }
 0x608   : >> { %3781 = vbcast.lane.b32.xlu1 %v5808_v9, 264  ;;  %3777 = vbcast.lane.b32.xlu0 %v5808_v9, 256 }
 0x60c   : >> { %3128 = vbcast.lane.b32.xlu1 %v3103_v51, 280  ;;  %3124 = vbcast.lane.b32.xlu0 %v3103_v51, 272  ;;  %v3031_v51 = vrot.slane %v2859_v19, %v6341_v37  ;;  %v5860_v19 = vrot.slane %v2852_v36, %v6341_v37 }
 0x60e   : >> { %v3039_v4 = vmul.f32 %v3031_v51, %v5690_v58 }
 0x610   : >> { %3136 = vbcast.lane.b32.xlu1 %v3114_v45, 280  ;;  %3132 = vbcast.lane.b32.xlu0 %v3114_v45, 272  ;;  %v2929_v45 = vrot.slane %v2908_v27, %v6342_v38  ;;  %v3044_v2 = vmul.f32 1.442695, %v3039_v4 }
 0x612   : >> { %v2931_v52 = vcombine.high %v2929_v45, %v2929_v45 }
 0x614   : >> { %3266 = vbcast.lane.b32.xlu1 %v3244_v47, 280  ;;  %3262 = vbcast.lane.b32.xlu0 %v3244_v47, 272  ;;  %v3040_v47 = vmul.f32 %v3035_v57, %v5685_v28  ;;  %v2939_v60 = vrot.slane %v2931_v52, %v6341_v37 }
 0x616   : >> { %v3046_v7 = vmul.f32 1.442695, %v3040_v47 }
 0x618   : >> { %3670 = vbcast.lane.b32.xlu1 %v3645_v14, 280  ;;  %3666 = vbcast.lane.b32.xlu0 %v3645_v14, 272  ;;  %v5855_v14 = vmul.f32 %v5695_v16, %v2781_v21 }
 0x61a   : >> { %v2984_v6 = vrot.slane %v5855_v14, 6 }
 0x61c   : >> { %3678 = vbcast.lane.b32.xlu1 %v3656_v1, 280  ;;  %3674 = vbcast.lane.b32.xlu0 %v3656_v1, 272  ;;  %v3392_v1 = vrot.slane %v3378_v25, %v6342_v38  ;;  %v2947_v25 = vmul.f32 %v4746_v23, %v4601_v48  ;;  %v2949_v23 = vmul.f32 %v4738_v15, %v4605_v54 }
 0x61d   : >> { %v3278_v48 = vmul.f32 %v5860_v19, %v5685_v28 }
 0x61e   : >> { %v3393_v18 = vcombine.high %v3392_v1, %v3392_v1 }
 0x620   : >> { %3808 = vbcast.lane.b32.xlu1 %v3786_v11, 280  ;;  %3804 = vbcast.lane.b32.xlu0 %v3786_v11, 272  ;;  %v2930_v11 = vcombine.high %v2922_v10, %v2922_v10  ;;  %v5889_v27 = vrot.slane %v3393_v18, %v6342_v38  ;;  %v2946_v10 = vmul.f32 %v4750_v29, %v4603_v32 }
 0x622   : >> { %v2935_v62 = vrot.slane %v2930_v11, %v6341_v37  ;;  %v3416_v11 = vcombine.high %v5889_v27, %v5889_v27 }
 0x624   : >> { %3018 = vbcast.lane.b32.xlu1 %v5772_v30, 280  ;;  %3014 = vbcast.lane.b32.xlu0 %v5772_v30, 272  ;;  %v3041_v30 = vmul.f32 %v3035_v57, %v5690_v58  ;;  %v4607_v57 = vpop.eup %4606 }
 0x625   : >> { %v2948_v29 = vmul.f32 %v4742_v44, %v4607_v57  ;;  %v3279_v44 = vmul.f32 %v5860_v19, %v5690_v58 }
 0x626   : >> { %v3048_v56 = vmul.f32 1.442695, %v3041_v30 }
 0x627   : >> { %v3284_v54 = vmul.f32 1.442695, %v3279_v44 }
 0x628   : >> { %3026 = vbcast.lane.b32.xlu1 %v5767_v5, 280  ;;  %3022 = vbcast.lane.b32.xlu0 %v5767_v5, 272  ;;  %v3146_v5 = vcombine.high %v2852_v36, %v2852_v36  ;;  %4608 = vpow2.f32 %v3048_v56  ;;  %v5886_v36 = vrot.slane %v2900_v22, %v6342_v38 }
 0x629   : >> { %4610 = vpow2.f32 %v3046_v7 }
 0x62a   : >> { %v3151_v40 = vrot.slane %v3146_v5, %v6341_v37  ;;  %v3166_v5 = vmul.f32 1.442695, %v3160_v49  ;;  %4612 = vpow2.f32 %v3044_v2  ;;  %v3424_v49 = vrot.slane %v3416_v11, %v6341_v37 }
 0x62c   : >> { %3560 = vbcast.lane.b32.xlu1 %v5800_v0, 280  ;;  %3556 = vbcast.lane.b32.xlu0 %v5800_v0, 272  ;;  %v3170_v0 = vcombine.high %v2900_v22, %v2900_v22  ;;  %v3159_v50 = vmul.f32 %v3151_v40, %v5690_v58  ;;  %v3281_v22 = vmul.f32 %v3275_v61, %v5690_v58  ;;  %v3286_v61 = vmul.f32 1.442695, %v3280_v41 }
 0x62d   : >> { %v3429_v11 = vmul.f32 %v3424_v49, %v5685_v28 }
 0x62e   : >> { %v5867_v21 = vrot.slane %v3170_v0, %v6342_v38  ;;  %v5897_v0 = vrot.slane %v3392_v1, %v6342_v38  ;;  %v5911_v1 = vld [vmem:[%s2779_s30] sm:$0xff]  ;;  %v3288_v15 = vmul.f32 1.442695, %v3281_v22 }
 0x62f   : >> { %v5926_v32 = vmul.f32 %v5836_v24, %v5911_v1 }
 0x630   : >> { %3568 = vbcast.lane.b32.xlu1 %v5795_v63, 280  ;;  %3564 = vbcast.lane.b32.xlu0 %v5795_v63, 272  ;;  %v3038_v63 = vmul.f32 %v3031_v51, %v5685_v28  ;;  %v3179_v43 = vcombine.high %v5867_v21, %v5867_v21  ;;  %v3158_v51 = vmul.f32 %v3151_v40, %v5685_v28 }
 0x632   : >> { %v3042_v39 = vmul.f32 1.442695, %v3038_v63 }
 0x634   : >> { %3258 = vbcast.lane.b32.xlu1 %v5780_v46, 280  ;;  %3254 = vbcast.lane.b32.xlu0 %v5780_v46, 272  ;;  %v5874_v46 = vrot.slane %v2929_v45, %v6341_v37  ;;  %4614 = vpow2.f32 %v3042_v39 }
 0x635   : >> { %4616 = vpow2.f32 %v3168_v55  ;;  %v4609_v55 = vpop.eup %4608 }
 0x636   : >> { %v2808_v13 = vpop.permute.xlu1 %2807  ;;  %v2797_v53 = vpop.permute.xlu0 %2796  ;;  %4618 = vpow2.f32 %v3166_v5 }
 0x637   : >> { %v2942_v34 = vmul.f32 %v2935_v62, %v2797_v53  ;;  %v2944_v40 = vmul.f32 %v2939_v60, %v2808_v13 }
 0x638   : >> { %3367 = vbcast.lane.b32.xlu1 %v5790_v17, 280  ;;  %3363 = vbcast.lane.b32.xlu0 %v5790_v17, 272  ;;  %v3164_v17 = vmul.f32 1.442695, %v3159_v50 }
 0x639   : >> { %v5907_v52 = vadd.f32 %v2946_v10, %v2942_v34  ;;  %v2952_v19 = vadd.f32 %v2948_v29, %v2944_v40  ;;  %v4611_v10 = vpop.eup %4610 }
 0x63a   : >> { %v2812_v30 = vpop.permute.xlu1 %2811  ;;  %v2801_v45 = vpop.permute.xlu0 %2800  ;;  %4620 = vpow2.f32 %v3164_v17 }
 0x63b   : >> { %v2943_v47 = vmul.f32 %v2935_v62, %v2801_v45  ;;  %v2945_v56 = vmul.f32 %v2939_v60, %v2812_v30  ;;  %v3415_v62 = vcombine.high %v5897_v0, %v5897_v0  ;;  %v3282_v30 = vmul.f32 1.442695, %v3278_v48  ;;  %v4613_v40 = vpop.eup %4612 }
 0x63c   : >> { %3375 = vbcast.lane.b32.xlu1 %v5785_v33, 280  ;;  %3371 = vbcast.lane.b32.xlu0 %v5785_v33, 272  ;;  %v3162_v33 = vmul.f32 1.442695, %v3158_v51  ;;  %v3441_v45 = vcombine.high %v5926_v32, %v5926_v32 }
 0x63d   : >> { %v5905_v4 = vadd.f32 %v2947_v25, %v2943_v47  ;;  %v2953_v2 = vadd.f32 %v2949_v23, %v2945_v56  ;;  %v3187_v25 = vrot.slane %v3179_v43, %v6341_v37  ;;  %v3420_v22 = vrot.slane %v3415_v62, %v6341_v37 }
 0x63e   : >> { %v2820_v7 = vpop.permute.xlu1 %2819  ;;  %v2816_v63 = vpop.permute.xlu0 %2815  ;;  %4622 = vpow2.f32 %v3162_v33  ;;  %v3430_v47 = vmul.f32 %v3424_v49, %v5690_v58  ;;  %v3066_v33 = vmul.f32 %v4611_v10, %v2952_v19 }
 0x63f   : >> { %v2955_v12 = vmul.f32 %v5905_v4, %v2820_v7  ;;  %v2954_v18 = vmul.f32 %v5907_v52, %v2816_v63  ;;  %4624 = vpow2.f32 %v3288_v15  ;;  %v3067_v7 = vmul.f32 %v4609_v55, %v2953_v2 }
 0x640   : >> { %3800 = vbcast.lane.b32.xlu1 %v5808_v9, 280  ;;  %3796 = vbcast.lane.b32.xlu0 %v5808_v9, 272  ;;  %v3178_v9 = vcombine.high %v5886_v36, %v5886_v36  ;;  %4626 = vpow2.f32 %v3286_v61  ;;  %v3437_v49 = vmul.f32 1.442695, %v3430_v47  ;;  %v3065_v55 = vmul.f32 %v4613_v40, %v5905_v4 }
 0x641   : >> { %v2959_v13 = vsel %vm703_vm2, %v2955_v12, 0.0  ;;  %v2958_v53 = vsel %vm703_vm2, %v2954_v18, 0.0  ;;  %4628 = vpow2.f32 %v3284_v54  ;;  %v4615_v15 = vpop.eup %4614  ;;  %v5943_v18 = vrot.slane %v3441_v45, %v6342_v38 }
 0x642   : >> { %v2960_v50 = vadd.f32 %v2959_v13, %v2958_v53  ;;  %v2828_v60 = vpop.permute.xlu1 %2827  ;;  %v2824_v39 = vpop.permute.xlu0 %2823  ;;  %4630 = vpow2.f32 %v3282_v30  ;;  %v3428_v13 = vmul.f32 %v3420_v22, %v5690_v58  ;;  %v3183_v45 = vrot.slane %v3178_v9, %v6341_v37 }
 0x643   : >> { %v2957_v57 = vmul.f32 %v2953_v2, %v2828_v60  ;;  %v2956_v34 = vmul.f32 %v2952_v19, %v2824_v39  ;;  %v4617_v48 = vpop.eup %4616  ;;  %v3435_v19 = vmul.f32 1.442695, %v3429_v11  ;;  %v3427_v60 = vmul.f32 %v3420_v22, %v5685_v28 }
 0x644   : >> { %v2961_v5 = vrot.slane %v2960_v50, 4  ;;  %v4619_v39 = vpop.eup %4618  ;;  %4632 = vpow2.f32 %v3437_v49  ;;  %v3433_v47 = vmul.f32 1.442695, %v3428_v13 }
 0x645   : >> { %v2968_v17 = vsel %vm703_vm2, %v2957_v57, 0.0  ;;  %v2967_v51 = vsel %vm703_vm2, %v2956_v34, 0.0  ;;  %v3064_v34 = vmul.f32 %v4615_v15, %v5907_v52  ;;  %4634 = vpow2.f32 %v3435_v19 }
 0x646   : >> { %v2962_v41 = vadd.f32 %v2961_v5, %v2960_v50  ;;  %v2969_v23 = vadd.f32 %v2968_v17, %v2967_v51  ;;  %v3011_v29 = vpop.permute.xlu1 %3010  ;;  %v3007_v43 = vpop.permute.xlu0 %3006  ;;  %v3456_v17 = vcombine.high %v5943_v18, %v5943_v18  ;;  %v3431_v52 = vmul.f32 1.442695, %v3427_v60 }
 0x647   : >> { %v3063_v56 = vmul.f32 %v5874_v46, %v3011_v29  ;;  %v3062_v63 = vmul.f32 %v5874_v46, %v3007_v43  ;;  %v4621_v10 = vpop.eup %4620  ;;  %4636 = vpow2.f32 %v3433_v47 }
 0x648   : >> { %v2963_v44 = vrot.slane %v2962_v41, 2  ;;  %v2970_v12 = vrot.slane %v2969_v23, 4  ;;  %4638 = vpow2.f32 %v3431_v52 }
 0x649   : >> { %v5945_v61 = vadd.f32 %v3067_v7, %v3063_v56  ;;  %v5947_v62 = vadd.f32 %v3066_v33, %v3062_v63  ;;  %v2985_v63 = vrot.slane %v5855_v14, 7 }
 0x64a   : >> { %v2964_v53 = vadd.f32 %v2963_v44, %v2962_v41  ;;  %v2971_v2 = vadd.f32 %v2970_v12, %v2969_v23  ;;  %v3000_v50 = vpop.permute.xlu1 %2999  ;;  %v2996_v46 = vpop.permute.xlu0 %2995  ;;  %v3297_v12 = vrot.slane %v5867_v21, %v6341_v37 }
 0x64b   : >> { %v3061_v54 = vmul.f32 %v5879_v31, %v3000_v50  ;;  %v3060_v57 = vmul.f32 %v5879_v31, %v2996_v46  ;;  %v4623_v29 = vpop.eup %4622  ;;  %v3197_v11 = vmul.f32 %v4617_v48, %v5945_v61  ;;  %v3196_v40 = vmul.f32 %v4619_v39, %v5947_v62 }
 0x64c   : >> { %v2965_v5 = vrot.slane %v2964_v53, 1  ;;  %v2972_v30 = vrot.slane %v2971_v2, 2  ;;  %v4625_v56 = vpop.eup %4624 }
 0x64d   : >> { %v5958_v51 = vadd.f32 %v3065_v55, %v3061_v54  ;;  %v5960_v22 = vadd.f32 %v3064_v34, %v3060_v57  ;;  %v4627_v33 = vpop.eup %4626 }
 0x64e   : >> { %v2966_v41 = vadd.f32 %v2965_v5, %v2964_v53  ;;  %v2973_v4 = vadd.f32 %v2972_v30, %v2971_v2  ;;  %v3121_v23 = vpop.permute.xlu1 %3120  ;;  %v3117_v31 = vpop.permute.xlu0 %3116  ;;  %v5974_v53 = vrot.slane %v3456_v17, %v6342_v38 }
 0x64f   : >> { %v3193_v43 = vmul.f32 %v3187_v25, %v3121_v23  ;;  %v3192_v9 = vmul.f32 %v3187_v25, %v3117_v31  ;;  %v4629_v2 = vpop.eup %4628  ;;  %v3195_v46 = vmul.f32 %v4621_v10, %v5958_v51  ;;  %v3194_v60 = vmul.f32 %v4623_v29, %v5960_v22 }
 0x650   : >> { %v2974_v7 = vrot.slane %v2973_v4, 1  ;;  %v2988_v49 = vadd.f32 %v2984_v6, %v2966_v41  ;;  %v4631_v21 = vpop.eup %4630  ;;  %v3293_v6 = vrot.slane %v5886_v36, %v6341_v37  ;;  %v3479_v17 = vcombine.high %v5974_v53, %v5974_v53 }
 0x651   : >> { %v5965_v15 = vadd.f32 %v3197_v11, %v3193_v43  ;;  %v5967_v44 = vadd.f32 %v3196_v40, %v3192_v9  ;;  %v5988_v10 = vrot.slane %v5943_v18, %v6342_v38  ;;  %v4633_v52 = vpop.eup %4632  ;;  %v3385_v18 = vrot.slane %v5836_v24, %v6342_v38 }
 0x652   : >> { %v2975_v48 = vadd.f32 %v2974_v7, %v2973_v4  ;;  %v3110_v25 = vpop.permute.xlu1 %3109  ;;  %v3106_v13 = vpop.permute.xlu0 %3105  ;;  %v3927_v57 = vrot.slane %v2988_v49, 2  ;;  %v3487_v11 = vrot.slane %v3479_v17, %v6341_v37 }
 0x653   : >> { %v3191_v50 = vmul.f32 %v3183_v45, %v3110_v25  ;;  %v3190_v19 = vmul.f32 %v3183_v45, %v3106_v13  ;;  %v3307_v47 = vmul.f32 %v4625_v56, %v5965_v15  ;;  %v3306_v4 = vmul.f32 %v4627_v33, %v5967_v44  ;;  %v4635_v40 = vpop.eup %4634 }
 0x654   : >> { %v2989_v39 = vadd.f32 %v2985_v63, %v2975_v48  ;;  %v3478_v9 = vcombine.high %v5988_v10, %v5988_v10  ;;  %v4637_v48 = vpop.eup %4636  ;;  %v3680_v13 = vcombine.high %v3385_v18, %v3385_v18 }
 0x655   : >> { %v5978_v54 = vadd.f32 %v3195_v46, %v3191_v50  ;;  %v5980_v55 = vadd.f32 %v3194_v60, %v3190_v19  ;;  %v4639_v46 = vpop.eup %4638 }
 0x656   : >> { %v3928_v34 = vrot.slane %v2989_v39, 1  ;;  %v3251_v5 = vpop.permute.xlu1 %3250  ;;  %v3247_v30 = vpop.permute.xlu0 %3246  ;;  %v3483_v50 = vrot.slane %v3478_v9, %v6341_v37 }
 0x657   : >> { %v3303_v45 = vmul.f32 %v3297_v12, %v3251_v5  ;;  %v3302_v41 = vmul.f32 %v3297_v12, %v3247_v30  ;;  %v3305_v7 = vmul.f32 %v4629_v2, %v5978_v54  ;;  %v3304_v33 = vmul.f32 %v4631_v21, %v5980_v55 }
 0x658   : >> { %v5993_v23 = vsel %vm2311_vm5, %v3928_v34, %v3927_v57  ;;  %v3577_v34 = vrot.slane %v5889_v27, %v6341_v37  ;;  %v3687_v5 = vrot.slane %v3680_v13, %v6342_v38 }
 0x659   : >> { %v5995_v36 = vadd.f32 %v3307_v47, %v3303_v45  ;;  %v5997_v31 = vadd.f32 %v3306_v4, %v3302_v41 }
 0x65a   : >> { %v3240_v29 = vpop.permute.xlu1 %3239  ;;  %v3236_v43 = vpop.permute.xlu0 %3235  ;;  %v3689_v9 = vcombine.high %v3687_v5, %v3687_v5 }
 0x65b   : >> { %v3301_v56 = vmul.f32 %v3293_v6, %v3240_v29  ;;  %v3300_v63 = vmul.f32 %v3293_v6, %v3236_v43  ;;  %v3497_v60 = vmul.f32 %v4633_v52, %v5995_v36  ;;  %v3496_v2 = vmul.f32 %v4635_v40, %v5997_v31 }
 0x65c   : >> { %v6014_v6 = vrot.slane %v3385_v18, %v6342_v38  ;;  %v3573_v52 = vrot.slane %v5897_v0, %v6341_v37  ;;  %v3583_v40 = vmul.f32 %v3577_v34, %v5690_v58 }
 0x65d   : >> { %v6006_v12 = vadd.f32 %v3305_v7, %v3301_v56  ;;  %v6008_v49 = vadd.f32 %v3304_v33, %v3300_v63  ;;  %v3582_v63 = vmul.f32 %v3577_v34, %v5685_v28 }
 0x65e   : >> { %v3360_v25 = vpop.permute.xlu1 %3359  ;;  %v3356_v24 = vpop.permute.xlu0 %3355  ;;  %v3688_v29 = vcombine.high %v6014_v6, %v6014_v6  ;;  %v3581_v56 = vmul.f32 %v3573_v52, %v5690_v58  ;;  %v3580_v0 = vmul.f32 %v3573_v52, %v5685_v28  ;;  %v3590_v13 = vmul.f32 1.442695, %v3583_v40 }
 0x65f   : >> { %v3493_v19 = vmul.f32 %v3487_v11, %v3360_v25  ;;  %v3492_v39 = vmul.f32 %v3487_v11, %v3356_v24  ;;  %v3495_v47 = vmul.f32 %v4637_v48, %v6006_v12  ;;  %v3494_v4 = vmul.f32 %v4639_v46, %v6008_v49 }
 0x660   : >> { %v3693_v7 = vrot.slane %v3688_v29, %v6341_v37  ;;  %v3697_v25 = vrot.slane %v3689_v9, %v6341_v37  ;;  %v3586_v24 = vmul.f32 1.442695, %v3581_v56  ;;  %4640 = vpow2.f32 %v3590_v13 }
 0x661   : >> { %v6016_v21 = vadd.f32 %v3497_v60, %v3493_v19  ;;  %v6018_v57 = vadd.f32 %v3496_v2, %v3492_v39  ;;  %v3588_v19 = vmul.f32 1.442695, %v3582_v63 }
 0x662   : >> { %v3349_v30 = vpop.permute.xlu1 %3348  ;;  %v3345_v17 = vpop.permute.xlu0 %3344  ;;  %v3701_v46 = vmul.f32 %v3693_v7, %v5690_v58  ;;  %v3700_v2 = vmul.f32 %v3693_v7, %v5685_v28  ;;  %4642 = vpow2.f32 %v3586_v24  ;;  %v3702_v34 = vmul.f32 %v3697_v25, %v5685_v28 }
 0x663   : >> { %v3491_v45 = vmul.f32 %v3483_v50, %v3349_v30  ;;  %v3490_v41 = vmul.f32 %v3483_v50, %v3345_v17  ;;  %v3584_v50 = vmul.f32 1.442695, %v3580_v0  ;;  %v3703_v30 = vmul.f32 %v3697_v25, %v5690_v58 }
 0x664   : >> { %v3817_v17 = vrot.slane %v3687_v5, %v6341_v37  ;;  %v3704_v52 = vmul.f32 1.442695, %v3700_v2  ;;  %v3708_v9 = vmul.f32 1.442695, %v3702_v34  ;;  %v6076_v2 = vrot.slane %v6014_v6, %v6341_v37 }
 0x665   : >> { %v6029_v43 = vadd.f32 %v3495_v47, %v3491_v45  ;;  %v6031_v18 = vadd.f32 %v3494_v4, %v3490_v41  ;;  %4644 = vpow2.f32 %v3584_v50  ;;  %v3706_v45 = vmul.f32 1.442695, %v3701_v46 }
 0x666   : >> { %v6033_v27 = vpop.permute.xlu1 %3552  ;;  %v6035_v11 = vpop.permute.xlu0 %3548  ;;  %4646 = vpow2.f32 %v3588_v19  ;;  %v3448_v47 = vrot.slane %v5926_v32, %v6342_v38  ;;  %v3710_v29 = vmul.f32 1.442695, %v3703_v30  ;;  %v3823_v40 = vmul.f32 %v3817_v17, %v5690_v58 }
 0x667   : >> { %4648 = vpow2.f32 %v3706_v45  ;;  %v3822_v0 = vmul.f32 %v3817_v17, %v5685_v28  ;;  %v3595_v46 = vrot.slane %v5988_v10, %v6341_v37  ;;  %v3599_v30 = vrot.slane %v5974_v53, %v6341_v37 }
 0x668   : >> { %v3712_v56 = vcombine.high %v3448_v47, %v3448_v47  ;;  %4650 = vpow2.f32 %v3704_v52  ;;  %v6065_v32 = vrot.slane %v3448_v47, %v6342_v38  ;;  %v3830_v63 = vmul.f32 1.442695, %v3823_v40 }
 0x669   : >> { %4652 = vpow2.f32 %v3710_v29  ;;  %v3828_v50 = vmul.f32 1.442695, %v3822_v0  ;;  %v3605_v0 = vmul.f32 %v3599_v30, %v6033_v27  ;;  %v3604_v53 = vmul.f32 %v3599_v30, %v6035_v11 }
 0x66a   : >> { %v3542_v33 = vpop.permute.xlu1 %3541  ;;  %v3538_v48 = vpop.permute.xlu0 %3537  ;;  %4654 = vpow2.f32 %v3708_v9  ;;  %v3719_v25 = vrot.slane %v3712_v56, %v6342_v38  ;;  %v3720_v34 = vcombine.high %v6065_v32, %v6065_v32 }
 0x66b   : >> { %4656 = vpow2.f32 %v3830_v63  ;;  %v3603_v10 = vmul.f32 %v3595_v46, %v3542_v33  ;;  %v3602_v40 = vmul.f32 %v3595_v46, %v3538_v48  ;;  %v3821_v63 = vmul.f32 %v6076_v2, %v5690_v58  ;;  %v3950_v58 = vld [vmem:[#allocation3 + $0x18] sm:$0xff] (%p2769_p5) }
 0x66c   : >> { %v3721_v47 = vcombine.high %v3719_v25, %v3719_v25  ;;  %4658 = vpow2.f32 %v3828_v50  ;;  %v3725_v3 = vrot.slane %v3720_v34, %v6341_v37 }
 0x66d   : >> { %v4641_v19 = vpop.eup %4640 }
 0x66e   : >> { %v6044_v60 = vpop.permute.xlu1 %3662  ;;  %v6046_v39 = vpop.permute.xlu0 %3658  ;;  %v3729_v11 = vrot.slane %v3721_v47, %v6341_v37 }
 0x66f   : >> { %v4643_v17 = vpop.eup %4642 }
 0x670   : >> { %v3607_v8 = vmul.f32 %v4643_v17, %v6029_v43 }
 0x672   : >> { %v6054_v41 = vpop.permute.xlu1 %3651  ;;  %v6056_v4 = vpop.permute.xlu0 %3647 }
 0x673   : >> { %v4645_v45 = vpop.eup %4644 }
 0x674   : >> { %v4647_v9 = vpop.eup %4646  ;;  %v3606_v50 = vmul.f32 %v4645_v45, %v6031_v18 }
 0x675   : >> { %v3608_v27 = vmul.f32 %v4647_v9, %v6018_v57  ;;  %v3839_v9 = vrot.slane %v3719_v25, %v6341_v37 }
 0x676   : >> { %v6059_v7 = vpop.permute.xlu1 %3792  ;;  %v6061_v5 = vpop.permute.xlu0 %3788  ;;  %v6098_v17 = vadd.f32 %v3606_v50, %v3602_v40 }
 0x67a   : >> { %v6068_v13 = vpop.permute.xlu1 %3781  ;;  %v6070_v24 = vpop.permute.xlu0 %3777 }
 0x67e   : >> { %v3129_v52 = vpop.permute.xlu1 %3128  ;;  %v3125_v29 = vpop.permute.xlu0 %3124 }
 0x67f   : >> { %v3203_v56 = vmul.f32 %v5978_v54, %v3129_v52  ;;  %v3202_v6 = vmul.f32 %v5980_v55, %v3125_v29  ;;  %v4649_v54 = vpop.eup %4648  ;;  %v3609_v55 = vmul.f32 %v4641_v19, %v6016_v21  ;;  %v6096_v29 = vadd.f32 %v3607_v8, %v3603_v10 }
 0x680   : >> { %v4651_v52 = vpop.eup %4650  ;;  %v6104_v19 = vadd.f32 %v3608_v27, %v3604_v53  ;;  %v3732_v8 = vmul.f32 %v3725_v3, %v6056_v4 }
 0x681   : >> { %v3207_v33 = vsel %vm703_vm2, %v3203_v56, 0.0  ;;  %v3206_v48 = vsel %vm703_vm2, %v3202_v6, 0.0  ;;  %v4653_v6 = vpop.eup %4652  ;;  %v6102_v20 = vadd.f32 %v3609_v55, %v3605_v0 }
 0x682   : >> { %v3208_v46 = vadd.f32 %v3207_v33, %v3206_v48  ;;  %v3137_v30 = vpop.permute.xlu1 %3136  ;;  %v3133_v34 = vpop.permute.xlu0 %3132  ;;  %v3733_v48 = vmul.f32 %v3725_v3, %v6054_v41  ;;  %v3737_v41 = vmul.f32 %v4649_v54, %v6096_v29  ;;  %v3736_v3 = vmul.f32 %v4651_v52, %v6098_v17 }
 0x683   : >> { %v3205_v45 = vmul.f32 %v5965_v15, %v3137_v30  ;;  %v3204_v56 = vmul.f32 %v5967_v44, %v3133_v34  ;;  %v4655_v33 = vpop.eup %4654  ;;  %v3735_v15 = vmul.f32 %v3729_v11, %v6044_v60  ;;  %v3734_v44 = vmul.f32 %v3729_v11, %v6046_v39 }
 0x684   : >> { %v3209_v47 = vrot.slane %v3208_v46, 4  ;;  %v3739_v34 = vmul.f32 %v4653_v6, %v6102_v20  ;;  %v3738_v60 = vmul.f32 %v4655_v33, %v6104_v19 }
 0x685   : >> { %v3216_v10 = vsel %vm703_vm2, %v3205_v45, 0.0  ;;  %v3215_v40 = vsel %vm703_vm2, %v3204_v56, 0.0  ;;  %v6123_v45 = vadd.f32 %v3736_v3, %v3732_v8  ;;  %v3820_v8 = vmul.f32 %v6076_v2, %v5685_v28  ;;  %v3949_v28 = vld [vmem:[#allocation3 + $0x10] sm:$0xff] (%p2769_p5) }
 0x686   : >> { %v3210_v0 = vadd.f32 %v3209_v47, %v3208_v46  ;;  %v3217_v50 = vadd.f32 %v3216_v10, %v3215_v40  ;;  %v3267_v53 = vpop.permute.xlu1 %3266  ;;  %v3263_v55 = vpop.permute.xlu0 %3262  ;;  %v6121_v46 = vadd.f32 %v3737_v41, %v3733_v48  ;;  %v3743_v40 = vadd.f32 %v3739_v34, %v3735_v15 }
 0x687   : >> { %v3315_v25 = vmul.f32 %v5995_v36, %v3267_v53  ;;  %v3314_v27 = vmul.f32 %v5997_v31, %v3263_v55  ;;  %v4657_v36 = vpop.eup %4656  ;;  %v3742_v53 = vadd.f32 %v3738_v60, %v3734_v44  ;;  %v3826_v48 = vmul.f32 1.442695, %v3821_v63 }
 0x688   : >> { %v3211_v4 = vrot.slane %v3210_v0, 2  ;;  %v3218_v30 = vrot.slane %v3217_v50, 4  ;;  %v4659_v10 = vpop.eup %4658 }
 0x689   : >> { %v3326_v39 = vsel %vm703_vm2, %v3315_v25, 0.0  ;;  %v3325_v11 = vsel %vm703_vm2, %v3314_v27, 0.0  ;;  %4660 = vpow2.f32 %v3826_v48 }
 0x68a   : >> { %v3212_v31 = vadd.f32 %v3211_v4, %v3210_v0  ;;  %v3219_v56 = vadd.f32 %v3218_v30, %v3217_v50  ;;  %v6125_v54 = vadd.f32 %v3326_v39, %v3325_v11  ;;  %v3671_v52 = vpop.permute.xlu1 %3670  ;;  %v3667_v47 = vpop.permute.xlu0 %3666  ;;  %v3845_v0 = vmul.f32 %v3839_v9, %v6059_v7 }
 0x68b   : >> { %v3745_v6 = vmul.f32 %v6121_v46, %v3671_v52  ;;  %v3744_v33 = vmul.f32 %v6123_v45, %v3667_v47  ;;  %v3844_v50 = vmul.f32 %v3839_v9, %v6061_v5  ;;  %v3224_v4 = vrot.slane %v5855_v14, 2 }
 0x68c   : >> { %v3213_v55 = vrot.slane %v3212_v31, 1  ;;  %v3220_v25 = vrot.slane %v3219_v56, 2  ;;  %v3849_v39 = vmul.f32 %v4657_v36, %v3743_v40  ;;  %v3848_v11 = vmul.f32 %v4659_v10, %v3742_v53 }
 0x68d   : >> { %v3749_v27 = vsel %vm703_vm2, %v3745_v6, 0.0  ;;  %v3748_v41 = vsel %vm703_vm2, %v3744_v33, 0.0  ;;  %v3225_v7 = vrot.slane %v5855_v14, 3  ;;  %v3824_v5 = vmul.f32 1.442695, %v3820_v8 }
 0x68e   : >> { %v3214_v3 = vadd.f32 %v3213_v55, %v3212_v31  ;;  %v3221_v30 = vadd.f32 %v3220_v25, %v3219_v56  ;;  %v3750_v15 = vadd.f32 %v3749_v27, %v3748_v41  ;;  %v3679_v44 = vpop.permute.xlu1 %3678  ;;  %v3675_v34 = vpop.permute.xlu0 %3674  ;;  %v6139_v31 = vadd.f32 %v3849_v39, %v3845_v0  }
 0x68f   : >> { %v3747_v60 = vmul.f32 %v3743_v40, %v3679_v44  ;;  %v3746_v63 = vmul.f32 %v3742_v53, %v3675_v34  ;;  %v6141_v44 = vadd.f32 %v3848_v11, %v3844_v50   ;;  %v6147_v53 = vmul.f32 %v5695_v16, %v5911_v1  ;;  %v4667_v16 = vld [vmem:[%s6345_s22] sm:$0xff] (%p2769_p5)  }
 0x690   : >> { %v3222_v2 = vrot.slane %v3221_v30, 1  ;;  %v3751_v52 = vrot.slane %v3750_v15, 4  ;;  %v3228_v56 = vadd.f32 %v3224_v4, %v3214_v3  ;;  %4662 = vpow2.f32 %v3824_v5 }
 0x691   : >> { %v3758_v9 = vsel %vm703_vm2, %v3747_v60, 0.0  ;;  %v3757_v47 = vsel %vm703_vm2, %v3746_v63, 0.0  ;;  %v3328_v11 = vrot.slane %v6125_v54, 4 }
 0x692   : >> { %v3223_v6 = vadd.f32 %v3222_v2, %v3221_v30  ;;  %v3752_v33 = vadd.f32 %v3751_v52, %v3750_v15  ;;  %v3809_v55 = vpop.permute.xlu1 %3808  ;;  %v3805_v25 = vpop.permute.xlu0 %3804  ;;  %v3759_v36 = vadd.f32 %v3758_v9, %v3757_v47  ;;  %v3915_v3 = vrot.slane %v3228_v56, 6 }
 0x693   : >> { %v3857_v10 = vmul.f32 %v6139_v31, %v3809_v55  ;;  %v3856_v40 = vmul.f32 %v6141_v44, %v3805_v25  ;;  %v3766_v9 = vrot.slane %v6147_v53, 2  ;;  %v3835_v25 = vrot.slane %v6065_v32, %v6341_v37 }
 0x694   : >> { %v3229_v8 = vadd.f32 %v3225_v7, %v3223_v6  ;;  %v3753_v0 = vrot.slane %v3752_v33, 2  ;;  %v3760_v27 = vrot.slane %v3759_v36, 4 }
 0x695   : >> { %v3868_v50 = vsel %vm703_vm2, %v3857_v10, 0.0  ;;  %v3867_v41 = vsel %vm703_vm2, %v3856_v40, 0.0  ;;  %v3334_v10 = vrot.slane %v5855_v14, 1 }
 0x696   : >> { %v3916_v4 = vrot.slane %v3229_v8, 5  ;;  %v3754_v48 = vadd.f32 %v3753_v0, %v3752_v33  ;;  %v6151_v30 = vadd.f32 %v3868_v50, %v3867_v41  ;;  %v3019_v15 = vpop.permute.xlu1 %3018  ;;  %v3015_v34 = vpop.permute.xlu0 %3014  ;;  %v3761_v60 = vadd.f32 %v3760_v27, %v3759_v36 }
 0x697   : >> { %v3073_v63 = vmul.f32 %v5958_v51, %v3019_v15  ;;  %v3072_v1 = vmul.f32 %v5960_v22, %v3015_v34  ;;  %v3329_v36 = vadd.f32 %v3328_v11, %v6125_v54  ;;  %v3767_v0 = vrot.slane %v6147_v53, 3 }
 0x698   : >> { %v6156_v39 = vsel %vm2297_vm14, %v3916_v4, %v3915_v3  ;;  %v3755_v2 = vrot.slane %v3754_v48, 1  ;;  %v3762_v7 = vrot.slane %v3761_v60, 2 }
 0x699   : >> { %v3077_v52 = vsel %vm703_vm2, %v3073_v63, 0.0  ;;  %v3076_v5 = vsel %vm703_vm2, %v3072_v1, 0.0  ;;  %v3330_v63 = vrot.slane %v3329_v36, 2 }
 0x69a   : >> { %v3078_v47 = vadd.f32 %v3077_v52, %v3076_v5  ;;  %v3027_v56 = vpop.permute.xlu1 %3026  ;;  %v3023_v6 = vpop.permute.xlu0 %3022  ;;  %v3756_v33 = vadd.f32 %v3755_v2, %v3754_v48  ;;  %v3763_v51 = vadd.f32 %v3762_v7, %v3761_v60  ;;  %v3636_v2 = vrot.slane %v6147_v53, 4 }
 0x69b   : >> { %v3075_v22 = vmul.f32 %v5945_v61, %v3027_v56  ;;  %v3074_v55 = vmul.f32 %v5947_v62, %v3023_v6  ;;  %v3094_v61 = vrot.slane %v5855_v14, 4  ;;  %v3095_v62 = vrot.slane %v5855_v14, 5  ;;  %v4661_v48 = vpop.eup %4660 }
 0x69c   : >> { %v3079_v40 = vrot.slane %v3078_v47, 4  ;;  %v3764_v8 = vrot.slane %v3763_v51, 1  ;;  %v3770_v54 = vadd.f32 %v3766_v9, %v3756_v33 }
 0x69d   : >> { %v3086_v27 = vsel %vm703_vm2, %v3075_v22, 0.0  ;;  %v3085_v50 = vsel %vm703_vm2, %v3074_v55, 0.0  ;;  %v4663_v56 = vpop.eup %4662 }
 0x69e   : >> { %v3080_v41 = vadd.f32 %v3079_v40, %v3078_v47  ;;  %v3087_v3 = vadd.f32 %v3086_v27, %v3085_v50  ;;  %v3561_v4 = vpop.permute.xlu1 %3560  ;;  %v3557_v32 = vpop.permute.xlu0 %3556  ;;  %v3765_v15 = vadd.f32 %v3764_v8, %v3763_v51  ;;  %v3637_v47 = vrot.slane %v6147_v53, 5 }
 0x69f   : >> { %v3615_v34 = vmul.f32 %v6096_v29, %v3561_v4  ;;  %v3614_v60 = vmul.f32 %v6098_v17, %v3557_v32  ;;  %v3847_v17 = vmul.f32 %v4661_v48, %v6121_v46  ;;  %v3889_v22 = vrot.slane %v3770_v54, 6 }
 0x6a0   : >> { %v3081_v1 = vrot.slane %v3080_v41, 2  ;;  %v3088_v11 = vrot.slane %v3087_v3, 4  ;;  %v3771_v7 = vadd.f32 %v3767_v0, %v3765_v15  ;;  %v3331_v0 = vadd.f32 %v3330_v63, %v3329_v36 }
 0x6a1   : >> { %v3619_v52 = vsel %vm703_vm2, %v3615_v34, 0.0  ;;  %v3618_v5 = vsel %vm703_vm2, %v3614_v60, 0.0  ;;  %v3843_v36 = vmul.f32 %v3835_v25, %v6068_v13 }
 0x6a2   : >> { %v3082_v6 = vadd.f32 %v3081_v1, %v3080_v41  ;;  %v3089_v9 = vadd.f32 %v3088_v11, %v3087_v3  ;;  %v3620_v33 = vadd.f32 %v3619_v52, %v3618_v5  ;;  %v3569_v51 = vpop.permute.xlu1 %3568  ;;  %v3565_v29 = vpop.permute.xlu0 %3564  ;;  %v3890_v55 = vrot.slane %v3771_v7, 5 }
 0x6a3   : >> { %v3617_v40 = vmul.f32 %v6102_v20, %v3569_v51  ;;  %v3616_v8 = vmul.f32 %v6104_v19, %v3565_v29  ;;  %v3870_v41 = vrot.slane %v6151_v30, 4  ;;  %v3846_v19 = vmul.f32 %v4663_v56, %v6123_v45 }
 0x6a4   : >> { %v3083_v27 = vrot.slane %v3082_v6, 1  ;;  %v3090_v50 = vrot.slane %v3089_v9, 2  ;;  %v3621_v4 = vrot.slane %v3620_v33, 4  ;;  %v6183_v32 = vsel %vm2297_vm14, %v3890_v55, %v3889_v22 }
 0x6a5   : >> { %v3628_v3 = vsel %vm703_vm2, %v3617_v40, 0.0  ;;  %v3627_v15 = vsel %vm703_vm2, %v3616_v8, 0.0  ;;  %v3842_v11 = vmul.f32 %v3835_v25, %v6070_v24  ;;  %v3332_v7 = vrot.slane %v3331_v0, 1 }
 0x6a6   : >> { %v3084_v46 = vadd.f32 %v3083_v27, %v3082_v6  ;;  %v3091_v48 = vadd.f32 %v3090_v50, %v3089_v9  ;;  %v3622_v54 = vadd.f32 %v3621_v4, %v3620_v33  ;;  %v3259_v34 = vpop.permute.xlu1 %3258  ;;  %v3255_v20 = vpop.permute.xlu0 %3254  ;;  %v3629_v60 = vadd.f32 %v3628_v3, %v3627_v15 }
 0x6a7   : >> { %v3313_v63 = vmul.f32 %v6006_v12, %v3259_v34  ;;  %v3312_v1 = vmul.f32 %v6008_v49, %v3255_v20  ;;  %v3871_v6 = vadd.f32 %v3870_v41, %v6151_v30  ;;  %v6198_v25 = vadd.f32 %v3847_v17, %v3843_v36  }
 0x6a8   : >> { %v3092_v52 = vrot.slane %v3091_v48, 1  ;;  %v3623_v5 = vrot.slane %v3622_v54, 2  ;;  %v3630_v9 = vrot.slane %v3629_v60, 4  ;;  %v3098_v45 = vadd.f32 %v3094_v61, %v3084_v46 }
 0x6a9   : >> { %v3317_v33 = vsel %vm703_vm2, %v3313_v63, 0.0  ;;  %v3316_v51 = vsel %vm703_vm2, %v3312_v1, 0.0  ;;  %v3333_v40 = vadd.f32 %v3332_v7, %v3331_v0  ;;  %v3872_v50 = vrot.slane %v3871_v6, 2 }
 0x6aa   : >> { %v3093_v56 = vadd.f32 %v3092_v52, %v3091_v48  ;;  %v3624_v13 = vadd.f32 %v3623_v5, %v3622_v54  ;;  %v3318_v29 = vadd.f32 %v3317_v33, %v3316_v51  ;;  %v3368_v22 = vpop.permute.xlu1 %3367  ;;  %v3364_v12 = vpop.permute.xlu0 %3363  ;;  %v3631_v55 = vadd.f32 %v3630_v9, %v3629_v60 }
 0x6ab   : >> { %v3503_v49 = vmul.f32 %v6029_v43, %v3368_v22  ;;  %v3502_v24 = vmul.f32 %v6031_v18, %v3364_v12  ;;  %v3921_v3 = vrot.slane %v3098_v45, 4  ;;  %v3338_v60 = vadd.f32 %v3334_v10, %v3333_v40 }
 0x6ac   : >> { %v3099_v30 = vadd.f32 %v3095_v62, %v3093_v56  ;;  %v3625_v8 = vrot.slane %v3624_v13, 1  ;;  %v3319_v27 = vrot.slane %v3318_v29, 4  ;;  %v3632_v61 = vrot.slane %v3631_v55, 2 }
 0x6ad   : >> { %v3507_v4 = vsel %vm703_vm2, %v3503_v49, 0.0  ;;  %v3506_v41 = vsel %vm703_vm2, %v3502_v24, 0.0  ;;  %v3873_v52 = vadd.f32 %v3872_v50, %v3871_v6 }
 0x6ae   : >> { %v3922_v15 = vrot.slane %v3099_v30, 3  ;;  %v3320_v46 = vadd.f32 %v3319_v27, %v3318_v29  ;;  %v3508_v43 = vadd.f32 %v3507_v4, %v3506_v41  ;;  %v3376_v48 = vpop.permute.xlu1 %3375  ;;  %v3372_v18 = vpop.permute.xlu0 %3371  ;;  %v3626_v17 = vadd.f32 %v3625_v8, %v3624_v13 }
 0x6af   : >> { %v3633_v54 = vadd.f32 %v3632_v61, %v3631_v55  ;;  %v3505_v0 = vmul.f32 %v6016_v21, %v3376_v48  ;;  %v3504_v62 = vmul.f32 %v6018_v57, %v3372_v18  ;;  %v6207_v29 = vadd.f32 %v3846_v19, %v3842_v11  }
 0x6b0   : >> { %v3923_v34 = vsel %vm2304_vm15, %v3922_v15, %v3921_v3  ;;  %v3321_v20 = vrot.slane %v3320_v46, 2  ;;  %v3509_v36 = vrot.slane %v3508_v43, 4  ;;  %v3640_v51 = vadd.f32 %v3636_v2, %v3626_v17  ;;  %v2790_v17 = vld [vmem:[%s2788_s21 + $0x8] sm:$0xff] }
 0x6b1   : >> { %v3634_v63 = vrot.slane %v3633_v54, 1  ;;  %v3516_v1 = vsel %vm703_vm2, %v3505_v0, 0.0  ;;  %v3515_v7 = vsel %vm703_vm2, %v3504_v62, 0.0  ;;  %v3910_v2 = vrot.slane %v3338_v60, 7 }
 0x6b2   : >> { %v3322_v5 = vadd.f32 %v3321_v20, %v3320_v46  ;;  %v3510_v9 = vadd.f32 %v3509_v36, %v3508_v43  ;;  %v3517_v21 = vadd.f32 %v3516_v1, %v3515_v7  ;;  %v3801_v33 = vpop.permute.xlu1 %3800  ;;  %v3797_v57 = vpop.permute.xlu0 %3796  ;;  %v3874_v30 = vrot.slane %v3873_v52, 1 }
 0x6b3   : >> { %v3635_v45 = vadd.f32 %v3634_v63, %v3633_v54  ;;  %v3855_v19 = vmul.f32 %v6198_v25, %v3801_v33  ;;  %v3854_v11 = vmul.f32 %v6207_v29, %v3797_v57  ;;  %v3896_v8 = vrot.slane %v3640_v51, 4 }
 0x6b4   : >> { %v3323_v10 = vrot.slane %v3322_v5, 1  ;;  %v3511_v56 = vrot.slane %v3510_v9, 2  ;;  %v3518_v13 = vrot.slane %v3517_v21, 4  ;;  %v3526_v3 = vrot.slane %v6147_v53, 6 }
 0x6b5   : >> { %v3641_v22 = vadd.f32 %v3637_v47, %v3635_v45  ;;  %v3859_v6 = vsel %vm703_vm2, %v3855_v19, 0.0  ;;  %v3858_v12 = vsel %vm703_vm2, %v3854_v11, 0.0  ;;  %v3876_v18 = vrot.slane %v6147_v53, 1 }
 0x6b6   : >> { %v3324_v55 = vadd.f32 %v3323_v10, %v3322_v5  ;;  %v3512_v49 = vadd.f32 %v3511_v56, %v3510_v9  ;;  %v3519_v24 = vadd.f32 %v3518_v13, %v3517_v21  ;;  %v3860_v40 = vadd.f32 %v3859_v6, %v3858_v12  ;;  %v3948_v6 = vld [vmem:[#allocation3 + $0x8] sm:$0xff] (%p2769_p5) }
 0x6b7   : >> { %v3897_v27 = vrot.slane %v3641_v22, 3  ;;  %v3875_v0 = vadd.f32 %v3874_v30, %v3873_v52  ;;  %v3947_v22 = vld [vmem:[#allocation3] sm:$0xff] (%p2769_p5) }
 0x6b8   : >> { %v3337_v50 = vadd.f32 %v3324_v55, %v5855_v14  ;;  %v3513_v61 = vrot.slane %v3512_v49, 1  ;;  %v3520_v4 = vrot.slane %v3519_v24, 2  ;;  %v3861_v41 = vrot.slane %v3860_v40, 4 }
 0x6b9   : >> { %v3899_v47 = vsel %vm2304_vm15, %v3897_v27, %v3896_v8  ;;  %v3527_v14 = vrot.slane %v6147_v53, 7  ;;  %v3880_v9 = vadd.f32 %v3876_v18, %v3875_v0 }
 0x6ba   : >> { %v3911_v15 = vsel %vm2290_vm13, %v3910_v2, %v3337_v50  ;;  %v3514_v46 = vadd.f32 %v3513_v61, %v3512_v49  ;;  %v3521_v43 = vadd.f32 %v3520_v4, %v3519_v24  ;;  %v3862_v48 = vadd.f32 %v3861_v41, %v3860_v40  ;;  %v4223_v49 = vld [vmem:[%s6285_s4] ss:$0 sm:$0xff] (%p2769_p5) }
 0x6bb   : >> { %v3936_v54 = vsel %vm993_vm3, %v3911_v15, %v6156_v39  ;;  %v3883_v52 = vrot.slane %v3880_v9, 7  ;;  %v6343_v15 = vmov %v6139_v31  ;;  %v4665_v31 = vld [vmem:[%s6345_s22 + $0x10] sm:$0xff] (%p2769_p5)  }
 0x6bc   : >> { %v3937_v62 = vsel %vm2338_vm1, %v3936_v54, %v3923_v34  ;;  %v3522_v20 = vrot.slane %v3521_v43, 1  ;;  %v3863_v36 = vrot.slane %v3862_v48, 2  ;;  %v3530_v1 = vadd.f32 %v3526_v3, %v3514_v46 }
 0x6bd   : >> { %v3938_v60 = vsel %vm2340_vm6, %v3937_v62, %v5993_v23  ;;  %v2789_v23 = vld [vmem:[%s2788_s21] sm:$0xff] }
 0x6be   : >> { %v3940_v63 = vadd.f32 %v3938_v60, %v2790_v17  ;;  %v3523_v7 = vadd.f32 %v3522_v20, %v3521_v43  ;;  %v3864_v5 = vadd.f32 %v3863_v36, %v3862_v48  ;;  %v3903_v39 = vrot.slane %v3530_v1, 2 }
 0x6c0   : >> { %3942 = vst.msk [vmem:[%s2788_s21 + $0x8] sm:$0xff] %vm703_vm2, %v3940_v63  ;;  %v3531_v21 = vadd.f32 %v3527_v14, %v3523_v7  ;;  %v3865_v33 = vrot.slane %v3864_v5, 1 }
 0x6c2   : >> { %v3904_v57 = vrot.slane %v3531_v21, 1  ;;  %v3866_v51 = vadd.f32 %v3865_v33, %v3864_v5 }
 0x6c4   : >> { %v3906_v34 = vsel %vm2311_vm5, %v3904_v57, %v3903_v39  ;;  %v3879_v45 = vadd.f32 %v3866_v51, %v6147_v53  ;;  %v4664_v53 = vld [vmem:[%s6345_s22 + $0x18] sm:$0xff] (%p2769_p5)  }
 0x6c5   : > { %4344 = vmatprep.subr.bf16.mxu1 (%p2769_p5), %v4664_v53 }
 0x6c6   : >> { %v3885_v19 = vsel %vm2290_vm13, %v3883_v52, %v3879_v45  ;;  %4345 = vmatpush3.bf16.msra.mxu1 (%p2769_p5), %v4664_v53 }
 0x6c7   : >> { %v3931_v11 = vsel %vm993_vm3, %v3885_v19, %v6183_v32  ;;  %v4666_v32 = vld [vmem:[%s6345_s22 + $0x8] sm:$0xff] (%p2769_p5)   ;;  %4346 = vmatprep.subr.bf16.mxu1 (%p2769_p5), %v4665_v31 }
 0x6c8   : >> { %v3933_v10 = vsel %vm2338_vm1, %v3931_v11, %v3899_v47  ;;  %2771 = sbr.rel (!%p2769_p5) target bundleno = 1470 (0x5be), region = 159 }
 0x6c9   : >> { %v3935_v56 = vsel %vm2340_vm6, %v3933_v10, %v3906_v34 }
 0x6ca   : >> { %v3939_v13 = vadd.f32 %v3935_v56, %v2789_v23  ;;  %v6344_v23 = vmov %v6198_v25  ;;  %4347 = vmatpush3.bf16.msra.mxu1 (%p2769_p5), %v4665_v31 }
 0x6cb   : > { %4348 = vmatprep.subr.bf16.mxu1 (%p2769_p5), %v4666_v32 }
 0x6cc   : >> { %3941 = vst.msk [vmem:[%s2788_s21] sm:$0xff] %vm703_vm2, %v3939_v13 }
 0x6ce   : > { %4349 = vmatpush3.bf16.msra.mxu1 %v4666_v32 }
 0x6cf   : > { %4350 = vmatprep.subr.bf16.mxu1 %v4667_v16 }
 0x6d2   : > { %4351 = vmatpush3.bf16.msra.mxu1 %v4667_v16 }
 0x6d3   : > { %v3943_v25 = vld [vmem:[#allocation7] sm:$0xff]  ;;  %v3944_v29 = vld [vmem:[#allocation7 + $0x8] sm:$0xff]  ;;  %v3945_v35 = vld [vmem:[#allocation7 + $0x10] sm:$0xff] }
 0x6d4   : > { %v3951_v12 = vmul.f32 %v3947_v22, %v3943_v25  ;;  %v3952_v59 = vmul.f32 %v3948_v6, %v3944_v29  ;;  %v3946_v42 = vld [vmem:[#allocation7 + $0x18] sm:$0xff]  ;;  %v3953_v37 = vmul.f32 %v3949_v28, %v3945_v35 }
 0x6d5   : > { %v3954_v38 = vmul.f32 %v3950_v58, %v3946_v42 }
 0x6d6   : > { %v3955_v26 = vpack.c.bf16 %v3952_v59, %v3951_v12 }
 0x6d7   : > { %v3956_v44 = vpack.c.bf16 %v3954_v38, %v3953_v37 }
 0x6d8   : > { %4352 = vmatprep.mubr.msk.bf16.mxu1 %vm703_vm2, %v3955_v26 }
 0x6d9   : > { %4353 = vmatmul.mubr.msk.bf16.vlgmr.msra.gmra.mxu1 %vm703_vm2, %v3956_v44 }
 0x799   : > { %v4354_v55 = vpop.f32.mrf.mxu1 }
 0x79a   : > { %v4045_v27 = vadd.f32 %v4354_v55, %v4223_v49 }
 0x79b   : > { %v4036_v24 = vpop.f32.mrf.mxu1 }
 0x79c   : > { %v4037_v40 = vadd.f32 %v4223_v49, %v4036_v24  ;;  %4053 = vst [vmem:[%s4880_s20 + $0x10] sm:$0xff] %v4045_v27 }
 0x79d   : > { %v4355_v2 = vpop.f32.mrf.mxu1 }
 0x79e   : > { %4051 = vst [vmem:[%s4880_s20] sm:$0xff] %v4037_v40  ;;  %v4048_v50 = vadd.f32 %v4355_v2, %v4223_v49 }
 0x79f   : > { %v4039_v30 = vpop.f32.mrf.mxu1 }
 0x7a0   : > { %v4040_v8 = vadd.f32 %v4223_v49, %v4039_v30  ;;  %4054 = vst [vmem:[%s4880_s20 + $0x18] sm:$0xff] %v4048_v50 }
 0x7a2   : > { %4052 = vst [vmem:[%s4880_s20 + $0x8] sm:$0xff] %v4040_v8 }
 0x7a3 PF: > { %s6346_s30 = sld [smem:[#allocation8_spill]] }
 0x7a9   : > { %s29_s0 = sadd.s32 1, %s6346_s30  }
 0x7aa   : > { %p26_p6 = scmp.ge.s32.totalorder %s29_s0, 4  }
 0x7ac   :  { %28 = sbr.rel (!%p26_p6) target bundleno = 5 (0x5), region = 170 }

</bundles_post_ra>
